<compile_context>
chip_gen: v5e
topology: v5e:2x2
jax: 0.10.0
libtpu: 0.0.40
codegen_flags: <defaults>
</compile_context>

<pallas_src>
import numpy as np
import jax
import jax.numpy as jnp
from jax.experimental import pallas as pl
from jax.experimental.pallas import tpu as pltpu


# ------------------------------ fused kernel -------------------------------

def _make_nista_kernel(N, L, CL, n_class, unfoldings):
    M = N * L
    C3 = CL[3]

    def kernel(x_ref,
               w1f_ref, w2f_ref, w3f_ref,
               w1t_ref, w2t_ref, w3t_ref,
               mu_ref,
               b1_ref, b2_ref, b3_ref,
               l1_ref, l2_ref, l3_ref,
               wc_ref, bc_ref,
               out_ref):
        x = x_ref[...]                                    # (M, C0)
        w1f = w1f_ref[...]; w2f = w2f_ref[...]; w3f = w3f_ref[...]
        w1t = w1t_ref[...]; w2t = w2t_ref[...]; w3t = w3t_ref[...]
        mu1 = mu_ref[0]; mu2 = mu_ref[1]; mu3 = mu_ref[2]  # SMEM scalars
        b1 = b1_ref[...]; b2 = b2_ref[...]; b3 = b3_ref[...]
        lam1 = l1_ref[...]; lam2 = l2_ref[...]; lam3 = l3_ref[...]

        # Boundary masks along the flattened (N*L) row axis: rows with l == 0 /
        # l == L-1 of each batch item.  These are exactly the rows where the
        # roll-based shifts wrap, so masking them also fixes batch boundaries.
        row = jax.lax.broadcasted_iota(jnp.int32, (M, 1), 0)
        is_first = row == 0
        is_last = row == (L - 1)
        for n in range(1, N):
            is_first = jnp.logical_or(is_first, row == n * L)
            is_last = jnp.logical_or(is_last, row == n * L + L - 1)

        def shift_prev(v):            # value at l-1 (zero-pad at l == 0)
            return jnp.where(is_first, 0.0, pltpu.roll(v, shift=1, axis=0))

        def shift_next(v):            # value at l+1 (zero-pad at l == L-1)
            return jnp.where(is_last, 0.0, pltpu.roll(v, shift=M - 1, axis=0))

        def tap_mm(a, w):
            # (M, cin) @ (cin, cout); trivial contraction stays on the VPU.
            if a.shape[1] == 1:
                return a * w                              # (M,1) * (1,cout)
            return jnp.dot(a, w, preferred_element_type=jnp.float32)

        def conv3(v, w):
            # Same-length K=3 / pad=1 conv; w holds the 3 taps as (3, Cin, Cout).
            return (tap_mm(shift_prev(v), w[0])
                    + tap_mm(v, w[1])
                    + tap_mm(shift_next(v), w[2]))

        def soft(z, lam):             # active_type='Soft'
            return (jnp.where(z > lam, z - lam, 0.0)
                    + jnp.where(z < -lam, z + lam, 0.0))

        # ------------------------------ encoder ------------------------------
        g1 = soft(mu1 * conv3(x, w1f) + b1, lam1)
        g2 = soft(mu2 * conv3(g1, w2f) + b2, lam2)
        g3 = soft(mu3 * conv3(g2, w3f) + b3, lam3)

        # ---------------- ISTA unfoldings (direct_connect=False) -------------
        for _ in range(unfoldings):
            g2 = conv3(g3, w3t)
            g1 = conv3(g2, w2t)
            g1 = soft(g1 - mu1 * conv3(conv3(g1, w1t) - x, w1f) + b1, lam1)
            g2 = soft(g2 - mu2 * conv3(conv3(g2, w2t) - g1, w2f) + b2, lam2)
            g3 = soft(g3 - mu3 * conv3(conv3(g3, w3t) - g2, w3f) + b3, lam3)

        # -------- |gamma3| max-pool over L + linear + log_softmax ------------
        # TODO(synk): max_pool1d's return_indices output is not produced
        # (it is unused upstream).
        pooled = jnp.max(jnp.abs(g3).reshape(N, L, C3), axis=1)      # (N, C3)
        logits = jnp.dot(pooled, wc_ref[...],
                         preferred_element_type=jnp.float32) + bc_ref[...]
        mx = jnp.max(logits, axis=1, keepdims=True)
        lse = mx + jnp.log(jnp.sum(jnp.exp(logits - mx), axis=1, keepdims=True))
        out_ref[...] = logits - lse                                   # log_softmax

    return kernel


# ------------------------------ host wrapper --------------------------------

def nista_forward(x_ncl, params, opt):
    """NISTA_Net forward (all_out=False). x_ncl: (N, C0, L) -> (N, n_class)."""
    CL, KL, SL, PL = opt['CL'], opt['KL'], opt['SL'], opt['PL']
    assert all(k == 3 for k in KL) and all(s == 1 for s in SL) and \
        all(p == 1 for p in PL), "fused kernel assumes K=3 / stride=1 / pad=1"
    n_class = opt['n_class']
    T = opt['unfoldings']
    N, C0, L = x_ncl.shape
    M = N * L
    C1, C2, C3 = CL[1], CL[2], CL[3]
    f32 = jnp.float32

    # Flattened channels-last rows (n*L + l, c).
    x2 = jnp.transpose(x_ncl, (0, 2, 1)).reshape(M, C0).astype(f32)

    # Conv / conv-transpose tap matrices, hoisted & precomputed once.
    def fwd_taps(w):                  # taps[k, ci, co] = W[co, ci, k]
        return jnp.transpose(w, (2, 1, 0)).astype(f32)

    def tra_taps(w):                  # conv_transpose1d == conv1d w/ flipped,
        return jnp.transpose(jnp.flip(w, axis=2), (2, 0, 1)).astype(f32)  # swapped taps

    w1f, w2f, w3f = fwd_taps(params['W1']), fwd_taps(params['W2']), fwd_taps(params['W3'])
    w1t, w2t, w3t = tra_taps(params['W1']), tra_taps(params['W2']), tra_taps(params['W3'])

    mu = jnp.concatenate([params['mu1'].reshape(1), params['mu2'].reshape(1),
                          params['mu3'].reshape(1)]).astype(f32)      # (3,) SMEM
    b1 = params['b1'].reshape(1, C1).astype(f32)
    b2 = params['b2'].reshape(1, C2).astype(f32)
    b3 = params['b3'].reshape(1, C3).astype(f32)
    l1 = params['lam1'].reshape(1, C1).astype(f32)
    l2 = params['lam2'].reshape(1, C2).astype(f32)
    l3 = params['lam3'].reshape(1, C3).astype(f32)
    wc_t = params['Wc'].T.astype(f32)                                 # (C3, n_class)
    bc = params['bc'].reshape(1, n_class).astype(f32)

    kernel = _make_nista_kernel(N, L, CL, n_class, T)

    def vspec(shape):
        return pl.BlockSpec(shape, lambda *_: (0,) * len(shape))

    in_specs = [
        vspec((M, C0)),
        vspec((3, C0, C1)), vspec((3, C1, C2)), vspec((3, C2, C3)),
        vspec((3, C1, C0)), vspec((3, C2, C1)), vspec((3, C3, C2)),
        pl.BlockSpec(memory_space=pltpu.MemorySpace.SMEM),
        vspec((1, C1)), vspec((1, C2)), vspec((1, C3)),
        vspec((1, C1)), vspec((1, C2)), vspec((1, C3)),
        vspec((C3, n_class)), vspec((1, n_class)),
    ]

    return pl.pallas_call(
        kernel,
        grid=(1,),
        in_specs=in_specs,
        out_specs=pl.BlockSpec((N, n_class), lambda *_: (0, 0)),
        out_shape=jax.ShapeDtypeStruct((N, n_class), f32),
        compiler_params=pltpu.CompilerParams(
            dimension_semantics=("arbitrary",)),
    )(x2, w1f, w2f, w3f, w1t, w2t, w3t, mu,
      b1, b2, b3, l1, l2, l3, wc_t, bc)


# -------------------- plain-JAX reference (validation) ----------------------

def _ref_conv1d(x_nlc, w, pad):
    n, l, cin = x_nlc.shape
    cout, _, k = w.shape
    lout = l + 2 * pad - k + 1
    xp = jnp.pad(x_nlc, ((0, 0), (pad, pad), (0, 0)))
    cols = jnp.concatenate([xp[:, i:i + lout, :] for i in range(k)], axis=-1)
    wmat = jnp.transpose(w, (2, 1, 0)).reshape(k * cin, cout)
    return (cols.reshape(n * lout, k * cin) @ wmat).reshape(n, lout, cout)


def _ref_forward(x_ncl, p, opt):
    pl0, pl1, pl2 = opt['PL']
    x = jnp.transpose(x_ncl, (0, 2, 1))

    def convT(v, w, pad):
        k = w.shape[2]
        return _ref_conv1d(v, jnp.transpose(jnp.flip(w, 2), (1, 0, 2)), k - 1 - pad)

    def soft(z, lam):
        return jnp.where(z > lam, z - lam, 0.) + jnp.where(z < -lam, z + lam, 0.)

    mu1, mu2, mu3 = (p['mu1'].reshape(()), p['mu2'].reshape(()), p['mu3'].reshape(()))
    b1, b2, b3 = (p['b1'].reshape(1, 1, -1), p['b2'].reshape(1, 1, -1), p['b3'].reshape(1, 1, -1))
    L1, L2, L3 = (p['lam1'].reshape(1, 1, -1), p['lam2'].reshape(1, 1, -1), p['lam3'].reshape(1, 1, -1))

    g1 = soft(mu1 * _ref_conv1d(x, p['W1'], pl0) + b1, L1)
    g2 = soft(mu2 * _ref_conv1d(g1, p['W2'], pl1) + b2, L2)
    g3 = soft(mu3 * _ref_conv1d(g2, p['W3'], pl2) + b3, L3)
    for _ in range(opt['unfoldings']):
        g2 = convT(g3, p['W3'], pl2)
        g1 = convT(g2, p['W2'], pl1)
        g1 = soft(g1 - mu1 * _ref_conv1d(convT(g1, p['W1'], pl0) - x, p['W1'], pl0) + b1, L1)
        g2 = soft(g2 - mu2 * _ref_conv1d(convT(g2, p['W2'], pl1) - g1, p['W2'], pl1) + b2, L2)
        g3 = soft(g3 - mu3 * _ref_conv1d(convT(g3, p['W3'], pl2) - g2, p['W3'], pl2) + b3, L3)
    pooled = jnp.max(jnp.abs(g3), axis=1)
    logits = pooled @ p['Wc'].T + p['bc'][None, :]
    return jax.nn.log_softmax(logits, axis=1)


# ----------------------------------- main ------------------------------------

if __name__ == "__main__":
    opt = dict(CL=[1, 4, 8, 16], KL=[3, 3, 3], SL=[1, 1, 1], PL=[1, 1, 1],
               unfoldings=2, n_class=10)
    N, L = 2, 16
    C, K = opt['CL'], opt['KL']

    key = jax.random.PRNGKey(0)
    kx, k1, k2, k3, kw, kb = jax.random.split(key, 6)

    W1 = (0.1 / np.sqrt(C[0] * K[0])) * jax.random.normal(k1, (C[1], C[0], K[0]), jnp.float32)
    W2 = (0.1 / np.sqrt(C[1] * K[1])) * jax.random.normal(k2, (C[2], C[1], K[1]), jnp.float32)
    W3 = (0.1 / np.sqrt(C[2] * K[2])) * jax.random.normal(k3, (C[3], C[2], K[2]), jnp.float32)
    bound = 1.0 / np.sqrt(C[3])
    Wc = jax.random.uniform(kw, (opt['n_class'], C[3]), jnp.float32, -bound, bound)
    bc = jax.random.uniform(kb, (opt['n_class'],), jnp.float32, -bound, bound)

    params = dict(
        W1=W1, W2=W2, W3=W3,
        mu1=jnp.ones((1, 1, 1), jnp.float32),
        mu2=jnp.ones((1, 1, 1), jnp.float32),
        mu3=jnp.ones((1, 1, 1), jnp.float32),
        b1=jnp.zeros((1, C[1], 1), jnp.float32),
        b2=jnp.zeros((1, C[2], 1), jnp.float32),
        b3=jnp.zeros((1, C[3], 1), jnp.float32),
        lam1=0.001 * jnp.ones((1, C[1], 1), jnp.float32),
        lam2=0.001 * jnp.ones((1, C[2], 1), jnp.float32),
        lam3=0.001 * jnp.ones((1, C[3], 1), jnp.float32),
        Wc=Wc, bc=bc,
    )

    # PyTorch conv1d layout (N, C, L).
    x_ncl = jax.random.normal(kx, (N, C[0], L), jnp.float32)

    forward = jax.jit(lambda xv, pv: nista_forward(xv, pv, opt))
    out = jax.block_until_ready(forward(x_ncl, params))

    ref = _ref_forward(x_ncl, params, opt)
    np.testing.assert_allclose(np.asarray(out), np.asarray(ref), rtol=1e-4, atol=1e-5)

    assert out.shape == (N, opt['n_class'])
    assert bool(jnp.all(jnp.isfinite(out)))
    print("KERNEL_OK")
</pallas_src>

<mosaic_0001>
module attributes {stable_mosaic.version = 11 : i64} {
  func.func @kernel(%arg0: i32, %arg1: memref<32x1xf32, #tpu.memory_space<vmem>>, %arg2: memref<3x1x4xf32, #tpu.memory_space<vmem>>, %arg3: memref<3x4x8xf32, #tpu.memory_space<vmem>>, %arg4: memref<3x8x16xf32, #tpu.memory_space<vmem>>, %arg5: memref<3x4x1xf32, #tpu.memory_space<vmem>>, %arg6: memref<3x8x4xf32, #tpu.memory_space<vmem>>, %arg7: memref<3x16x8xf32, #tpu.memory_space<vmem>>, %arg8: memref<3xf32, #tpu.memory_space<smem>>, %arg9: memref<1x4xf32, #tpu.memory_space<vmem>>, %arg10: memref<1x8xf32, #tpu.memory_space<vmem>>, %arg11: memref<1x16xf32, #tpu.memory_space<vmem>>, %arg12: memref<1x4xf32, #tpu.memory_space<vmem>>, %arg13: memref<1x8xf32, #tpu.memory_space<vmem>>, %arg14: memref<1x16xf32, #tpu.memory_space<vmem>>, %arg15: memref<16x10xf32, #tpu.memory_space<vmem>>, %arg16: memref<1x10xf32, #tpu.memory_space<vmem>>, %arg17: memref<2x10xf32, #tpu.memory_space<vmem>>) attributes {dimension_semantics = [#tpu.dimension_semantics<arbitrary>], iteration_bounds = array<i64: 1>, scalar_prefetch = 0 : i64, scratch_operands = 0 : i64, tpu.core_type = #tpu.core_type<tc>, window_params = [{pipeline_mode = #tpu.pipeline_mode<synchronous>, transform_indices = @transform_0, window_bounds = array<i64: 32, 1>}, {pipeline_mode = #tpu.pipeline_mode<synchronous>, transform_indices = @transform_1, window_bounds = array<i64: 3, 1, 4>}, {pipeline_mode = #tpu.pipeline_mode<synchronous>, transform_indices = @transform_2, window_bounds = array<i64: 3, 4, 8>}, {pipeline_mode = #tpu.pipeline_mode<synchronous>, transform_indices = @transform_3, window_bounds = array<i64: 3, 8, 16>}, {pipeline_mode = #tpu.pipeline_mode<synchronous>, transform_indices = @transform_4, window_bounds = array<i64: 3, 4, 1>}, {pipeline_mode = #tpu.pipeline_mode<synchronous>, transform_indices = @transform_5, window_bounds = array<i64: 3, 8, 4>}, {pipeline_mode = #tpu.pipeline_mode<synchronous>, transform_indices = @transform_6, window_bounds = array<i64: 3, 16, 8>}, {transform_indices = @transform_7, window_bounds = array<i64: 3>}, {pipeline_mode = #tpu.pipeline_mode<synchronous>, transform_indices = @transform_8, window_bounds = array<i64: 1, 4>}, {pipeline_mode = #tpu.pipeline_mode<synchronous>, transform_indices = @transform_9, window_bounds = array<i64: 1, 8>}, {pipeline_mode = #tpu.pipeline_mode<synchronous>, transform_indices = @transform_10, window_bounds = array<i64: 1, 16>}, {pipeline_mode = #tpu.pipeline_mode<synchronous>, transform_indices = @transform_11, window_bounds = array<i64: 1, 4>}, {pipeline_mode = #tpu.pipeline_mode<synchronous>, transform_indices = @transform_12, window_bounds = array<i64: 1, 8>}, {pipeline_mode = #tpu.pipeline_mode<synchronous>, transform_indices = @transform_13, window_bounds = array<i64: 1, 16>}, {pipeline_mode = #tpu.pipeline_mode<synchronous>, transform_indices = @transform_14, window_bounds = array<i64: 16, 10>}, {pipeline_mode = #tpu.pipeline_mode<synchronous>, transform_indices = @transform_15, window_bounds = array<i64: 1, 10>}, {pipeline_mode = #tpu.pipeline_mode<synchronous>, transform_indices = @transform_16, window_bounds = array<i64: 2, 10>}]} {
    %c0 = arith.constant 0 : index
    %c0_0 = arith.constant 0 : index
    %0 = vector.load %arg1[%c0, %c0_0] : memref<32x1xf32, #tpu.memory_space<vmem>>, vector<32x1xf32>
    %c0_1 = arith.constant 0 : index
    %c0_2 = arith.constant 0 : index
    %c0_3 = arith.constant 0 : index
    %1 = vector.load %arg2[%c0_1, %c0_2, %c0_3] : memref<3x1x4xf32, #tpu.memory_space<vmem>>, vector<3x1x4xf32>
    %c0_4 = arith.constant 0 : index
    %c0_5 = arith.constant 0 : index
    %c0_6 = arith.constant 0 : index
    %2 = vector.load %arg3[%c0_4, %c0_5, %c0_6] : memref<3x4x8xf32, #tpu.memory_space<vmem>>, vector<3x4x8xf32>
    %c0_7 = arith.constant 0 : index
    %c0_8 = arith.constant 0 : index
    %c0_9 = arith.constant 0 : index
    %3 = vector.load %arg4[%c0_7, %c0_8, %c0_9] : memref<3x8x16xf32, #tpu.memory_space<vmem>>, vector<3x8x16xf32>
    %c0_10 = arith.constant 0 : index
    %c0_11 = arith.constant 0 : index
    %c0_12 = arith.constant 0 : index
    %4 = vector.load %arg5[%c0_10, %c0_11, %c0_12] : memref<3x4x1xf32, #tpu.memory_space<vmem>>, vector<3x4x1xf32>
    %c0_13 = arith.constant 0 : index
    %c0_14 = arith.constant 0 : index
    %c0_15 = arith.constant 0 : index
    %5 = vector.load %arg6[%c0_13, %c0_14, %c0_15] : memref<3x8x4xf32, #tpu.memory_space<vmem>>, vector<3x8x4xf32>
    %c0_16 = arith.constant 0 : index
    %c0_17 = arith.constant 0 : index
    %c0_18 = arith.constant 0 : index
    %6 = vector.load %arg7[%c0_16, %c0_17, %c0_18] : memref<3x16x8xf32, #tpu.memory_space<vmem>>, vector<3x16x8xf32>
    %c0_19 = arith.constant 0 : index
    %7 = memref.load %arg8[%c0_19] : memref<3xf32, #tpu.memory_space<smem>>
    %c1 = arith.constant 1 : index
    %8 = memref.load %arg8[%c1] : memref<3xf32, #tpu.memory_space<smem>>
    %c2 = arith.constant 2 : index
    %9 = memref.load %arg8[%c2] : memref<3xf32, #tpu.memory_space<smem>>
    %c0_20 = arith.constant 0 : index
    %c0_21 = arith.constant 0 : index
    %10 = vector.load %arg9[%c0_20, %c0_21] : memref<1x4xf32, #tpu.memory_space<vmem>>, vector<1x4xf32>
    %c0_22 = arith.constant 0 : index
    %c0_23 = arith.constant 0 : index
    %11 = vector.load %arg10[%c0_22, %c0_23] : memref<1x8xf32, #tpu.memory_space<vmem>>, vector<1x8xf32>
    %c0_24 = arith.constant 0 : index
    %c0_25 = arith.constant 0 : index
    %12 = vector.load %arg11[%c0_24, %c0_25] : memref<1x16xf32, #tpu.memory_space<vmem>>, vector<1x16xf32>
    %c0_26 = arith.constant 0 : index
    %c0_27 = arith.constant 0 : index
    %13 = vector.load %arg12[%c0_26, %c0_27] : memref<1x4xf32, #tpu.memory_space<vmem>>, vector<1x4xf32>
    %c0_28 = arith.constant 0 : index
    %c0_29 = arith.constant 0 : index
    %14 = vector.load %arg13[%c0_28, %c0_29] : memref<1x8xf32, #tpu.memory_space<vmem>>, vector<1x8xf32>
    %c0_30 = arith.constant 0 : index
    %c0_31 = arith.constant 0 : index
    %15 = vector.load %arg14[%c0_30, %c0_31] : memref<1x16xf32, #tpu.memory_space<vmem>>, vector<1x16xf32>
    %16 = tpu.iota {dimensions = array<i32: 0>} : vector<32x1xi32>
    %c0_i32 = arith.constant 0 : i32
    %17 = vector.broadcast %c0_i32 : i32 to vector<32x1xi32>
    %18 = arith.cmpi eq, %16, %17 : vector<32x1xi32>
    %c15_i32 = arith.constant 15 : i32
    %19 = vector.broadcast %c15_i32 : i32 to vector<32x1xi32>
    %20 = arith.cmpi eq, %16, %19 : vector<32x1xi32>
    %c16_i32 = arith.constant 16 : i32
    %21 = vector.broadcast %c16_i32 : i32 to vector<32x1xi32>
    %22 = arith.cmpi eq, %16, %21 : vector<32x1xi32>
    %23 = arith.ori %18, %22 : vector<32x1xi1>
    %c31_i32 = arith.constant 31 : i32
    %24 = vector.broadcast %c31_i32 : i32 to vector<32x1xi32>
    %25 = arith.cmpi eq, %16, %24 : vector<32x1xi32>
    %26 = arith.ori %20, %25 : vector<32x1xi1>
    %c1_i32 = arith.constant 1 : i32
    %27 = tpu.dynamic_rotate %0 by %c1_i32 dim 0 : vector<32x1xf32>, i32 -> vector<32x1xf32>
    %cst = arith.constant 0.000000e+00 : f32
    %28 = vector.broadcast %cst : f32 to vector<32x1xf32>
    %29 = arith.select %23, %28, %27 : vector<32x1xi1>, vector<32x1xf32>
    %30 = vector.extract_strided_slice %1 {offsets = [0, 0, 0], sizes = [1, 1, 4], strides = [1, 1, 1]} : vector<3x1x4xf32> to vector<1x1x4xf32>
    %31 = vector.shape_cast %30 : vector<1x1x4xf32> to vector<1x4xf32>
    %32 = vector.broadcast %29 : vector<32x1xf32> to vector<32x4xf32>
    %33 = vector.broadcast %31 : vector<1x4xf32> to vector<32x4xf32>
    %34 = arith.mulf %32, %33 : vector<32x4xf32>
    %35 = vector.extract_strided_slice %1 {offsets = [1, 0, 0], sizes = [1, 1, 4], strides = [1, 1, 1]} : vector<3x1x4xf32> to vector<1x1x4xf32>
    %36 = vector.shape_cast %35 : vector<1x1x4xf32> to vector<1x4xf32>
    %37 = vector.broadcast %0 : vector<32x1xf32> to vector<32x4xf32>
    %38 = vector.broadcast %36 : vector<1x4xf32> to vector<32x4xf32>
    %39 = arith.mulf %37, %38 : vector<32x4xf32>
    %40 = arith.addf %34, %39 : vector<32x4xf32>
    %c31_i32_32 = arith.constant 31 : i32
    %41 = tpu.dynamic_rotate %0 by %c31_i32_32 dim 0 : vector<32x1xf32>, i32 -> vector<32x1xf32>
    %cst_33 = arith.constant 0.000000e+00 : f32
    %42 = vector.broadcast %cst_33 : f32 to vector<32x1xf32>
    %43 = arith.select %26, %42, %41 : vector<32x1xi1>, vector<32x1xf32>
    %44 = vector.extract_strided_slice %1 {offsets = [2, 0, 0], sizes = [1, 1, 4], strides = [1, 1, 1]} : vector<3x1x4xf32> to vector<1x1x4xf32>
    %45 = vector.shape_cast %44 : vector<1x1x4xf32> to vector<1x4xf32>
    %46 = vector.broadcast %43 : vector<32x1xf32> to vector<32x4xf32>
    %47 = vector.broadcast %45 : vector<1x4xf32> to vector<32x4xf32>
    %48 = arith.mulf %46, %47 : vector<32x4xf32>
    %49 = arith.addf %40, %48 : vector<32x4xf32>
    %50 = vector.broadcast %7 : f32 to vector<32x4xf32>
    %51 = arith.mulf %50, %49 : vector<32x4xf32>
    %52 = vector.broadcast %10 : vector<1x4xf32> to vector<32x4xf32>
    %53 = arith.addf %51, %52 : vector<32x4xf32>
    %54 = vector.broadcast %13 : vector<1x4xf32> to vector<32x4xf32>
    %55 = arith.cmpf ogt, %53, %54 : vector<32x4xf32>
    %56 = vector.broadcast %13 : vector<1x4xf32> to vector<32x4xf32>
    %57 = arith.subf %53, %56 : vector<32x4xf32>
    %cst_34 = arith.constant 0.000000e+00 : f32
    %58 = vector.broadcast %cst_34 : f32 to vector<32x4xf32>
    %59 = arith.select %55, %57, %58 : vector<32x4xi1>, vector<32x4xf32>
    %cst_35 = arith.constant 0.000000e+00 : f32
    %60 = vector.broadcast %cst_35 : f32 to vector<1x4xf32>
    %61 = arith.subf %60, %13 : vector<1x4xf32>
    %62 = vector.broadcast %61 : vector<1x4xf32> to vector<32x4xf32>
    %63 = arith.cmpf olt, %53, %62 : vector<32x4xf32>
    %64 = vector.broadcast %13 : vector<1x4xf32> to vector<32x4xf32>
    %65 = arith.addf %53, %64 : vector<32x4xf32>
    %cst_36 = arith.constant 0.000000e+00 : f32
    %66 = vector.broadcast %cst_36 : f32 to vector<32x4xf32>
    %67 = arith.select %63, %65, %66 : vector<32x4xi1>, vector<32x4xf32>
    %68 = arith.addf %59, %67 : vector<32x4xf32>
    %c1_i32_37 = arith.constant 1 : i32
    %69 = tpu.dynamic_rotate %68 by %c1_i32_37 dim 0 : vector<32x4xf32>, i32 -> vector<32x4xf32>
    %cst_38 = arith.constant 0.000000e+00 : f32
    %70 = vector.shape_cast %23 : vector<32x1xi1> to vector<32x1xi1>
    %71 = vector.broadcast %70 : vector<32x1xi1> to vector<32x4xi1>
    %72 = vector.broadcast %cst_38 : f32 to vector<32x4xf32>
    %73 = arith.select %71, %72, %69 : vector<32x4xi1>, vector<32x4xf32>
    %74 = vector.extract_strided_slice %2 {offsets = [0, 0, 0], sizes = [1, 4, 8], strides = [1, 1, 1]} : vector<3x4x8xf32> to vector<1x4x8xf32>
    %75 = vector.shape_cast %74 : vector<1x4x8xf32> to vector<4x8xf32>
    %cst_39 = arith.constant dense<0.000000e+00> : vector<32x8xf32>
    %76 = tpu.matmul %73, %75, %cst_39 {dimension_numbers = #tpu.dot_dimension_numbers<[1], [0], [0], [1], [0, 0, 1, 1], [], []>} : vector<32x4xf32>, vector<4x8xf32>, vector<32x8xf32> -> vector<32x8xf32>
    %77 = vector.extract_strided_slice %2 {offsets = [1, 0, 0], sizes = [1, 4, 8], strides = [1, 1, 1]} : vector<3x4x8xf32> to vector<1x4x8xf32>
    %78 = vector.shape_cast %77 : vector<1x4x8xf32> to vector<4x8xf32>
    %cst_40 = arith.constant dense<0.000000e+00> : vector<32x8xf32>
    %79 = tpu.matmul %68, %78, %cst_40 {dimension_numbers = #tpu.dot_dimension_numbers<[1], [0], [0], [1], [0, 0, 1, 1], [], []>} : vector<32x4xf32>, vector<4x8xf32>, vector<32x8xf32> -> vector<32x8xf32>
    %80 = arith.addf %76, %79 : vector<32x8xf32>
    %c31_i32_41 = arith.constant 31 : i32
    %81 = tpu.dynamic_rotate %68 by %c31_i32_41 dim 0 : vector<32x4xf32>, i32 -> vector<32x4xf32>
    %cst_42 = arith.constant 0.000000e+00 : f32
    %82 = vector.shape_cast %26 : vector<32x1xi1> to vector<32x1xi1>
    %83 = vector.broadcast %82 : vector<32x1xi1> to vector<32x4xi1>
    %84 = vector.broadcast %cst_42 : f32 to vector<32x4xf32>
    %85 = arith.select %83, %84, %81 : vector<32x4xi1>, vector<32x4xf32>
    %86 = vector.extract_strided_slice %2 {offsets = [2, 0, 0], sizes = [1, 4, 8], strides = [1, 1, 1]} : vector<3x4x8xf32> to vector<1x4x8xf32>
    %87 = vector.shape_cast %86 : vector<1x4x8xf32> to vector<4x8xf32>
    %cst_43 = arith.constant dense<0.000000e+00> : vector<32x8xf32>
    %88 = tpu.matmul %85, %87, %cst_43 {dimension_numbers = #tpu.dot_dimension_numbers<[1], [0], [0], [1], [0, 0, 1, 1], [], []>} : vector<32x4xf32>, vector<4x8xf32>, vector<32x8xf32> -> vector<32x8xf32>
    %89 = arith.addf %80, %88 : vector<32x8xf32>
    %90 = vector.broadcast %8 : f32 to vector<32x8xf32>
    %91 = arith.mulf %90, %89 : vector<32x8xf32>
    %92 = vector.broadcast %11 : vector<1x8xf32> to vector<32x8xf32>
    %93 = arith.addf %91, %92 : vector<32x8xf32>
    %94 = vector.broadcast %14 : vector<1x8xf32> to vector<32x8xf32>
    %95 = arith.cmpf ogt, %93, %94 : vector<32x8xf32>
    %96 = vector.broadcast %14 : vector<1x8xf32> to vector<32x8xf32>
    %97 = arith.subf %93, %96 : vector<32x8xf32>
    %cst_44 = arith.constant 0.000000e+00 : f32
    %98 = vector.broadcast %cst_44 : f32 to vector<32x8xf32>
    %99 = arith.select %95, %97, %98 : vector<32x8xi1>, vector<32x8xf32>
    %cst_45 = arith.constant 0.000000e+00 : f32
    %100 = vector.broadcast %cst_45 : f32 to vector<1x8xf32>
    %101 = arith.subf %100, %14 : vector<1x8xf32>
    %102 = vector.broadcast %101 : vector<1x8xf32> to vector<32x8xf32>
    %103 = arith.cmpf olt, %93, %102 : vector<32x8xf32>
    %104 = vector.broadcast %14 : vector<1x8xf32> to vector<32x8xf32>
    %105 = arith.addf %93, %104 : vector<32x8xf32>
    %cst_46 = arith.constant 0.000000e+00 : f32
    %106 = vector.broadcast %cst_46 : f32 to vector<32x8xf32>
    %107 = arith.select %103, %105, %106 : vector<32x8xi1>, vector<32x8xf32>
    %108 = arith.addf %99, %107 : vector<32x8xf32>
    %c1_i32_47 = arith.constant 1 : i32
    %109 = tpu.dynamic_rotate %108 by %c1_i32_47 dim 0 : vector<32x8xf32>, i32 -> vector<32x8xf32>
    %cst_48 = arith.constant 0.000000e+00 : f32
    %110 = vector.shape_cast %23 : vector<32x1xi1> to vector<32x1xi1>
    %111 = vector.broadcast %110 : vector<32x1xi1> to vector<32x8xi1>
    %112 = vector.broadcast %cst_48 : f32 to vector<32x8xf32>
    %113 = arith.select %111, %112, %109 : vector<32x8xi1>, vector<32x8xf32>
    %114 = vector.extract_strided_slice %3 {offsets = [0, 0, 0], sizes = [1, 8, 16], strides = [1, 1, 1]} : vector<3x8x16xf32> to vector<1x8x16xf32>
    %115 = vector.shape_cast %114 : vector<1x8x16xf32> to vector<8x16xf32>
    %cst_49 = arith.constant dense<0.000000e+00> : vector<32x16xf32>
    %116 = tpu.matmul %113, %115, %cst_49 {dimension_numbers = #tpu.dot_dimension_numbers<[1], [0], [0], [1], [0, 0, 1, 1], [], []>} : vector<32x8xf32>, vector<8x16xf32>, vector<32x16xf32> -> vector<32x16xf32>
    %117 = vector.extract_strided_slice %3 {offsets = [1, 0, 0], sizes = [1, 8, 16], strides = [1, 1, 1]} : vector<3x8x16xf32> to vector<1x8x16xf32>
    %118 = vector.shape_cast %117 : vector<1x8x16xf32> to vector<8x16xf32>
    %cst_50 = arith.constant dense<0.000000e+00> : vector<32x16xf32>
    %119 = tpu.matmul %108, %118, %cst_50 {dimension_numbers = #tpu.dot_dimension_numbers<[1], [0], [0], [1], [0, 0, 1, 1], [], []>} : vector<32x8xf32>, vector<8x16xf32>, vector<32x16xf32> -> vector<32x16xf32>
    %120 = arith.addf %116, %119 : vector<32x16xf32>
    %c31_i32_51 = arith.constant 31 : i32
    %121 = tpu.dynamic_rotate %108 by %c31_i32_51 dim 0 : vector<32x8xf32>, i32 -> vector<32x8xf32>
    %cst_52 = arith.constant 0.000000e+00 : f32
    %122 = vector.shape_cast %26 : vector<32x1xi1> to vector<32x1xi1>
    %123 = vector.broadcast %122 : vector<32x1xi1> to vector<32x8xi1>
    %124 = vector.broadcast %cst_52 : f32 to vector<32x8xf32>
    %125 = arith.select %123, %124, %121 : vector<32x8xi1>, vector<32x8xf32>
    %126 = vector.extract_strided_slice %3 {offsets = [2, 0, 0], sizes = [1, 8, 16], strides = [1, 1, 1]} : vector<3x8x16xf32> to vector<1x8x16xf32>
    %127 = vector.shape_cast %126 : vector<1x8x16xf32> to vector<8x16xf32>
    %cst_53 = arith.constant dense<0.000000e+00> : vector<32x16xf32>
    %128 = tpu.matmul %125, %127, %cst_53 {dimension_numbers = #tpu.dot_dimension_numbers<[1], [0], [0], [1], [0, 0, 1, 1], [], []>} : vector<32x8xf32>, vector<8x16xf32>, vector<32x16xf32> -> vector<32x16xf32>
    %129 = arith.addf %120, %128 : vector<32x16xf32>
    %130 = vector.broadcast %9 : f32 to vector<32x16xf32>
    %131 = arith.mulf %130, %129 : vector<32x16xf32>
    %132 = vector.broadcast %12 : vector<1x16xf32> to vector<32x16xf32>
    %133 = arith.addf %131, %132 : vector<32x16xf32>
    %134 = vector.broadcast %15 : vector<1x16xf32> to vector<32x16xf32>
    %135 = arith.cmpf ogt, %133, %134 : vector<32x16xf32>
    %136 = vector.broadcast %15 : vector<1x16xf32> to vector<32x16xf32>
    %137 = arith.subf %133, %136 : vector<32x16xf32>
    %cst_54 = arith.constant 0.000000e+00 : f32
    %138 = vector.broadcast %cst_54 : f32 to vector<32x16xf32>
    %139 = arith.select %135, %137, %138 : vector<32x16xi1>, vector<32x16xf32>
    %cst_55 = arith.constant 0.000000e+00 : f32
    %140 = vector.broadcast %cst_55 : f32 to vector<1x16xf32>
    %141 = arith.subf %140, %15 : vector<1x16xf32>
    %142 = vector.broadcast %141 : vector<1x16xf32> to vector<32x16xf32>
    %143 = arith.cmpf olt, %133, %142 : vector<32x16xf32>
    %144 = vector.broadcast %15 : vector<1x16xf32> to vector<32x16xf32>
    %145 = arith.addf %133, %144 : vector<32x16xf32>
    %cst_56 = arith.constant 0.000000e+00 : f32
    %146 = vector.broadcast %cst_56 : f32 to vector<32x16xf32>
    %147 = arith.select %143, %145, %146 : vector<32x16xi1>, vector<32x16xf32>
    %148 = arith.addf %139, %147 : vector<32x16xf32>
    %c1_i32_57 = arith.constant 1 : i32
    %149 = tpu.dynamic_rotate %148 by %c1_i32_57 dim 0 : vector<32x16xf32>, i32 -> vector<32x16xf32>
    %cst_58 = arith.constant 0.000000e+00 : f32
    %150 = vector.shape_cast %23 : vector<32x1xi1> to vector<32x1xi1>
    %151 = vector.broadcast %150 : vector<32x1xi1> to vector<32x16xi1>
    %152 = vector.broadcast %cst_58 : f32 to vector<32x16xf32>
    %153 = arith.select %151, %152, %149 : vector<32x16xi1>, vector<32x16xf32>
    %154 = vector.extract_strided_slice %6 {offsets = [0, 0, 0], sizes = [1, 16, 8], strides = [1, 1, 1]} : vector<3x16x8xf32> to vector<1x16x8xf32>
    %155 = vector.shape_cast %154 : vector<1x16x8xf32> to vector<16x8xf32>
    %cst_59 = arith.constant dense<0.000000e+00> : vector<32x8xf32>
    %156 = tpu.matmul %153, %155, %cst_59 {dimension_numbers = #tpu.dot_dimension_numbers<[1], [0], [0], [1], [0, 0, 1, 1], [], []>} : vector<32x16xf32>, vector<16x8xf32>, vector<32x8xf32> -> vector<32x8xf32>
    %157 = vector.extract_strided_slice %6 {offsets = [1, 0, 0], sizes = [1, 16, 8], strides = [1, 1, 1]} : vector<3x16x8xf32> to vector<1x16x8xf32>
    %158 = vector.shape_cast %157 : vector<1x16x8xf32> to vector<16x8xf32>
    %cst_60 = arith.constant dense<0.000000e+00> : vector<32x8xf32>
    %159 = tpu.matmul %148, %158, %cst_60 {dimension_numbers = #tpu.dot_dimension_numbers<[1], [0], [0], [1], [0, 0, 1, 1], [], []>} : vector<32x16xf32>, vector<16x8xf32>, vector<32x8xf32> -> vector<32x8xf32>
    %160 = arith.addf %156, %159 : vector<32x8xf32>
    %c31_i32_61 = arith.constant 31 : i32
    %161 = tpu.dynamic_rotate %148 by %c31_i32_61 dim 0 : vector<32x16xf32>, i32 -> vector<32x16xf32>
    %cst_62 = arith.constant 0.000000e+00 : f32
    %162 = vector.shape_cast %26 : vector<32x1xi1> to vector<32x1xi1>
    %163 = vector.broadcast %162 : vector<32x1xi1> to vector<32x16xi1>
    %164 = vector.broadcast %cst_62 : f32 to vector<32x16xf32>
    %165 = arith.select %163, %164, %161 : vector<32x16xi1>, vector<32x16xf32>
    %166 = vector.extract_strided_slice %6 {offsets = [2, 0, 0], sizes = [1, 16, 8], strides = [1, 1, 1]} : vector<3x16x8xf32> to vector<1x16x8xf32>
    %167 = vector.shape_cast %166 : vector<1x16x8xf32> to vector<16x8xf32>
    %cst_63 = arith.constant dense<0.000000e+00> : vector<32x8xf32>
    %168 = tpu.matmul %165, %167, %cst_63 {dimension_numbers = #tpu.dot_dimension_numbers<[1], [0], [0], [1], [0, 0, 1, 1], [], []>} : vector<32x16xf32>, vector<16x8xf32>, vector<32x8xf32> -> vector<32x8xf32>
    %169 = arith.addf %160, %168 : vector<32x8xf32>
    %c1_i32_64 = arith.constant 1 : i32
    %170 = tpu.dynamic_rotate %169 by %c1_i32_64 dim 0 : vector<32x8xf32>, i32 -> vector<32x8xf32>
    %cst_65 = arith.constant 0.000000e+00 : f32
    %171 = vector.shape_cast %23 : vector<32x1xi1> to vector<32x1xi1>
    %172 = vector.broadcast %171 : vector<32x1xi1> to vector<32x8xi1>
    %173 = vector.broadcast %cst_65 : f32 to vector<32x8xf32>
    %174 = arith.select %172, %173, %170 : vector<32x8xi1>, vector<32x8xf32>
    %175 = vector.extract_strided_slice %5 {offsets = [0, 0, 0], sizes = [1, 8, 4], strides = [1, 1, 1]} : vector<3x8x4xf32> to vector<1x8x4xf32>
    %176 = vector.shape_cast %175 : vector<1x8x4xf32> to vector<8x4xf32>
    %cst_66 = arith.constant dense<0.000000e+00> : vector<32x4xf32>
    %177 = tpu.matmul %174, %176, %cst_66 {dimension_numbers = #tpu.dot_dimension_numbers<[1], [0], [0], [1], [0, 0, 1, 1], [], []>} : vector<32x8xf32>, vector<8x4xf32>, vector<32x4xf32> -> vector<32x4xf32>
    %178 = vector.extract_strided_slice %5 {offsets = [1, 0, 0], sizes = [1, 8, 4], strides = [1, 1, 1]} : vector<3x8x4xf32> to vector<1x8x4xf32>
    %179 = vector.shape_cast %178 : vector<1x8x4xf32> to vector<8x4xf32>
    %cst_67 = arith.constant dense<0.000000e+00> : vector<32x4xf32>
    %180 = tpu.matmul %169, %179, %cst_67 {dimension_numbers = #tpu.dot_dimension_numbers<[1], [0], [0], [1], [0, 0, 1, 1], [], []>} : vector<32x8xf32>, vector<8x4xf32>, vector<32x4xf32> -> vector<32x4xf32>
    %181 = arith.addf %177, %180 : vector<32x4xf32>
    %c31_i32_68 = arith.constant 31 : i32
    %182 = tpu.dynamic_rotate %169 by %c31_i32_68 dim 0 : vector<32x8xf32>, i32 -> vector<32x8xf32>
    %cst_69 = arith.constant 0.000000e+00 : f32
    %183 = vector.shape_cast %26 : vector<32x1xi1> to vector<32x1xi1>
    %184 = vector.broadcast %183 : vector<32x1xi1> to vector<32x8xi1>
    %185 = vector.broadcast %cst_69 : f32 to vector<32x8xf32>
    %186 = arith.select %184, %185, %182 : vector<32x8xi1>, vector<32x8xf32>
    %187 = vector.extract_strided_slice %5 {offsets = [2, 0, 0], sizes = [1, 8, 4], strides = [1, 1, 1]} : vector<3x8x4xf32> to vector<1x8x4xf32>
    %188 = vector.shape_cast %187 : vector<1x8x4xf32> to vector<8x4xf32>
    %cst_70 = arith.constant dense<0.000000e+00> : vector<32x4xf32>
    %189 = tpu.matmul %186, %188, %cst_70 {dimension_numbers = #tpu.dot_dimension_numbers<[1], [0], [0], [1], [0, 0, 1, 1], [], []>} : vector<32x8xf32>, vector<8x4xf32>, vector<32x4xf32> -> vector<32x4xf32>
    %190 = arith.addf %181, %189 : vector<32x4xf32>
    %c1_i32_71 = arith.constant 1 : i32
    %191 = tpu.dynamic_rotate %190 by %c1_i32_71 dim 0 : vector<32x4xf32>, i32 -> vector<32x4xf32>
    %cst_72 = arith.constant 0.000000e+00 : f32
    %192 = vector.shape_cast %23 : vector<32x1xi1> to vector<32x1xi1>
    %193 = vector.broadcast %192 : vector<32x1xi1> to vector<32x4xi1>
    %194 = vector.broadcast %cst_72 : f32 to vector<32x4xf32>
    %195 = arith.select %193, %194, %191 : vector<32x4xi1>, vector<32x4xf32>
    %196 = vector.extract_strided_slice %4 {offsets = [0, 0, 0], sizes = [1, 4, 1], strides = [1, 1, 1]} : vector<3x4x1xf32> to vector<1x4x1xf32>
    %197 = vector.shape_cast %196 : vector<1x4x1xf32> to vector<4x1xf32>
    %cst_73 = arith.constant dense<0.000000e+00> : vector<32x1xf32>
    %198 = tpu.matmul %195, %197, %cst_73 {dimension_numbers = #tpu.dot_dimension_numbers<[1], [0], [0], [1], [0, 0, 1, 1], [], []>} : vector<32x4xf32>, vector<4x1xf32>, vector<32x1xf32> -> vector<32x1xf32>
    %199 = vector.extract_strided_slice %4 {offsets = [1, 0, 0], sizes = [1, 4, 1], strides = [1, 1, 1]} : vector<3x4x1xf32> to vector<1x4x1xf32>
    %200 = vector.shape_cast %199 : vector<1x4x1xf32> to vector<4x1xf32>
    %cst_74 = arith.constant dense<0.000000e+00> : vector<32x1xf32>
    %201 = tpu.matmul %190, %200, %cst_74 {dimension_numbers = #tpu.dot_dimension_numbers<[1], [0], [0], [1], [0, 0, 1, 1], [], []>} : vector<32x4xf32>, vector<4x1xf32>, vector<32x1xf32> -> vector<32x1xf32>
    %202 = arith.addf %198, %201 : vector<32x1xf32>
    %c31_i32_75 = arith.constant 31 : i32
    %203 = tpu.dynamic_rotate %190 by %c31_i32_75 dim 0 : vector<32x4xf32>, i32 -> vector<32x4xf32>
    %cst_76 = arith.constant 0.000000e+00 : f32
    %204 = vector.shape_cast %26 : vector<32x1xi1> to vector<32x1xi1>
    %205 = vector.broadcast %204 : vector<32x1xi1> to vector<32x4xi1>
    %206 = vector.broadcast %cst_76 : f32 to vector<32x4xf32>
    %207 = arith.select %205, %206, %203 : vector<32x4xi1>, vector<32x4xf32>
    %208 = vector.extract_strided_slice %4 {offsets = [2, 0, 0], sizes = [1, 4, 1], strides = [1, 1, 1]} : vector<3x4x1xf32> to vector<1x4x1xf32>
    %209 = vector.shape_cast %208 : vector<1x4x1xf32> to vector<4x1xf32>
    %cst_77 = arith.constant dense<0.000000e+00> : vector<32x1xf32>
    %210 = tpu.matmul %207, %209, %cst_77 {dimension_numbers = #tpu.dot_dimension_numbers<[1], [0], [0], [1], [0, 0, 1, 1], [], []>} : vector<32x4xf32>, vector<4x1xf32>, vector<32x1xf32> -> vector<32x1xf32>
    %211 = arith.addf %202, %210 : vector<32x1xf32>
    %212 = arith.subf %211, %0 : vector<32x1xf32>
    %c1_i32_78 = arith.constant 1 : i32
    %213 = tpu.dynamic_rotate %212 by %c1_i32_78 dim 0 : vector<32x1xf32>, i32 -> vector<32x1xf32>
    %cst_79 = arith.constant 0.000000e+00 : f32
    %214 = vector.broadcast %cst_79 : f32 to vector<32x1xf32>
    %215 = arith.select %23, %214, %213 : vector<32x1xi1>, vector<32x1xf32>
    %216 = vector.extract_strided_slice %1 {offsets = [0, 0, 0], sizes = [1, 1, 4], strides = [1, 1, 1]} : vector<3x1x4xf32> to vector<1x1x4xf32>
    %217 = vector.shape_cast %216 : vector<1x1x4xf32> to vector<1x4xf32>
    %218 = vector.broadcast %215 : vector<32x1xf32> to vector<32x4xf32>
    %219 = vector.broadcast %217 : vector<1x4xf32> to vector<32x4xf32>
    %220 = arith.mulf %218, %219 : vector<32x4xf32>
    %221 = vector.extract_strided_slice %1 {offsets = [1, 0, 0], sizes = [1, 1, 4], strides = [1, 1, 1]} : vector<3x1x4xf32> to vector<1x1x4xf32>
    %222 = vector.shape_cast %221 : vector<1x1x4xf32> to vector<1x4xf32>
    %223 = vector.broadcast %212 : vector<32x1xf32> to vector<32x4xf32>
    %224 = vector.broadcast %222 : vector<1x4xf32> to vector<32x4xf32>
    %225 = arith.mulf %223, %224 : vector<32x4xf32>
    %226 = arith.addf %220, %225 : vector<32x4xf32>
    %c31_i32_80 = arith.constant 31 : i32
    %227 = tpu.dynamic_rotate %212 by %c31_i32_80 dim 0 : vector<32x1xf32>, i32 -> vector<32x1xf32>
    %cst_81 = arith.constant 0.000000e+00 : f32
    %228 = vector.broadcast %cst_81 : f32 to vector<32x1xf32>
    %229 = arith.select %26, %228, %227 : vector<32x1xi1>, vector<32x1xf32>
    %230 = vector.extract_strided_slice %1 {offsets = [2, 0, 0], sizes = [1, 1, 4], strides = [1, 1, 1]} : vector<3x1x4xf32> to vector<1x1x4xf32>
    %231 = vector.shape_cast %230 : vector<1x1x4xf32> to vector<1x4xf32>
    %232 = vector.broadcast %229 : vector<32x1xf32> to vector<32x4xf32>
    %233 = vector.broadcast %231 : vector<1x4xf32> to vector<32x4xf32>
    %234 = arith.mulf %232, %233 : vector<32x4xf32>
    %235 = arith.addf %226, %234 : vector<32x4xf32>
    %236 = vector.broadcast %7 : f32 to vector<32x4xf32>
    %237 = arith.mulf %236, %235 : vector<32x4xf32>
    %238 = arith.subf %190, %237 : vector<32x4xf32>
    %239 = vector.broadcast %10 : vector<1x4xf32> to vector<32x4xf32>
    %240 = arith.addf %238, %239 : vector<32x4xf32>
    %241 = vector.broadcast %13 : vector<1x4xf32> to vector<32x4xf32>
    %242 = arith.cmpf ogt, %240, %241 : vector<32x4xf32>
    %243 = vector.broadcast %13 : vector<1x4xf32> to vector<32x4xf32>
    %244 = arith.subf %240, %243 : vector<32x4xf32>
    %cst_82 = arith.constant 0.000000e+00 : f32
    %245 = vector.broadcast %cst_82 : f32 to vector<32x4xf32>
    %246 = arith.select %242, %244, %245 : vector<32x4xi1>, vector<32x4xf32>
    %cst_83 = arith.constant 0.000000e+00 : f32
    %247 = vector.broadcast %cst_83 : f32 to vector<1x4xf32>
    %248 = arith.subf %247, %13 : vector<1x4xf32>
    %249 = vector.broadcast %248 : vector<1x4xf32> to vector<32x4xf32>
    %250 = arith.cmpf olt, %240, %249 : vector<32x4xf32>
    %251 = vector.broadcast %13 : vector<1x4xf32> to vector<32x4xf32>
    %252 = arith.addf %240, %251 : vector<32x4xf32>
    %cst_84 = arith.constant 0.000000e+00 : f32
    %253 = vector.broadcast %cst_84 : f32 to vector<32x4xf32>
    %254 = arith.select %250, %252, %253 : vector<32x4xi1>, vector<32x4xf32>
    %255 = arith.addf %246, %254 : vector<32x4xf32>
    %c1_i32_85 = arith.constant 1 : i32
    %256 = tpu.dynamic_rotate %169 by %c1_i32_85 dim 0 : vector<32x8xf32>, i32 -> vector<32x8xf32>
    %cst_86 = arith.constant 0.000000e+00 : f32
    %257 = vector.shape_cast %23 : vector<32x1xi1> to vector<32x1xi1>
    %258 = vector.broadcast %257 : vector<32x1xi1> to vector<32x8xi1>
    %259 = vector.broadcast %cst_86 : f32 to vector<32x8xf32>
    %260 = arith.select %258, %259, %256 : vector<32x8xi1>, vector<32x8xf32>
    %261 = vector.extract_strided_slice %5 {offsets = [0, 0, 0], sizes = [1, 8, 4], strides = [1, 1, 1]} : vector<3x8x4xf32> to vector<1x8x4xf32>
    %262 = vector.shape_cast %261 : vector<1x8x4xf32> to vector<8x4xf32>
    %cst_87 = arith.constant dense<0.000000e+00> : vector<32x4xf32>
    %263 = tpu.matmul %260, %262, %cst_87 {dimension_numbers = #tpu.dot_dimension_numbers<[1], [0], [0], [1], [0, 0, 1, 1], [], []>} : vector<32x8xf32>, vector<8x4xf32>, vector<32x4xf32> -> vector<32x4xf32>
    %264 = vector.extract_strided_slice %5 {offsets = [1, 0, 0], sizes = [1, 8, 4], strides = [1, 1, 1]} : vector<3x8x4xf32> to vector<1x8x4xf32>
    %265 = vector.shape_cast %264 : vector<1x8x4xf32> to vector<8x4xf32>
    %cst_88 = arith.constant dense<0.000000e+00> : vector<32x4xf32>
    %266 = tpu.matmul %169, %265, %cst_88 {dimension_numbers = #tpu.dot_dimension_numbers<[1], [0], [0], [1], [0, 0, 1, 1], [], []>} : vector<32x8xf32>, vector<8x4xf32>, vector<32x4xf32> -> vector<32x4xf32>
    %267 = arith.addf %263, %266 : vector<32x4xf32>
    %c31_i32_89 = arith.constant 31 : i32
    %268 = tpu.dynamic_rotate %169 by %c31_i32_89 dim 0 : vector<32x8xf32>, i32 -> vector<32x8xf32>
    %cst_90 = arith.constant 0.000000e+00 : f32
    %269 = vector.shape_cast %26 : vector<32x1xi1> to vector<32x1xi1>
    %270 = vector.broadcast %269 : vector<32x1xi1> to vector<32x8xi1>
    %271 = vector.broadcast %cst_90 : f32 to vector<32x8xf32>
    %272 = arith.select %270, %271, %268 : vector<32x8xi1>, vector<32x8xf32>
    %273 = vector.extract_strided_slice %5 {offsets = [2, 0, 0], sizes = [1, 8, 4], strides = [1, 1, 1]} : vector<3x8x4xf32> to vector<1x8x4xf32>
    %274 = vector.shape_cast %273 : vector<1x8x4xf32> to vector<8x4xf32>
    %cst_91 = arith.constant dense<0.000000e+00> : vector<32x4xf32>
    %275 = tpu.matmul %272, %274, %cst_91 {dimension_numbers = #tpu.dot_dimension_numbers<[1], [0], [0], [1], [0, 0, 1, 1], [], []>} : vector<32x8xf32>, vector<8x4xf32>, vector<32x4xf32> -> vector<32x4xf32>
    %276 = arith.addf %267, %275 : vector<32x4xf32>
    %277 = arith.subf %276, %255 : vector<32x4xf32>
    %c1_i32_92 = arith.constant 1 : i32
    %278 = tpu.dynamic_rotate %277 by %c1_i32_92 dim 0 : vector<32x4xf32>, i32 -> vector<32x4xf32>
    %cst_93 = arith.constant 0.000000e+00 : f32
    %279 = vector.shape_cast %23 : vector<32x1xi1> to vector<32x1xi1>
    %280 = vector.broadcast %279 : vector<32x1xi1> to vector<32x4xi1>
    %281 = vector.broadcast %cst_93 : f32 to vector<32x4xf32>
    %282 = arith.select %280, %281, %278 : vector<32x4xi1>, vector<32x4xf32>
    %283 = vector.extract_strided_slice %2 {offsets = [0, 0, 0], sizes = [1, 4, 8], strides = [1, 1, 1]} : vector<3x4x8xf32> to vector<1x4x8xf32>
    %284 = vector.shape_cast %283 : vector<1x4x8xf32> to vector<4x8xf32>
    %cst_94 = arith.constant dense<0.000000e+00> : vector<32x8xf32>
    %285 = tpu.matmul %282, %284, %cst_94 {dimension_numbers = #tpu.dot_dimension_numbers<[1], [0], [0], [1], [0, 0, 1, 1], [], []>} : vector<32x4xf32>, vector<4x8xf32>, vector<32x8xf32> -> vector<32x8xf32>
    %286 = vector.extract_strided_slice %2 {offsets = [1, 0, 0], sizes = [1, 4, 8], strides = [1, 1, 1]} : vector<3x4x8xf32> to vector<1x4x8xf32>
    %287 = vector.shape_cast %286 : vector<1x4x8xf32> to vector<4x8xf32>
    %cst_95 = arith.constant dense<0.000000e+00> : vector<32x8xf32>
    %288 = tpu.matmul %277, %287, %cst_95 {dimension_numbers = #tpu.dot_dimension_numbers<[1], [0], [0], [1], [0, 0, 1, 1], [], []>} : vector<32x4xf32>, vector<4x8xf32>, vector<32x8xf32> -> vector<32x8xf32>
    %289 = arith.addf %285, %288 : vector<32x8xf32>
    %c31_i32_96 = arith.constant 31 : i32
    %290 = tpu.dynamic_rotate %277 by %c31_i32_96 dim 0 : vector<32x4xf32>, i32 -> vector<32x4xf32>
    %cst_97 = arith.constant 0.000000e+00 : f32
    %291 = vector.shape_cast %26 : vector<32x1xi1> to vector<32x1xi1>
    %292 = vector.broadcast %291 : vector<32x1xi1> to vector<32x4xi1>
    %293 = vector.broadcast %cst_97 : f32 to vector<32x4xf32>
    %294 = arith.select %292, %293, %290 : vector<32x4xi1>, vector<32x4xf32>
    %295 = vector.extract_strided_slice %2 {offsets = [2, 0, 0], sizes = [1, 4, 8], strides = [1, 1, 1]} : vector<3x4x8xf32> to vector<1x4x8xf32>
    %296 = vector.shape_cast %295 : vector<1x4x8xf32> to vector<4x8xf32>
    %cst_98 = arith.constant dense<0.000000e+00> : vector<32x8xf32>
    %297 = tpu.matmul %294, %296, %cst_98 {dimension_numbers = #tpu.dot_dimension_numbers<[1], [0], [0], [1], [0, 0, 1, 1], [], []>} : vector<32x4xf32>, vector<4x8xf32>, vector<32x8xf32> -> vector<32x8xf32>
    %298 = arith.addf %289, %297 : vector<32x8xf32>
    %299 = vector.broadcast %8 : f32 to vector<32x8xf32>
    %300 = arith.mulf %299, %298 : vector<32x8xf32>
    %301 = arith.subf %169, %300 : vector<32x8xf32>
    %302 = vector.broadcast %11 : vector<1x8xf32> to vector<32x8xf32>
    %303 = arith.addf %301, %302 : vector<32x8xf32>
    %304 = vector.broadcast %14 : vector<1x8xf32> to vector<32x8xf32>
    %305 = arith.cmpf ogt, %303, %304 : vector<32x8xf32>
    %306 = vector.broadcast %14 : vector<1x8xf32> to vector<32x8xf32>
    %307 = arith.subf %303, %306 : vector<32x8xf32>
    %cst_99 = arith.constant 0.000000e+00 : f32
    %308 = vector.broadcast %cst_99 : f32 to vector<32x8xf32>
    %309 = arith.select %305, %307, %308 : vector<32x8xi1>, vector<32x8xf32>
    %cst_100 = arith.constant 0.000000e+00 : f32
    %310 = vector.broadcast %cst_100 : f32 to vector<1x8xf32>
    %311 = arith.subf %310, %14 : vector<1x8xf32>
    %312 = vector.broadcast %311 : vector<1x8xf32> to vector<32x8xf32>
    %313 = arith.cmpf olt, %303, %312 : vector<32x8xf32>
    %314 = vector.broadcast %14 : vector<1x8xf32> to vector<32x8xf32>
    %315 = arith.addf %303, %314 : vector<32x8xf32>
    %cst_101 = arith.constant 0.000000e+00 : f32
    %316 = vector.broadcast %cst_101 : f32 to vector<32x8xf32>
    %317 = arith.select %313, %315, %316 : vector<32x8xi1>, vector<32x8xf32>
    %318 = arith.addf %309, %317 : vector<32x8xf32>
    %c1_i32_102 = arith.constant 1 : i32
    %319 = tpu.dynamic_rotate %148 by %c1_i32_102 dim 0 : vector<32x16xf32>, i32 -> vector<32x16xf32>
    %cst_103 = arith.constant 0.000000e+00 : f32
    %320 = vector.shape_cast %23 : vector<32x1xi1> to vector<32x1xi1>
    %321 = vector.broadcast %320 : vector<32x1xi1> to vector<32x16xi1>
    %322 = vector.broadcast %cst_103 : f32 to vector<32x16xf32>
    %323 = arith.select %321, %322, %319 : vector<32x16xi1>, vector<32x16xf32>
    %324 = vector.extract_strided_slice %6 {offsets = [0, 0, 0], sizes = [1, 16, 8], strides = [1, 1, 1]} : vector<3x16x8xf32> to vector<1x16x8xf32>
    %325 = vector.shape_cast %324 : vector<1x16x8xf32> to vector<16x8xf32>
    %cst_104 = arith.constant dense<0.000000e+00> : vector<32x8xf32>
    %326 = tpu.matmul %323, %325, %cst_104 {dimension_numbers = #tpu.dot_dimension_numbers<[1], [0], [0], [1], [0, 0, 1, 1], [], []>} : vector<32x16xf32>, vector<16x8xf32>, vector<32x8xf32> -> vector<32x8xf32>
    %327 = vector.extract_strided_slice %6 {offsets = [1, 0, 0], sizes = [1, 16, 8], strides = [1, 1, 1]} : vector<3x16x8xf32> to vector<1x16x8xf32>
    %328 = vector.shape_cast %327 : vector<1x16x8xf32> to vector<16x8xf32>
    %cst_105 = arith.constant dense<0.000000e+00> : vector<32x8xf32>
    %329 = tpu.matmul %148, %328, %cst_105 {dimension_numbers = #tpu.dot_dimension_numbers<[1], [0], [0], [1], [0, 0, 1, 1], [], []>} : vector<32x16xf32>, vector<16x8xf32>, vector<32x8xf32> -> vector<32x8xf32>
    %330 = arith.addf %326, %329 : vector<32x8xf32>
    %c31_i32_106 = arith.constant 31 : i32
    %331 = tpu.dynamic_rotate %148 by %c31_i32_106 dim 0 : vector<32x16xf32>, i32 -> vector<32x16xf32>
    %cst_107 = arith.constant 0.000000e+00 : f32
    %332 = vector.shape_cast %26 : vector<32x1xi1> to vector<32x1xi1>
    %333 = vector.broadcast %332 : vector<32x1xi1> to vector<32x16xi1>
    %334 = vector.broadcast %cst_107 : f32 to vector<32x16xf32>
    %335 = arith.select %333, %334, %331 : vector<32x16xi1>, vector<32x16xf32>
    %336 = vector.extract_strided_slice %6 {offsets = [2, 0, 0], sizes = [1, 16, 8], strides = [1, 1, 1]} : vector<3x16x8xf32> to vector<1x16x8xf32>
    %337 = vector.shape_cast %336 : vector<1x16x8xf32> to vector<16x8xf32>
    %cst_108 = arith.constant dense<0.000000e+00> : vector<32x8xf32>
    %338 = tpu.matmul %335, %337, %cst_108 {dimension_numbers = #tpu.dot_dimension_numbers<[1], [0], [0], [1], [0, 0, 1, 1], [], []>} : vector<32x16xf32>, vector<16x8xf32>, vector<32x8xf32> -> vector<32x8xf32>
    %339 = arith.addf %330, %338 : vector<32x8xf32>
    %340 = arith.subf %339, %318 : vector<32x8xf32>
    %c1_i32_109 = arith.constant 1 : i32
    %341 = tpu.dynamic_rotate %340 by %c1_i32_109 dim 0 : vector<32x8xf32>, i32 -> vector<32x8xf32>
    %cst_110 = arith.constant 0.000000e+00 : f32
    %342 = vector.shape_cast %23 : vector<32x1xi1> to vector<32x1xi1>
    %343 = vector.broadcast %342 : vector<32x1xi1> to vector<32x8xi1>
    %344 = vector.broadcast %cst_110 : f32 to vector<32x8xf32>
    %345 = arith.select %343, %344, %341 : vector<32x8xi1>, vector<32x8xf32>
    %346 = vector.extract_strided_slice %3 {offsets = [0, 0, 0], sizes = [1, 8, 16], strides = [1, 1, 1]} : vector<3x8x16xf32> to vector<1x8x16xf32>
    %347 = vector.shape_cast %346 : vector<1x8x16xf32> to vector<8x16xf32>
    %cst_111 = arith.constant dense<0.000000e+00> : vector<32x16xf32>
    %348 = tpu.matmul %345, %347, %cst_111 {dimension_numbers = #tpu.dot_dimension_numbers<[1], [0], [0], [1], [0, 0, 1, 1], [], []>} : vector<32x8xf32>, vector<8x16xf32>, vector<32x16xf32> -> vector<32x16xf32>
    %349 = vector.extract_strided_slice %3 {offsets = [1, 0, 0], sizes = [1, 8, 16], strides = [1, 1, 1]} : vector<3x8x16xf32> to vector<1x8x16xf32>
    %350 = vector.shape_cast %349 : vector<1x8x16xf32> to vector<8x16xf32>
    %cst_112 = arith.constant dense<0.000000e+00> : vector<32x16xf32>
    %351 = tpu.matmul %340, %350, %cst_112 {dimension_numbers = #tpu.dot_dimension_numbers<[1], [0], [0], [1], [0, 0, 1, 1], [], []>} : vector<32x8xf32>, vector<8x16xf32>, vector<32x16xf32> -> vector<32x16xf32>
    %352 = arith.addf %348, %351 : vector<32x16xf32>
    %c31_i32_113 = arith.constant 31 : i32
    %353 = tpu.dynamic_rotate %340 by %c31_i32_113 dim 0 : vector<32x8xf32>, i32 -> vector<32x8xf32>
    %cst_114 = arith.constant 0.000000e+00 : f32
    %354 = vector.shape_cast %26 : vector<32x1xi1> to vector<32x1xi1>
    %355 = vector.broadcast %354 : vector<32x1xi1> to vector<32x8xi1>
    %356 = vector.broadcast %cst_114 : f32 to vector<32x8xf32>
    %357 = arith.select %355, %356, %353 : vector<32x8xi1>, vector<32x8xf32>
    %358 = vector.extract_strided_slice %3 {offsets = [2, 0, 0], sizes = [1, 8, 16], strides = [1, 1, 1]} : vector<3x8x16xf32> to vector<1x8x16xf32>
    %359 = vector.shape_cast %358 : vector<1x8x16xf32> to vector<8x16xf32>
    %cst_115 = arith.constant dense<0.000000e+00> : vector<32x16xf32>
    %360 = tpu.matmul %357, %359, %cst_115 {dimension_numbers = #tpu.dot_dimension_numbers<[1], [0], [0], [1], [0, 0, 1, 1], [], []>} : vector<32x8xf32>, vector<8x16xf32>, vector<32x16xf32> -> vector<32x16xf32>
    %361 = arith.addf %352, %360 : vector<32x16xf32>
    %362 = vector.broadcast %9 : f32 to vector<32x16xf32>
    %363 = arith.mulf %362, %361 : vector<32x16xf32>
    %364 = arith.subf %148, %363 : vector<32x16xf32>
    %365 = vector.broadcast %12 : vector<1x16xf32> to vector<32x16xf32>
    %366 = arith.addf %364, %365 : vector<32x16xf32>
    %367 = vector.broadcast %15 : vector<1x16xf32> to vector<32x16xf32>
    %368 = arith.cmpf ogt, %366, %367 : vector<32x16xf32>
    %369 = vector.broadcast %15 : vector<1x16xf32> to vector<32x16xf32>
    %370 = arith.subf %366, %369 : vector<32x16xf32>
    %cst_116 = arith.constant 0.000000e+00 : f32
    %371 = vector.broadcast %cst_116 : f32 to vector<32x16xf32>
    %372 = arith.select %368, %370, %371 : vector<32x16xi1>, vector<32x16xf32>
    %cst_117 = arith.constant 0.000000e+00 : f32
    %373 = vector.broadcast %cst_117 : f32 to vector<1x16xf32>
    %374 = arith.subf %373, %15 : vector<1x16xf32>
    %375 = vector.broadcast %374 : vector<1x16xf32> to vector<32x16xf32>
    %376 = arith.cmpf olt, %366, %375 : vector<32x16xf32>
    %377 = vector.broadcast %15 : vector<1x16xf32> to vector<32x16xf32>
    %378 = arith.addf %366, %377 : vector<32x16xf32>
    %cst_118 = arith.constant 0.000000e+00 : f32
    %379 = vector.broadcast %cst_118 : f32 to vector<32x16xf32>
    %380 = arith.select %376, %378, %379 : vector<32x16xi1>, vector<32x16xf32>
    %381 = arith.addf %372, %380 : vector<32x16xf32>
    %c1_i32_119 = arith.constant 1 : i32
    %382 = tpu.dynamic_rotate %381 by %c1_i32_119 dim 0 : vector<32x16xf32>, i32 -> vector<32x16xf32>
    %cst_120 = arith.constant 0.000000e+00 : f32
    %383 = vector.shape_cast %23 : vector<32x1xi1> to vector<32x1xi1>
    %384 = vector.broadcast %383 : vector<32x1xi1> to vector<32x16xi1>
    %385 = vector.broadcast %cst_120 : f32 to vector<32x16xf32>
    %386 = arith.select %384, %385, %382 : vector<32x16xi1>, vector<32x16xf32>
    %387 = vector.extract_strided_slice %6 {offsets = [0, 0, 0], sizes = [1, 16, 8], strides = [1, 1, 1]} : vector<3x16x8xf32> to vector<1x16x8xf32>
    %388 = vector.shape_cast %387 : vector<1x16x8xf32> to vector<16x8xf32>
    %cst_121 = arith.constant dense<0.000000e+00> : vector<32x8xf32>
    %389 = tpu.matmul %386, %388, %cst_121 {dimension_numbers = #tpu.dot_dimension_numbers<[1], [0], [0], [1], [0, 0, 1, 1], [], []>} : vector<32x16xf32>, vector<16x8xf32>, vector<32x8xf32> -> vector<32x8xf32>
    %390 = vector.extract_strided_slice %6 {offsets = [1, 0, 0], sizes = [1, 16, 8], strides = [1, 1, 1]} : vector<3x16x8xf32> to vector<1x16x8xf32>
    %391 = vector.shape_cast %390 : vector<1x16x8xf32> to vector<16x8xf32>
    %cst_122 = arith.constant dense<0.000000e+00> : vector<32x8xf32>
    %392 = tpu.matmul %381, %391, %cst_122 {dimension_numbers = #tpu.dot_dimension_numbers<[1], [0], [0], [1], [0, 0, 1, 1], [], []>} : vector<32x16xf32>, vector<16x8xf32>, vector<32x8xf32> -> vector<32x8xf32>
    %393 = arith.addf %389, %392 : vector<32x8xf32>
    %c31_i32_123 = arith.constant 31 : i32
    %394 = tpu.dynamic_rotate %381 by %c31_i32_123 dim 0 : vector<32x16xf32>, i32 -> vector<32x16xf32>
    %cst_124 = arith.constant 0.000000e+00 : f32
    %395 = vector.shape_cast %26 : vector<32x1xi1> to vector<32x1xi1>
    %396 = vector.broadcast %395 : vector<32x1xi1> to vector<32x16xi1>
    %397 = vector.broadcast %cst_124 : f32 to vector<32x16xf32>
    %398 = arith.select %396, %397, %394 : vector<32x16xi1>, vector<32x16xf32>
    %399 = vector.extract_strided_slice %6 {offsets = [2, 0, 0], sizes = [1, 16, 8], strides = [1, 1, 1]} : vector<3x16x8xf32> to vector<1x16x8xf32>
    %400 = vector.shape_cast %399 : vector<1x16x8xf32> to vector<16x8xf32>
    %cst_125 = arith.constant dense<0.000000e+00> : vector<32x8xf32>
    %401 = tpu.matmul %398, %400, %cst_125 {dimension_numbers = #tpu.dot_dimension_numbers<[1], [0], [0], [1], [0, 0, 1, 1], [], []>} : vector<32x16xf32>, vector<16x8xf32>, vector<32x8xf32> -> vector<32x8xf32>
    %402 = arith.addf %393, %401 : vector<32x8xf32>
    %c1_i32_126 = arith.constant 1 : i32
    %403 = tpu.dynamic_rotate %402 by %c1_i32_126 dim 0 : vector<32x8xf32>, i32 -> vector<32x8xf32>
    %cst_127 = arith.constant 0.000000e+00 : f32
    %404 = vector.shape_cast %23 : vector<32x1xi1> to vector<32x1xi1>
    %405 = vector.broadcast %404 : vector<32x1xi1> to vector<32x8xi1>
    %406 = vector.broadcast %cst_127 : f32 to vector<32x8xf32>
    %407 = arith.select %405, %406, %403 : vector<32x8xi1>, vector<32x8xf32>
    %408 = vector.extract_strided_slice %5 {offsets = [0, 0, 0], sizes = [1, 8, 4], strides = [1, 1, 1]} : vector<3x8x4xf32> to vector<1x8x4xf32>
    %409 = vector.shape_cast %408 : vector<1x8x4xf32> to vector<8x4xf32>
    %cst_128 = arith.constant dense<0.000000e+00> : vector<32x4xf32>
    %410 = tpu.matmul %407, %409, %cst_128 {dimension_numbers = #tpu.dot_dimension_numbers<[1], [0], [0], [1], [0, 0, 1, 1], [], []>} : vector<32x8xf32>, vector<8x4xf32>, vector<32x4xf32> -> vector<32x4xf32>
    %411 = vector.extract_strided_slice %5 {offsets = [1, 0, 0], sizes = [1, 8, 4], strides = [1, 1, 1]} : vector<3x8x4xf32> to vector<1x8x4xf32>
    %412 = vector.shape_cast %411 : vector<1x8x4xf32> to vector<8x4xf32>
    %cst_129 = arith.constant dense<0.000000e+00> : vector<32x4xf32>
    %413 = tpu.matmul %402, %412, %cst_129 {dimension_numbers = #tpu.dot_dimension_numbers<[1], [0], [0], [1], [0, 0, 1, 1], [], []>} : vector<32x8xf32>, vector<8x4xf32>, vector<32x4xf32> -> vector<32x4xf32>
    %414 = arith.addf %410, %413 : vector<32x4xf32>
    %c31_i32_130 = arith.constant 31 : i32
    %415 = tpu.dynamic_rotate %402 by %c31_i32_130 dim 0 : vector<32x8xf32>, i32 -> vector<32x8xf32>
    %cst_131 = arith.constant 0.000000e+00 : f32
    %416 = vector.shape_cast %26 : vector<32x1xi1> to vector<32x1xi1>
    %417 = vector.broadcast %416 : vector<32x1xi1> to vector<32x8xi1>
    %418 = vector.broadcast %cst_131 : f32 to vector<32x8xf32>
    %419 = arith.select %417, %418, %415 : vector<32x8xi1>, vector<32x8xf32>
    %420 = vector.extract_strided_slice %5 {offsets = [2, 0, 0], sizes = [1, 8, 4], strides = [1, 1, 1]} : vector<3x8x4xf32> to vector<1x8x4xf32>
    %421 = vector.shape_cast %420 : vector<1x8x4xf32> to vector<8x4xf32>
    %cst_132 = arith.constant dense<0.000000e+00> : vector<32x4xf32>
    %422 = tpu.matmul %419, %421, %cst_132 {dimension_numbers = #tpu.dot_dimension_numbers<[1], [0], [0], [1], [0, 0, 1, 1], [], []>} : vector<32x8xf32>, vector<8x4xf32>, vector<32x4xf32> -> vector<32x4xf32>
    %423 = arith.addf %414, %422 : vector<32x4xf32>
    %c1_i32_133 = arith.constant 1 : i32
    %424 = tpu.dynamic_rotate %423 by %c1_i32_133 dim 0 : vector<32x4xf32>, i32 -> vector<32x4xf32>
    %cst_134 = arith.constant 0.000000e+00 : f32
    %425 = vector.shape_cast %23 : vector<32x1xi1> to vector<32x1xi1>
    %426 = vector.broadcast %425 : vector<32x1xi1> to vector<32x4xi1>
    %427 = vector.broadcast %cst_134 : f32 to vector<32x4xf32>
    %428 = arith.select %426, %427, %424 : vector<32x4xi1>, vector<32x4xf32>
    %429 = vector.extract_strided_slice %4 {offsets = [0, 0, 0], sizes = [1, 4, 1], strides = [1, 1, 1]} : vector<3x4x1xf32> to vector<1x4x1xf32>
    %430 = vector.shape_cast %429 : vector<1x4x1xf32> to vector<4x1xf32>
    %cst_135 = arith.constant dense<0.000000e+00> : vector<32x1xf32>
    %431 = tpu.matmul %428, %430, %cst_135 {dimension_numbers = #tpu.dot_dimension_numbers<[1], [0], [0], [1], [0, 0, 1, 1], [], []>} : vector<32x4xf32>, vector<4x1xf32>, vector<32x1xf32> -> vector<32x1xf32>
    %432 = vector.extract_strided_slice %4 {offsets = [1, 0, 0], sizes = [1, 4, 1], strides = [1, 1, 1]} : vector<3x4x1xf32> to vector<1x4x1xf32>
    %433 = vector.shape_cast %432 : vector<1x4x1xf32> to vector<4x1xf32>
    %cst_136 = arith.constant dense<0.000000e+00> : vector<32x1xf32>
    %434 = tpu.matmul %423, %433, %cst_136 {dimension_numbers = #tpu.dot_dimension_numbers<[1], [0], [0], [1], [0, 0, 1, 1], [], []>} : vector<32x4xf32>, vector<4x1xf32>, vector<32x1xf32> -> vector<32x1xf32>
    %435 = arith.addf %431, %434 : vector<32x1xf32>
    %c31_i32_137 = arith.constant 31 : i32
    %436 = tpu.dynamic_rotate %423 by %c31_i32_137 dim 0 : vector<32x4xf32>, i32 -> vector<32x4xf32>
    %cst_138 = arith.constant 0.000000e+00 : f32
    %437 = vector.shape_cast %26 : vector<32x1xi1> to vector<32x1xi1>
    %438 = vector.broadcast %437 : vector<32x1xi1> to vector<32x4xi1>
    %439 = vector.broadcast %cst_138 : f32 to vector<32x4xf32>
    %440 = arith.select %438, %439, %436 : vector<32x4xi1>, vector<32x4xf32>
    %441 = vector.extract_strided_slice %4 {offsets = [2, 0, 0], sizes = [1, 4, 1], strides = [1, 1, 1]} : vector<3x4x1xf32> to vector<1x4x1xf32>
    %442 = vector.shape_cast %441 : vector<1x4x1xf32> to vector<4x1xf32>
    %cst_139 = arith.constant dense<0.000000e+00> : vector<32x1xf32>
    %443 = tpu.matmul %440, %442, %cst_139 {dimension_numbers = #tpu.dot_dimension_numbers<[1], [0], [0], [1], [0, 0, 1, 1], [], []>} : vector<32x4xf32>, vector<4x1xf32>, vector<32x1xf32> -> vector<32x1xf32>
    %444 = arith.addf %435, %443 : vector<32x1xf32>
    %445 = arith.subf %444, %0 : vector<32x1xf32>
    %c1_i32_140 = arith.constant 1 : i32
    %446 = tpu.dynamic_rotate %445 by %c1_i32_140 dim 0 : vector<32x1xf32>, i32 -> vector<32x1xf32>
    %cst_141 = arith.constant 0.000000e+00 : f32
    %447 = vector.broadcast %cst_141 : f32 to vector<32x1xf32>
    %448 = arith.select %23, %447, %446 : vector<32x1xi1>, vector<32x1xf32>
    %449 = vector.extract_strided_slice %1 {offsets = [0, 0, 0], sizes = [1, 1, 4], strides = [1, 1, 1]} : vector<3x1x4xf32> to vector<1x1x4xf32>
    %450 = vector.shape_cast %449 : vector<1x1x4xf32> to vector<1x4xf32>
    %451 = vector.broadcast %448 : vector<32x1xf32> to vector<32x4xf32>
    %452 = vector.broadcast %450 : vector<1x4xf32> to vector<32x4xf32>
    %453 = arith.mulf %451, %452 : vector<32x4xf32>
    %454 = vector.extract_strided_slice %1 {offsets = [1, 0, 0], sizes = [1, 1, 4], strides = [1, 1, 1]} : vector<3x1x4xf32> to vector<1x1x4xf32>
    %455 = vector.shape_cast %454 : vector<1x1x4xf32> to vector<1x4xf32>
    %456 = vector.broadcast %445 : vector<32x1xf32> to vector<32x4xf32>
    %457 = vector.broadcast %455 : vector<1x4xf32> to vector<32x4xf32>
    %458 = arith.mulf %456, %457 : vector<32x4xf32>
    %459 = arith.addf %453, %458 : vector<32x4xf32>
    %c31_i32_142 = arith.constant 31 : i32
    %460 = tpu.dynamic_rotate %445 by %c31_i32_142 dim 0 : vector<32x1xf32>, i32 -> vector<32x1xf32>
    %cst_143 = arith.constant 0.000000e+00 : f32
    %461 = vector.broadcast %cst_143 : f32 to vector<32x1xf32>
    %462 = arith.select %26, %461, %460 : vector<32x1xi1>, vector<32x1xf32>
    %463 = vector.extract_strided_slice %1 {offsets = [2, 0, 0], sizes = [1, 1, 4], strides = [1, 1, 1]} : vector<3x1x4xf32> to vector<1x1x4xf32>
    %464 = vector.shape_cast %463 : vector<1x1x4xf32> to vector<1x4xf32>
    %465 = vector.broadcast %462 : vector<32x1xf32> to vector<32x4xf32>
    %466 = vector.broadcast %464 : vector<1x4xf32> to vector<32x4xf32>
    %467 = arith.mulf %465, %466 : vector<32x4xf32>
    %468 = arith.addf %459, %467 : vector<32x4xf32>
    %469 = vector.broadcast %7 : f32 to vector<32x4xf32>
    %470 = arith.mulf %469, %468 : vector<32x4xf32>
    %471 = arith.subf %423, %470 : vector<32x4xf32>
    %472 = vector.broadcast %10 : vector<1x4xf32> to vector<32x4xf32>
    %473 = arith.addf %471, %472 : vector<32x4xf32>
    %474 = vector.broadcast %13 : vector<1x4xf32> to vector<32x4xf32>
    %475 = arith.cmpf ogt, %473, %474 : vector<32x4xf32>
    %476 = vector.broadcast %13 : vector<1x4xf32> to vector<32x4xf32>
    %477 = arith.subf %473, %476 : vector<32x4xf32>
    %cst_144 = arith.constant 0.000000e+00 : f32
    %478 = vector.broadcast %cst_144 : f32 to vector<32x4xf32>
    %479 = arith.select %475, %477, %478 : vector<32x4xi1>, vector<32x4xf32>
    %cst_145 = arith.constant 0.000000e+00 : f32
    %480 = vector.broadcast %cst_145 : f32 to vector<1x4xf32>
    %481 = arith.subf %480, %13 : vector<1x4xf32>
    %482 = vector.broadcast %481 : vector<1x4xf32> to vector<32x4xf32>
    %483 = arith.cmpf olt, %473, %482 : vector<32x4xf32>
    %484 = vector.broadcast %13 : vector<1x4xf32> to vector<32x4xf32>
    %485 = arith.addf %473, %484 : vector<32x4xf32>
    %cst_146 = arith.constant 0.000000e+00 : f32
    %486 = vector.broadcast %cst_146 : f32 to vector<32x4xf32>
    %487 = arith.select %483, %485, %486 : vector<32x4xi1>, vector<32x4xf32>
    %488 = arith.addf %479, %487 : vector<32x4xf32>
    %c1_i32_147 = arith.constant 1 : i32
    %489 = tpu.dynamic_rotate %402 by %c1_i32_147 dim 0 : vector<32x8xf32>, i32 -> vector<32x8xf32>
    %cst_148 = arith.constant 0.000000e+00 : f32
    %490 = vector.shape_cast %23 : vector<32x1xi1> to vector<32x1xi1>
    %491 = vector.broadcast %490 : vector<32x1xi1> to vector<32x8xi1>
    %492 = vector.broadcast %cst_148 : f32 to vector<32x8xf32>
    %493 = arith.select %491, %492, %489 : vector<32x8xi1>, vector<32x8xf32>
    %494 = vector.extract_strided_slice %5 {offsets = [0, 0, 0], sizes = [1, 8, 4], strides = [1, 1, 1]} : vector<3x8x4xf32> to vector<1x8x4xf32>
    %495 = vector.shape_cast %494 : vector<1x8x4xf32> to vector<8x4xf32>
    %cst_149 = arith.constant dense<0.000000e+00> : vector<32x4xf32>
    %496 = tpu.matmul %493, %495, %cst_149 {dimension_numbers = #tpu.dot_dimension_numbers<[1], [0], [0], [1], [0, 0, 1, 1], [], []>} : vector<32x8xf32>, vector<8x4xf32>, vector<32x4xf32> -> vector<32x4xf32>
    %497 = vector.extract_strided_slice %5 {offsets = [1, 0, 0], sizes = [1, 8, 4], strides = [1, 1, 1]} : vector<3x8x4xf32> to vector<1x8x4xf32>
    %498 = vector.shape_cast %497 : vector<1x8x4xf32> to vector<8x4xf32>
    %cst_150 = arith.constant dense<0.000000e+00> : vector<32x4xf32>
    %499 = tpu.matmul %402, %498, %cst_150 {dimension_numbers = #tpu.dot_dimension_numbers<[1], [0], [0], [1], [0, 0, 1, 1], [], []>} : vector<32x8xf32>, vector<8x4xf32>, vector<32x4xf32> -> vector<32x4xf32>
    %500 = arith.addf %496, %499 : vector<32x4xf32>
    %c31_i32_151 = arith.constant 31 : i32
    %501 = tpu.dynamic_rotate %402 by %c31_i32_151 dim 0 : vector<32x8xf32>, i32 -> vector<32x8xf32>
    %cst_152 = arith.constant 0.000000e+00 : f32
    %502 = vector.shape_cast %26 : vector<32x1xi1> to vector<32x1xi1>
    %503 = vector.broadcast %502 : vector<32x1xi1> to vector<32x8xi1>
    %504 = vector.broadcast %cst_152 : f32 to vector<32x8xf32>
    %505 = arith.select %503, %504, %501 : vector<32x8xi1>, vector<32x8xf32>
    %506 = vector.extract_strided_slice %5 {offsets = [2, 0, 0], sizes = [1, 8, 4], strides = [1, 1, 1]} : vector<3x8x4xf32> to vector<1x8x4xf32>
    %507 = vector.shape_cast %506 : vector<1x8x4xf32> to vector<8x4xf32>
    %cst_153 = arith.constant dense<0.000000e+00> : vector<32x4xf32>
    %508 = tpu.matmul %505, %507, %cst_153 {dimension_numbers = #tpu.dot_dimension_numbers<[1], [0], [0], [1], [0, 0, 1, 1], [], []>} : vector<32x8xf32>, vector<8x4xf32>, vector<32x4xf32> -> vector<32x4xf32>
    %509 = arith.addf %500, %508 : vector<32x4xf32>
    %510 = arith.subf %509, %488 : vector<32x4xf32>
    %c1_i32_154 = arith.constant 1 : i32
    %511 = tpu.dynamic_rotate %510 by %c1_i32_154 dim 0 : vector<32x4xf32>, i32 -> vector<32x4xf32>
    %cst_155 = arith.constant 0.000000e+00 : f32
    %512 = vector.shape_cast %23 : vector<32x1xi1> to vector<32x1xi1>
    %513 = vector.broadcast %512 : vector<32x1xi1> to vector<32x4xi1>
    %514 = vector.broadcast %cst_155 : f32 to vector<32x4xf32>
    %515 = arith.select %513, %514, %511 : vector<32x4xi1>, vector<32x4xf32>
    %516 = vector.extract_strided_slice %2 {offsets = [0, 0, 0], sizes = [1, 4, 8], strides = [1, 1, 1]} : vector<3x4x8xf32> to vector<1x4x8xf32>
    %517 = vector.shape_cast %516 : vector<1x4x8xf32> to vector<4x8xf32>
    %cst_156 = arith.constant dense<0.000000e+00> : vector<32x8xf32>
    %518 = tpu.matmul %515, %517, %cst_156 {dimension_numbers = #tpu.dot_dimension_numbers<[1], [0], [0], [1], [0, 0, 1, 1], [], []>} : vector<32x4xf32>, vector<4x8xf32>, vector<32x8xf32> -> vector<32x8xf32>
    %519 = vector.extract_strided_slice %2 {offsets = [1, 0, 0], sizes = [1, 4, 8], strides = [1, 1, 1]} : vector<3x4x8xf32> to vector<1x4x8xf32>
    %520 = vector.shape_cast %519 : vector<1x4x8xf32> to vector<4x8xf32>
    %cst_157 = arith.constant dense<0.000000e+00> : vector<32x8xf32>
    %521 = tpu.matmul %510, %520, %cst_157 {dimension_numbers = #tpu.dot_dimension_numbers<[1], [0], [0], [1], [0, 0, 1, 1], [], []>} : vector<32x4xf32>, vector<4x8xf32>, vector<32x8xf32> -> vector<32x8xf32>
    %522 = arith.addf %518, %521 : vector<32x8xf32>
    %c31_i32_158 = arith.constant 31 : i32
    %523 = tpu.dynamic_rotate %510 by %c31_i32_158 dim 0 : vector<32x4xf32>, i32 -> vector<32x4xf32>
    %cst_159 = arith.constant 0.000000e+00 : f32
    %524 = vector.shape_cast %26 : vector<32x1xi1> to vector<32x1xi1>
    %525 = vector.broadcast %524 : vector<32x1xi1> to vector<32x4xi1>
    %526 = vector.broadcast %cst_159 : f32 to vector<32x4xf32>
    %527 = arith.select %525, %526, %523 : vector<32x4xi1>, vector<32x4xf32>
    %528 = vector.extract_strided_slice %2 {offsets = [2, 0, 0], sizes = [1, 4, 8], strides = [1, 1, 1]} : vector<3x4x8xf32> to vector<1x4x8xf32>
    %529 = vector.shape_cast %528 : vector<1x4x8xf32> to vector<4x8xf32>
    %cst_160 = arith.constant dense<0.000000e+00> : vector<32x8xf32>
    %530 = tpu.matmul %527, %529, %cst_160 {dimension_numbers = #tpu.dot_dimension_numbers<[1], [0], [0], [1], [0, 0, 1, 1], [], []>} : vector<32x4xf32>, vector<4x8xf32>, vector<32x8xf32> -> vector<32x8xf32>
    %531 = arith.addf %522, %530 : vector<32x8xf32>
    %532 = vector.broadcast %8 : f32 to vector<32x8xf32>
    %533 = arith.mulf %532, %531 : vector<32x8xf32>
    %534 = arith.subf %402, %533 : vector<32x8xf32>
    %535 = vector.broadcast %11 : vector<1x8xf32> to vector<32x8xf32>
    %536 = arith.addf %534, %535 : vector<32x8xf32>
    %537 = vector.broadcast %14 : vector<1x8xf32> to vector<32x8xf32>
    %538 = arith.cmpf ogt, %536, %537 : vector<32x8xf32>
    %539 = vector.broadcast %14 : vector<1x8xf32> to vector<32x8xf32>
    %540 = arith.subf %536, %539 : vector<32x8xf32>
    %cst_161 = arith.constant 0.000000e+00 : f32
    %541 = vector.broadcast %cst_161 : f32 to vector<32x8xf32>
    %542 = arith.select %538, %540, %541 : vector<32x8xi1>, vector<32x8xf32>
    %cst_162 = arith.constant 0.000000e+00 : f32
    %543 = vector.broadcast %cst_162 : f32 to vector<1x8xf32>
    %544 = arith.subf %543, %14 : vector<1x8xf32>
    %545 = vector.broadcast %544 : vector<1x8xf32> to vector<32x8xf32>
    %546 = arith.cmpf olt, %536, %545 : vector<32x8xf32>
    %547 = vector.broadcast %14 : vector<1x8xf32> to vector<32x8xf32>
    %548 = arith.addf %536, %547 : vector<32x8xf32>
    %cst_163 = arith.constant 0.000000e+00 : f32
    %549 = vector.broadcast %cst_163 : f32 to vector<32x8xf32>
    %550 = arith.select %546, %548, %549 : vector<32x8xi1>, vector<32x8xf32>
    %551 = arith.addf %542, %550 : vector<32x8xf32>
    %c1_i32_164 = arith.constant 1 : i32
    %552 = tpu.dynamic_rotate %381 by %c1_i32_164 dim 0 : vector<32x16xf32>, i32 -> vector<32x16xf32>
    %cst_165 = arith.constant 0.000000e+00 : f32
    %553 = vector.shape_cast %23 : vector<32x1xi1> to vector<32x1xi1>
    %554 = vector.broadcast %553 : vector<32x1xi1> to vector<32x16xi1>
    %555 = vector.broadcast %cst_165 : f32 to vector<32x16xf32>
    %556 = arith.select %554, %555, %552 : vector<32x16xi1>, vector<32x16xf32>
    %557 = vector.extract_strided_slice %6 {offsets = [0, 0, 0], sizes = [1, 16, 8], strides = [1, 1, 1]} : vector<3x16x8xf32> to vector<1x16x8xf32>
    %558 = vector.shape_cast %557 : vector<1x16x8xf32> to vector<16x8xf32>
    %cst_166 = arith.constant dense<0.000000e+00> : vector<32x8xf32>
    %559 = tpu.matmul %556, %558, %cst_166 {dimension_numbers = #tpu.dot_dimension_numbers<[1], [0], [0], [1], [0, 0, 1, 1], [], []>} : vector<32x16xf32>, vector<16x8xf32>, vector<32x8xf32> -> vector<32x8xf32>
    %560 = vector.extract_strided_slice %6 {offsets = [1, 0, 0], sizes = [1, 16, 8], strides = [1, 1, 1]} : vector<3x16x8xf32> to vector<1x16x8xf32>
    %561 = vector.shape_cast %560 : vector<1x16x8xf32> to vector<16x8xf32>
    %cst_167 = arith.constant dense<0.000000e+00> : vector<32x8xf32>
    %562 = tpu.matmul %381, %561, %cst_167 {dimension_numbers = #tpu.dot_dimension_numbers<[1], [0], [0], [1], [0, 0, 1, 1], [], []>} : vector<32x16xf32>, vector<16x8xf32>, vector<32x8xf32> -> vector<32x8xf32>
    %563 = arith.addf %559, %562 : vector<32x8xf32>
    %c31_i32_168 = arith.constant 31 : i32
    %564 = tpu.dynamic_rotate %381 by %c31_i32_168 dim 0 : vector<32x16xf32>, i32 -> vector<32x16xf32>
    %cst_169 = arith.constant 0.000000e+00 : f32
    %565 = vector.shape_cast %26 : vector<32x1xi1> to vector<32x1xi1>
    %566 = vector.broadcast %565 : vector<32x1xi1> to vector<32x16xi1>
    %567 = vector.broadcast %cst_169 : f32 to vector<32x16xf32>
    %568 = arith.select %566, %567, %564 : vector<32x16xi1>, vector<32x16xf32>
    %569 = vector.extract_strided_slice %6 {offsets = [2, 0, 0], sizes = [1, 16, 8], strides = [1, 1, 1]} : vector<3x16x8xf32> to vector<1x16x8xf32>
    %570 = vector.shape_cast %569 : vector<1x16x8xf32> to vector<16x8xf32>
    %cst_170 = arith.constant dense<0.000000e+00> : vector<32x8xf32>
    %571 = tpu.matmul %568, %570, %cst_170 {dimension_numbers = #tpu.dot_dimension_numbers<[1], [0], [0], [1], [0, 0, 1, 1], [], []>} : vector<32x16xf32>, vector<16x8xf32>, vector<32x8xf32> -> vector<32x8xf32>
    %572 = arith.addf %563, %571 : vector<32x8xf32>
    %573 = arith.subf %572, %551 : vector<32x8xf32>
    %c1_i32_171 = arith.constant 1 : i32
    %574 = tpu.dynamic_rotate %573 by %c1_i32_171 dim 0 : vector<32x8xf32>, i32 -> vector<32x8xf32>
    %cst_172 = arith.constant 0.000000e+00 : f32
    %575 = vector.shape_cast %23 : vector<32x1xi1> to vector<32x1xi1>
    %576 = vector.broadcast %575 : vector<32x1xi1> to vector<32x8xi1>
    %577 = vector.broadcast %cst_172 : f32 to vector<32x8xf32>
    %578 = arith.select %576, %577, %574 : vector<32x8xi1>, vector<32x8xf32>
    %579 = vector.extract_strided_slice %3 {offsets = [0, 0, 0], sizes = [1, 8, 16], strides = [1, 1, 1]} : vector<3x8x16xf32> to vector<1x8x16xf32>
    %580 = vector.shape_cast %579 : vector<1x8x16xf32> to vector<8x16xf32>
    %cst_173 = arith.constant dense<0.000000e+00> : vector<32x16xf32>
    %581 = tpu.matmul %578, %580, %cst_173 {dimension_numbers = #tpu.dot_dimension_numbers<[1], [0], [0], [1], [0, 0, 1, 1], [], []>} : vector<32x8xf32>, vector<8x16xf32>, vector<32x16xf32> -> vector<32x16xf32>
    %582 = vector.extract_strided_slice %3 {offsets = [1, 0, 0], sizes = [1, 8, 16], strides = [1, 1, 1]} : vector<3x8x16xf32> to vector<1x8x16xf32>
    %583 = vector.shape_cast %582 : vector<1x8x16xf32> to vector<8x16xf32>
    %cst_174 = arith.constant dense<0.000000e+00> : vector<32x16xf32>
    %584 = tpu.matmul %573, %583, %cst_174 {dimension_numbers = #tpu.dot_dimension_numbers<[1], [0], [0], [1], [0, 0, 1, 1], [], []>} : vector<32x8xf32>, vector<8x16xf32>, vector<32x16xf32> -> vector<32x16xf32>
    %585 = arith.addf %581, %584 : vector<32x16xf32>
    %c31_i32_175 = arith.constant 31 : i32
    %586 = tpu.dynamic_rotate %573 by %c31_i32_175 dim 0 : vector<32x8xf32>, i32 -> vector<32x8xf32>
    %cst_176 = arith.constant 0.000000e+00 : f32
    %587 = vector.shape_cast %26 : vector<32x1xi1> to vector<32x1xi1>
    %588 = vector.broadcast %587 : vector<32x1xi1> to vector<32x8xi1>
    %589 = vector.broadcast %cst_176 : f32 to vector<32x8xf32>
    %590 = arith.select %588, %589, %586 : vector<32x8xi1>, vector<32x8xf32>
    %591 = vector.extract_strided_slice %3 {offsets = [2, 0, 0], sizes = [1, 8, 16], strides = [1, 1, 1]} : vector<3x8x16xf32> to vector<1x8x16xf32>
    %592 = vector.shape_cast %591 : vector<1x8x16xf32> to vector<8x16xf32>
    %cst_177 = arith.constant dense<0.000000e+00> : vector<32x16xf32>
    %593 = tpu.matmul %590, %592, %cst_177 {dimension_numbers = #tpu.dot_dimension_numbers<[1], [0], [0], [1], [0, 0, 1, 1], [], []>} : vector<32x8xf32>, vector<8x16xf32>, vector<32x16xf32> -> vector<32x16xf32>
    %594 = arith.addf %585, %593 : vector<32x16xf32>
    %595 = vector.broadcast %9 : f32 to vector<32x16xf32>
    %596 = arith.mulf %595, %594 : vector<32x16xf32>
    %597 = arith.subf %381, %596 : vector<32x16xf32>
    %598 = vector.broadcast %12 : vector<1x16xf32> to vector<32x16xf32>
    %599 = arith.addf %597, %598 : vector<32x16xf32>
    %600 = vector.broadcast %15 : vector<1x16xf32> to vector<32x16xf32>
    %601 = arith.cmpf ogt, %599, %600 : vector<32x16xf32>
    %602 = vector.broadcast %15 : vector<1x16xf32> to vector<32x16xf32>
    %603 = arith.subf %599, %602 : vector<32x16xf32>
    %cst_178 = arith.constant 0.000000e+00 : f32
    %604 = vector.broadcast %cst_178 : f32 to vector<32x16xf32>
    %605 = arith.select %601, %603, %604 : vector<32x16xi1>, vector<32x16xf32>
    %cst_179 = arith.constant 0.000000e+00 : f32
    %606 = vector.broadcast %cst_179 : f32 to vector<1x16xf32>
    %607 = arith.subf %606, %15 : vector<1x16xf32>
    %608 = vector.broadcast %607 : vector<1x16xf32> to vector<32x16xf32>
    %609 = arith.cmpf olt, %599, %608 : vector<32x16xf32>
    %610 = vector.broadcast %15 : vector<1x16xf32> to vector<32x16xf32>
    %611 = arith.addf %599, %610 : vector<32x16xf32>
    %cst_180 = arith.constant 0.000000e+00 : f32
    %612 = vector.broadcast %cst_180 : f32 to vector<32x16xf32>
    %613 = arith.select %609, %611, %612 : vector<32x16xi1>, vector<32x16xf32>
    %614 = arith.addf %605, %613 : vector<32x16xf32>
    %615 = math.absf %614 : vector<32x16xf32>
    %616 = vector.shape_cast %615 : vector<32x16xf32> to vector<2x16x16xf32>
    %cst_181 = arith.constant dense<0xFF800000> : vector<2x16xf32>
    %617 = vector.multi_reduction <maximumf>, %616, %cst_181 [1] : vector<2x16x16xf32> to vector<2x16xf32>
    %c0_182 = arith.constant 0 : index
    %c0_183 = arith.constant 0 : index
    %618 = vector.load %arg15[%c0_182, %c0_183] : memref<16x10xf32, #tpu.memory_space<vmem>>, vector<16x10xf32>
    %cst_184 = arith.constant dense<0.000000e+00> : vector<2x10xf32>
    %619 = tpu.matmul %617, %618, %cst_184 {dimension_numbers = #tpu.dot_dimension_numbers<[1], [0], [0], [1], [0, 0, 1, 1], [], []>} : vector<2x16xf32>, vector<16x10xf32>, vector<2x10xf32> -> vector<2x10xf32>
    %c0_185 = arith.constant 0 : index
    %c0_186 = arith.constant 0 : index
    %620 = vector.load %arg16[%c0_185, %c0_186] : memref<1x10xf32, #tpu.memory_space<vmem>>, vector<1x10xf32>
    %621 = vector.broadcast %620 : vector<1x10xf32> to vector<2x10xf32>
    %622 = arith.addf %619, %621 : vector<2x10xf32>
    %cst_187 = arith.constant dense<0xFF800000> : vector<2xf32>
    %623 = vector.multi_reduction <maximumf>, %622, %cst_187 [1] : vector<2x10xf32> to vector<2xf32>
    %624 = vector.shape_cast %623 : vector<2xf32> to vector<2x1xf32>
    %625 = vector.broadcast %624 : vector<2x1xf32> to vector<2x10xf32>
    %626 = arith.subf %622, %625 : vector<2x10xf32>
    %627 = math.exp %626 : vector<2x10xf32>
    %cst_188 = arith.constant dense<0.000000e+00> : vector<2xf32>
    %628 = vector.multi_reduction <add>, %627, %cst_188 [1] : vector<2x10xf32> to vector<2xf32>
    %629 = vector.shape_cast %628 : vector<2xf32> to vector<2x1xf32>
    %630 = math.log %629 : vector<2x1xf32>
    %631 = arith.addf %624, %630 : vector<2x1xf32>
    %632 = vector.broadcast %631 : vector<2x1xf32> to vector<2x10xf32>
    %633 = arith.subf %622, %632 : vector<2x10xf32>
    %c0_189 = arith.constant 0 : index
    %c0_190 = arith.constant 0 : index
    %634 = vector.load %arg17[%c0_189, %c0_190] : memref<2x10xf32, #tpu.memory_space<vmem>>, vector<2x10xf32>
    tpu.vector_store %arg17[%c0_189, %c0_190], %633 {strides = array<i32>} : memref<2x10xf32, #tpu.memory_space<vmem>>, vector<2x10xf32>,
    return
  }
  func.func @transform_0(%arg0: i32) -> (i32, i32) {
    %c0_i32 = arith.constant 0 : i32
    %c0_i32_0 = arith.constant 0 : i32
    %c0_i32_1 = arith.constant 0 : i32
    return %c0_i32, %c0_i32_0 : i32, i32
  }
  func.func @transform_1(%arg0: i32) -> (i32, i32, i32) {
    %c0_i32 = arith.constant 0 : i32
    %c0_i32_0 = arith.constant 0 : i32
    %c0_i32_1 = arith.constant 0 : i32
    %c0_i32_2 = arith.constant 0 : i32
    return %c0_i32, %c0_i32_0, %c0_i32_1 : i32, i32, i32
  }
  func.func @transform_2(%arg0: i32) -> (i32, i32, i32) {
    %c0_i32 = arith.constant 0 : i32
    %c0_i32_0 = arith.constant 0 : i32
    %c0_i32_1 = arith.constant 0 : i32
    %c0_i32_2 = arith.constant 0 : i32
    return %c0_i32, %c0_i32_0, %c0_i32_1 : i32, i32, i32
  }
  func.func @transform_3(%arg0: i32) -> (i32, i32, i32) {
    %c0_i32 = arith.constant 0 : i32
    %c0_i32_0 = arith.constant 0 : i32
    %c0_i32_1 = arith.constant 0 : i32
    %c0_i32_2 = arith.constant 0 : i32
    return %c0_i32, %c0_i32_0, %c0_i32_1 : i32, i32, i32
  }
  func.func @transform_4(%arg0: i32) -> (i32, i32, i32) {
    %c0_i32 = arith.constant 0 : i32
    %c0_i32_0 = arith.constant 0 : i32
    %c0_i32_1 = arith.constant 0 : i32
    %c0_i32_2 = arith.constant 0 : i32
    return %c0_i32, %c0_i32_0, %c0_i32_1 : i32, i32, i32
  }
  func.func @transform_5(%arg0: i32) -> (i32, i32, i32) {
    %c0_i32 = arith.constant 0 : i32
    %c0_i32_0 = arith.constant 0 : i32
    %c0_i32_1 = arith.constant 0 : i32
    %c0_i32_2 = arith.constant 0 : i32
    return %c0_i32, %c0_i32_0, %c0_i32_1 : i32, i32, i32
  }
  func.func @transform_6(%arg0: i32) -> (i32, i32, i32) {
    %c0_i32 = arith.constant 0 : i32
    %c0_i32_0 = arith.constant 0 : i32
    %c0_i32_1 = arith.constant 0 : i32
    %c0_i32_2 = arith.constant 0 : i32
    return %c0_i32, %c0_i32_0, %c0_i32_1 : i32, i32, i32
  }
  func.func @transform_7(%arg0: i32) -> i32 {
    %c0_i32 = arith.constant 0 : i32
    %c0_i32_0 = arith.constant 0 : i32
    return %c0_i32 : i32
  }
  func.func @transform_8(%arg0: i32) -> (i32, i32) {
    %c0_i32 = arith.constant 0 : i32
    %c0_i32_0 = arith.constant 0 : i32
    %c0_i32_1 = arith.constant 0 : i32
    return %c0_i32, %c0_i32_0 : i32, i32
  }
  func.func @transform_9(%arg0: i32) -> (i32, i32) {
    %c0_i32 = arith.constant 0 : i32
    %c0_i32_0 = arith.constant 0 : i32
    %c0_i32_1 = arith.constant 0 : i32
    return %c0_i32, %c0_i32_0 : i32, i32
  }
  func.func @transform_10(%arg0: i32) -> (i32, i32) {
    %c0_i32 = arith.constant 0 : i32
    %c0_i32_0 = arith.constant 0 : i32
    %c0_i32_1 = arith.constant 0 : i32
    return %c0_i32, %c0_i32_0 : i32, i32
  }
  func.func @transform_11(%arg0: i32) -> (i32, i32) {
    %c0_i32 = arith.constant 0 : i32
    %c0_i32_0 = arith.constant 0 : i32
    %c0_i32_1 = arith.constant 0 : i32
    return %c0_i32, %c0_i32_0 : i32, i32
  }
  func.func @transform_12(%arg0: i32) -> (i32, i32) {
    %c0_i32 = arith.constant 0 : i32
    %c0_i32_0 = arith.constant 0 : i32
    %c0_i32_1 = arith.constant 0 : i32
    return %c0_i32, %c0_i32_0 : i32, i32
  }
  func.func @transform_13(%arg0: i32) -> (i32, i32) {
    %c0_i32 = arith.constant 0 : i32
    %c0_i32_0 = arith.constant 0 : i32
    %c0_i32_1 = arith.constant 0 : i32
    return %c0_i32, %c0_i32_0 : i32, i32
  }
  func.func @transform_14(%arg0: i32) -> (i32, i32) {
    %c0_i32 = arith.constant 0 : i32
    %c0_i32_0 = arith.constant 0 : i32
    %c0_i32_1 = arith.constant 0 : i32
    return %c0_i32, %c0_i32_0 : i32, i32
  }
  func.func @transform_15(%arg0: i32) -> (i32, i32) {
    %c0_i32 = arith.constant 0 : i32
    %c0_i32_0 = arith.constant 0 : i32
    %c0_i32_1 = arith.constant 0 : i32
    return %c0_i32, %c0_i32_0 : i32, i32
  }
  func.func @transform_16(%arg0: i32) -> (i32, i32) {
    %c0_i32 = arith.constant 0 : i32
    %c0_i32_0 = arith.constant 0 : i32
    %c0_i32_1 = arith.constant 0 : i32
    return %c0_i32, %c0_i32_0 : i32, i32
  }
}

</mosaic_0001>

<bundles_post_ra>
// kernel: _lambda_.1
= control target key start
LH: loop header
LB: loop body
LE: loop exit
PB: predicated region body
PF: predicated region fallthrough
CT: control target
= control target key end

     0   :  { %s4414_s0 = inlined_call_operand.vmem [shape: f32[32,1], index: 0, kind: input, shape index: {}]   ;;  %s4415_s1 = inlined_call_operand.vmem [shape: f32[3,1,4], index: 1, kind: input, shape index: {}]   ;;  %s4416_s2 = inlined_call_operand.vmem [shape: f32[3,4,8], index: 2, kind: input, shape index: {}]   ;;  %s4417_s3 = inlined_call_operand.vmem [shape: f32[3,8,16], index: 3, kind: input, shape index: {}]   ;;  %s4418_s4 = inlined_call_operand.vmem [shape: f32[3,4,1], index: 4, kind: input, shape index: {}]   ;;  %s4419_s5 = inlined_call_operand.vmem [shape: f32[3,8,4], index: 5, kind: input, shape index: {}]   ;;  %s4420_s6 = inlined_call_operand.vmem [shape: f32[3,16,8], index: 6, kind: input, shape index: {}]   ;;  %s4421_s7 = inlined_call_operand.vmem [shape: f32[3], index: 7, kind: input, shape index: {}]   ;;  %s4422_s8 = inlined_call_operand.vmem [shape: f32[1,4], index: 8, kind: input, shape index: {}]   ;;  %s4423_s9 = inlined_call_operand.vmem [shape: f32[1,8], index: 9, kind: input, shape index: {}]   ;;  %s4424_s10 = inlined_call_operand.vmem [shape: f32[1,16], index: 10, kind: input, shape index: {}]   ;;  %s4425_s11 = inlined_call_operand.vmem [shape: f32[1,4], index: 11, kind: input, shape index: {}]   ;;  %s4426_s12 = inlined_call_operand.vmem [shape: f32[1,8], index: 12, kind: input, shape index: {}]   ;;  %s4427_s13 = inlined_call_operand.vmem [shape: f32[1,16], index: 13, kind: input, shape index: {}]   ;;  %s4428_s14 = inlined_call_operand.vmem [shape: f32[16,10], index: 14, kind: input, shape index: {}]   ;;  %s4429_s15 = inlined_call_operand.vmem [shape: f32[1,10], index: 15, kind: input, shape index: {}]   ;;  %s4430_s16 = inlined_call_operand.hbm [shape: f32[2,10], index: 16, kind: output, shape index: {}]  }
   0x1   :  { %4432 = sst [smem:[#allocation8_spill]] %s4414_s0 }
   0x2   :  { %21 = vsyncpa [#allocation4], 0 }
   0x3   :  { %22 = vsyncpa [#allocation3], 0  ;;  %s42_s23 = sshll.u32 %s4421_s7, 4  ;;  %s3035_s24 = smov [#allocation2]   ;;  %s43_s23 = int_to_ptr.vmem [resolvable:$true] %s42_s23 }
   0x4   :  { %45 = dma.vmem_to_smem %s43_s23, 16, %s3035_s24, [#allocation4]  }
   0x5   :  { %3031 = dma.done.wait [#allocation4], 16  }
   0x6   :  { %3032 = vsyncadd [#allocation4], 4294967280 }
   0x7   :  { %66 = sfence }
   0x8   :  { %s4433_s27 = sld [smem:[#allocation8_spill]]  ;;  %v101_v2 = vlaneseq  ;;  %v3036_v4 = vmov 0   ;;  %v3182_v30 = vld [vmem:[%s4416_s2 + $0x4] sm:$0xf]  ;;  %vm325_vm6 = vcmask 1043456   ;;  %vm312_vm9 = vcmask 31744  }
   0x9   :  { %2960 = vset.pattern.permute.xlu1 %v3036_v4  ;;  %2959 = vset.pattern.permute.xlu0 %v3036_v4  ;;  %v3189_v32 = vld [vmem:[%s4416_s2 + $0x8] sm:$0xf]  ;;  %v3194_v33 = vld [vmem:[%s4415_s1 + $0x1] ss:$0 sm:$0xff]  ;;  %s92_s24 = sld [smem:[#allocation2]]  ;;  %s3037_s30 = smov [#allocation5]  }
   0xa   :  { %v3138_v10 = vshrl.u32 %v101_v2, 7  ;;  %2961 = vset.pattern.permute.xlu2 %v3036_v4  ;;  %2796 = vmatpush.msk.msra.mxu0 %vm325_vm6, %v3182_v30  ;;  %v3201_v35 = vld [vmem:[%s4415_s1 + $0x2] ss:$0 sm:$0xff]  ;;  %v3206_v36 = vld [vmem:[%s4415_s1] ss:$0 sm:$0xff]  ;;  %s2794_s29 = sld [smem:[#allocation2 + $0x1]] }
   0xb   :  { %2806 = vmatpush.msk.msra.mxu2 %vm325_vm6, %v3189_v32  ;;  %v98_v39 = vld [vmem:[%s4425_s11] sm:$0x1]  ;;  %s2795_s0 = sld [smem:[#allocation2 + $0x2]] }
   0xc   :  { %vm106_vm0 = vcmp.eq.s32.totalorder %v3138_v10, 0  ;;  %vm134_vm1 = vcmp.lt.s32.totalorder %v3138_v10, 1  ;;  %vm205_vm2 = vcmp.lt.s32.totalorder %v3138_v10, 7  ;;  %v3144_v12 = vadd.s32 8, %v3138_v10  ;;  %v3217_v42 = vld [vmem:[%s4416_s2] sm:$0xf] }
   0xd   :  { %v3160_v20 = vadd.s32 24, %v3138_v10  ;;  %v3170_v26 = vadd.s32 16, %v3138_v10  ;;  %2801 = vmatpush.msk.msra.mxu1 %vm325_vm6, %v3217_v42  ;;  %v272_v46 = vsub.f32 0.0, %v98_v39  ;;  %v3226_v48 = vld [vmem:[%s4422_s8] ss:$0 sm:$0xff]  ;;  %v2731_v10 = vld [vmem:[%s4428_s14 + $0x8] sm:$0xff] }
   0xe   :  { %v67_v0 = vld [vmem:[%s4433_s27] sm:$0xff]  ;;  %v70_v1 = vld [vmem:[%s4433_s27 + $0x18] sm:$0xff]  ;;  %v68_v3 = vld [vmem:[%s4433_s27 + $0x8] sm:$0xff]  ;;  %vm111_vm3 = vcmp.eq.s32.totalorder %v3144_v12, 15 }
   0xf   :  { %v130_v5 = vrot.slane %v67_v0, 7  ;;  %v133_v6 = vrot.slane %v70_v1, 7  ;;  %v201_v7 = vrot.slane %v67_v0, 1  ;;  %v202_v8 = vrot.slane %v68_v3, 1  ;;  %v69_v9 = vld [vmem:[%s4433_s27 + $0x10] sm:$0xff]  ;;  %172 = vperm.xlu1 %2960, %v67_v0  }
  0x10   :  { %v203_v11 = vrot.slane %v69_v9, 1  ;;  %v131_v16 = vrot.slane %v68_v3, 7  ;;  %v204_v21 = vrot.slane %v70_v1, 1  ;;  %v132_v22 = vrot.slane %v69_v9, 7  ;;  %v3232_v51 = vld [vmem:[%s4425_s11] ss:$0 sm:$0xff] }
  0x11   :  { %v138_v13 = vsel %vm134_vm1, %v133_v6, %v130_v5  ;;  %v208_v14 = vsel %vm205_vm2, %v201_v7, %v202_v8  ;;  %vm125_vm4 = vcmp.eq.s32.totalorder %v3160_v20, 31  ;;  %vm116_vm5 = vcmp.eq.s32.totalorder %v3170_v26, 16 }
  0x12   :  { %v139_v15 = vsel %vm106_vm0, 0.0, %v138_v13  ;;  %216 = vperm.xlu2 %2961, %v208_v14   ;;  %v207_v17 = vsel %vm205_vm2, %v202_v8, %v203_v11  ;;  %v137_v19 = vsel %vm134_vm1, %v130_v5, %v131_v16  ;;  %v209_v23 = vsel %vm205_vm2, %v204_v21, %v201_v7 }
  0x13   :  { %145 = vperm.xlu0 %2959, %v139_v15   ;;  %v211_v18 = vsel %vm111_vm3, 0.0, %v207_v17  ;;  %v213_v24 = vsel %vm125_vm4, 0.0, %v209_v23  ;;  %v135_v25 = vsel %vm134_vm1, %v132_v22, %v133_v6  ;;  %v136_v27 = vsel %vm134_vm1, %v131_v16, %v132_v22 }
  0x14   :  { %v206_v28 = vsel %vm205_vm2, %v203_v11, %v204_v21  ;;  %v141_v29 = vsel %vm116_vm5, 0.0, %v136_v27  ;;  %v3221_v47 = vstv %s92_s24  ;;  %v3234_v52 = vperm.slane %v272_v46, 0 }
  0x17   :  { %177 = vperm.xlu1 %2960, %v68_v3  }
  0x1a   :  { %221 = vperm.xlu2 %2961, %v211_v18  }
  0x1b   :  { %150 = vperm.xlu0 %2959, %v137_v19  }
  0x1f   :  { %187 = vperm.xlu1 %2960, %v70_v1  }
  0x22   :  { %231 = vperm.xlu2 %2961, %v213_v24  }
  0x23   :  { %160 = vperm.xlu0 %2959, %v135_v25  }
  0x27   :  { %182 = vperm.xlu1 %2960, %v69_v9  }
  0x2a   :  { %226 = vperm.xlu2 %2961, %v206_v28  }
  0x2b   :  { %155 = vperm.xlu0 %2959, %v141_v29  }
  0x6c   :  { %v217_v31 = vpop.permute.xlu2 %216 }
  0x6d   :  { %v237_v40 = vmul.f32 %v3201_v35, %v217_v31 }
  0x74   :  { %v222_v43 = vpop.permute.xlu2 %221 }
  0x75   :  { %v238_v57 = vmul.f32 %v3201_v35, %v222_v43 }
  0x7c   :  { %v232_v62 = vpop.permute.xlu2 %231 }
  0x7d   :  { %v240_v8 = vmul.f32 %v3201_v35, %v232_v62 }
  0x81   :  { %v173_v34 = vpop.permute.xlu1 %172 }
  0x82   :  { %v193_v37 = vmul.f32 %v3194_v33, %v173_v34 }
  0x84   :  { %v227_v18 = vpop.permute.xlu2 %226 }
  0x85   :  { %v146_v38 = vpop.permute.xlu0 %145  ;;  %v239_v29 = vmul.f32 %v3201_v35, %v227_v18 }
  0x86   :  { %v166_v41 = vmul.f32 %v3206_v36, %v146_v38 }
  0x88   :  { %v197_v44 = vadd.f32 %v193_v37, %v166_v41 }
  0x89   :  { %v178_v45 = vpop.permute.xlu1 %177 }
  0x8a   :  { %v241_v49 = vadd.f32 %v237_v40, %v197_v44  ;;  %v194_v55 = vmul.f32 %v3194_v33, %v178_v45 }
  0x8c   :  { %v246_v50 = vmul.f32 %v3221_v47, %v241_v49 }
  0x8d   :  { %v151_v53 = vpop.permute.xlu0 %150 }
  0x8e   :  { %v253_v54 = vadd.f32 %v3226_v48, %v246_v50  ;;  %v167_v56 = vmul.f32 %v3206_v36, %v151_v53 }
  0x90   :  { %v198_v58 = vadd.f32 %v194_v55, %v167_v56  ;;  %vm260_vm7 = vcmp.gt.f32.partialorder %v253_v54, %v3232_v51  ;;  %v264_v59 = vsub.f32 %v253_v54, %v3232_v51  ;;  %vm276_vm8 = vcmp.lt.f32.partialorder %v253_v54, %v3234_v52 }
  0x91   :  { %v188_v60 = vpop.permute.xlu1 %187  ;;  %v280_v61 = vadd.f32 %v3232_v51, %v253_v54 }
  0x92   :  { %v242_v63 = vadd.f32 %v238_v57, %v198_v58  ;;  %v268_v0 = vsel %vm260_vm7, %v264_v59, 0.0  ;;  %v196_v6 = vmul.f32 %v3194_v33, %v188_v60 }
  0x93   :  { %v284_v1 = vsel %vm276_vm8, %v280_v61, 0.0 }
  0x94   :  { %v247_v2 = vmul.f32 %v3221_v47, %v242_v63  ;;  %v3245_v3 = vadd.f32 %v284_v1, %v268_v0 }
  0x95   :  { %v161_v4 = vpop.permute.xlu0 %160 }
  0x96   :  { %v254_v5 = vadd.f32 %v3226_v48, %v247_v2  ;;  %2797 = vmatmul.msk.f32.vlgmr.msra.gmra.mxu0 %vm312_vm9, %v3245_v3  ;;  %v169_v7 = vmul.f32 %v3206_v36, %v161_v4  ;;  %v402_v23 = vrot.slane %v3245_v3, 1  ;;  %v292_v46 = vrot.slane %v3245_v3, 7 }
  0x98   :  { %v200_v9 = vadd.f32 %v196_v6, %v169_v7  ;;  %vm261_vm10 = vcmp.gt.f32.partialorder %v254_v5, %v3232_v51  ;;  %v265_v11 = vsub.f32 %v254_v5, %v3232_v51  ;;  %vm277_vm11 = vcmp.lt.f32.partialorder %v254_v5, %v3234_v52 }
  0x99   :  { %v281_v13 = vadd.f32 %v3232_v51, %v254_v5  ;;  %v183_v16 = vpop.permute.xlu1 %182 }
  0x9a   :  { %v244_v14 = vadd.f32 %v240_v8, %v200_v9  ;;  %v269_v15 = vsel %vm261_vm10, %v265_v11, 0.0  ;;  %v195_v25 = vmul.f32 %v3194_v33, %v183_v16  ;;  %v3312_v8 = vld [vmem:[%s4417_s3 + $0x8] sm:$0xff]  ;;  %v3318_v9 = vld [vmem:[%s4417_s3] sm:$0xff]  ;;  %v3323_v11 = vld [vmem:[%s4417_s3 + $0x10] sm:$0xff]  ;;  %vm529_vm10 = vcmask 64512  }
  0x9b   :  { %v285_v17 = vsel %vm277_vm11, %v281_v13, 0.0  ;;  %557 = vmatpush.msra.mxu3 %v3312_v8  ;;  %598 = vmatpush.msrb.mxu0 %v3318_v9  ;;  %v99_v13 = vld [vmem:[%s4426_s12] sm:$0x1] }
  0x9c   :  { %v249_v19 = vmul.f32 %v3221_v47, %v244_v14  ;;  %v289_v21 = vadd.f32 %v285_v17, %v269_v15  ;;  %651 = vmatpush.msrb.mxu1 %v3323_v11  ;;  %v497_v17 = vsub.f32 0.0, %v99_v13 }
  0x9d   :  { %v156_v22 = vpop.permute.xlu0 %155 }
  0x9e   :  { %v256_v24 = vadd.f32 %v3226_v48, %v249_v19  ;;  %2798 = vmatmul.msk.f32.gmra.mxu0 %vm312_vm9, %v289_v21  ;;  %v168_v27 = vmul.f32 %v3206_v36, %v156_v22  ;;  %v403_v28 = vrot.slane %v289_v21, 1  ;;  %v293_v59 = vrot.slane %v289_v21, 7  ;;  %v3335_v22 = vld [vmem:[%s4423_s9] ss:$0 sm:$0xff] }
  0x9f   :  { %v3330_v19 = vstv %s2794_s29 }
  0xa0   :  { %v199_v31 = vadd.f32 %v195_v25, %v168_v27  ;;  %v408_v34 = vsel %vm205_vm2, %v402_v23, %v403_v28  ;;  %vm263_vm12 = vcmp.gt.f32.partialorder %v256_v24, %v3232_v51  ;;  %v267_v37 = vsub.f32 %v256_v24, %v3232_v51 }
  0xa1   :  { %2807 = vmatmul.msk.f32.vlgmr.msra.gmra.mxu2 %vm312_vm9, %v408_v34  ;;  %vm279_vm13 = vcmp.lt.f32.partialorder %v256_v24, %v3234_v52  ;;  %v283_v38 = vadd.f32 %v3232_v51, %v256_v24  ;;  %v298_v62 = vsel %vm134_vm1, %v292_v46, %v293_v59  ;;  %v3341_v24 = vld [vmem:[%s4426_s12] ss:$0 sm:$0xff]  ;;  %v3343_v25 = vperm.slane %v497_v17, 0 }
  0xa2   :  { %v243_v39 = vadd.f32 %v239_v29, %v199_v31  ;;  %v271_v40 = vsel %vm263_vm12, %v267_v37, 0.0 }
  0xa3   :  { %v287_v41 = vsel %vm279_vm13, %v283_v38, 0.0 }
  0xa4   :  { %v248_v43 = vmul.f32 %v3221_v47, %v243_v39  ;;  %v291_v44 = vadd.f32 %v287_v41, %v271_v40 }
  0xa6   :  { %v255_v45 = vadd.f32 %v3226_v48, %v248_v43  ;;  %v295_v49 = vrot.slane %v291_v44, 7  ;;  %v405_v2 = vrot.slane %v291_v44, 1 }
  0xa8   :  { %v299_v50 = vsel %vm134_vm1, %v295_v49, %v292_v46  ;;  %vm262_vm14 = vcmp.gt.f32.partialorder %v255_v45, %v3232_v51  ;;  %v266_v53 = vsub.f32 %v255_v45, %v3232_v51  ;;  %vm278_vm15 = vcmp.lt.f32.partialorder %v255_v45, %v3234_v52 }
  0xa9   :  { %v308_v54 = vsel %vm106_vm0, 0.0, %v299_v50  ;;  %v282_v55 = vadd.f32 %v3232_v51, %v255_v45  ;;  %v409_v5 = vsel %vm205_vm2, %v405_v2, %v402_v23 }
  0xaa   :  { %2802 = vmatmul.msk.f32.vlgmr.msra.gmra.mxu1 %vm312_vm9, %v308_v54  ;;  %v270_v56 = vsel %vm262_vm14, %v266_v53, 0.0  ;;  %v421_v7 = vsel %vm125_vm4, 0.0, %v409_v5 }
  0xab   :  { %v286_v57 = vsel %vm278_vm15, %v282_v55, 0.0 }
  0xac   :  { %v290_v58 = vadd.f32 %v286_v57, %v270_v56 }
  0xae   :  { %2799 = vmatmul.msk.f32.gmra.mxu0 %vm312_vm9, %v290_v58  ;;  %v404_v60 = vrot.slane %v290_v58, 1  ;;  %v294_v0 = vrot.slane %v290_v58, 7 }
  0xb0   :  { %v407_v61 = vsel %vm205_vm2, %v403_v28, %v404_v60  ;;  %v297_v1 = vsel %vm134_vm1, %v293_v59, %v294_v0  ;;  %v406_v4 = vsel %vm205_vm2, %v404_v60, %v405_v2  ;;  %v296_v6 = vsel %vm134_vm1, %v294_v0, %v295_v49 }
  0xb1   :  { %v419_v63 = vsel %vm111_vm3, 0.0, %v407_v61  ;;  %v310_v3 = vsel %vm116_vm5, 0.0, %v297_v1 }
  0xb2   :  { %2803 = vmatmul.msk.f32.gmra.mxu1 %vm312_vm9, %v298_v62  ;;  %2808 = vmatmul.msk.f32.gmra.mxu2 %vm312_vm9, %v419_v63 }
  0xb6   :  { %2800 = vmatmul.msk.f32.gmra.mxu0 %vm312_vm9, %v291_v44 }
  0xba   :  { %2804 = vmatmul.msk.f32.gmra.mxu1 %vm312_vm9, %v310_v3  ;;  %2809 = vmatmul.msk.f32.gmra.mxu2 %vm312_vm9, %v406_v4 }
  0xc2   :  { %2805 = vmatmul.msk.f32.gmra.mxu1 %vm312_vm9, %v296_v6  ;;  %2810 = vmatmul.msk.f32.gmra.mxu2 %vm312_vm9, %v421_v7 }
 0x113   :  { %v346_v14 = vpop.f32.mrf.mxu0 }
 0x11b   :  { %v349_v29 = vpop.f32.mrf.mxu0 }
 0x124   :  { %v454_v18 = vpop.f32.mrf.mxu2 }
 0x127   :  { %v390_v15 = vpop.f32.mrf.mxu1 }
 0x128   :  { %v391_v16 = vadd.f32 %v390_v15, %v346_v14 }
 0x12a   :  { %v466_v21 = vadd.f32 %v454_v18, %v391_v16 }
 0x12b   :  { %v352_v45 = vpop.f32.mrf.mxu0 }
 0x12c   :  { %v471_v23 = vmul.f32 %v3330_v19, %v466_v21 }
 0x12e   :  { %v478_v27 = vadd.f32 %v3335_v22, %v471_v23 }
 0x12f   :  { %v393_v28 = vpop.f32.mrf.mxu1 }
 0x130   :  { %vm485_vm7 = vcmp.gt.f32.partialorder %v478_v27, %v3341_v24  ;;  %v489_v31 = vsub.f32 %v478_v27, %v3341_v24  ;;  %vm501_vm8 = vcmp.lt.f32.partialorder %v478_v27, %v3343_v25  ;;  %v505_v34 = vadd.f32 %v3341_v24, %v478_v27 }
 0x131   :  { %v394_v39 = vadd.f32 %v393_v28, %v349_v29 }
 0x132   :  { %v493_v37 = vsel %vm485_vm7, %v489_v31, 0.0  ;;  %v509_v38 = vsel %vm501_vm8, %v505_v34, 0.0 }
 0x133   :  { %v3350_v40 = vadd.f32 %v509_v38, %v493_v37  ;;  %v355_v0 = vpop.f32.mrf.mxu0 }
 0x135   :  { %v457_v41 = vpop.f32.mrf.mxu2  ;;  %2811 = vmatmul.msk.f32.vlgmr.msra.gmra.mxu3 %vm529_vm10, %v3350_v40  ;;  %v612_v62 = vrot.slane %v3350_v40, 1  ;;  %v517_v37 = vrot.slane %v3350_v40, 7 }
 0x136   :  { %v467_v43 = vadd.f32 %v457_v41, %v394_v39 }
 0x137   :  { %v396_v44 = vpop.f32.mrf.mxu1 }
 0x138   :  { %v472_v46 = vmul.f32 %v3330_v19, %v467_v43  ;;  %v397_v50 = vadd.f32 %v396_v44, %v352_v45 }
 0x13a   :  { %v479_v49 = vadd.f32 %v3335_v22, %v472_v46 }
 0x13c   :  { %vm486_vm11 = vcmp.gt.f32.partialorder %v479_v49, %v3341_v24  ;;  %v490_v53 = vsub.f32 %v479_v49, %v3341_v24  ;;  %vm502_vm12 = vcmp.lt.f32.partialorder %v479_v49, %v3343_v25  ;;  %v506_v54 = vadd.f32 %v3341_v24, %v479_v49 }
 0x13d   :  { %v460_v55 = vpop.f32.mrf.mxu2 }
 0x13e   :  { %v468_v56 = vadd.f32 %v460_v55, %v397_v50  ;;  %v494_v57 = vsel %vm486_vm11, %v490_v53, 0.0  ;;  %v510_v58 = vsel %vm502_vm12, %v506_v54, 0.0  ;;  %vm728_vm12 = vcmask 130048  }
 0x13f   :  { %v514_v59 = vadd.f32 %v510_v58, %v494_v57  ;;  %v399_v61 = vpop.f32.mrf.mxu1  ;;  %v3418_v57 = vld [vmem:[%s4420_s6 + $0x10] sm:$0xff]  ;;  %v3424_v58 = vld [vmem:[%s4420_s6 + $0x8] sm:$0xff] }
 0x140   :  { %v473_v60 = vmul.f32 %v3330_v19, %v468_v56  ;;  %v400_v2 = vadd.f32 %v399_v61, %v355_v0  ;;  %v3412_v56 = vld [vmem:[%s4420_s6 + $0x18] sm:$0xff]  ;;  %796 = vmatpush.msrb.mxu3 %v3424_v58  ;;  %v3445_v0 = vld [vmem:[%s4420_s6] sm:$0xff] }
 0x141   :  { %2812 = vmatmul.msk.f32.gmra.mxu3 %vm529_vm10, %v514_v59  ;;  %v613_v63 = vrot.slane %v514_v59, 1  ;;  %v518_v45 = vrot.slane %v514_v59, 7  ;;  %755 = vmatpush.msrb.mxu2 %v3412_v56  ;;  %v3430_v59 = vld [vmem:[%s4420_s6 + $0x28] sm:$0xff] }
 0x142   :  { %v480_v1 = vadd.f32 %v3335_v22, %v473_v60  ;;  %849 = vmatpush.msra.mxu0 %v3430_v59  ;;  %v3436_v60 = vld [vmem:[%s4420_s6 + $0x20] sm:$0xff]  ;;  %797 = vmatpush.msrb.mxu3 %v3445_v0 }
 0x143   :  { %v618_v3 = vsel %vm205_vm2, %v612_v62, %v613_v63  ;;  %v523_v49 = vsel %vm134_vm1, %v517_v37, %v518_v45  ;;  %756 = vmatpush.msrb.mxu2 %v3418_v57 }
 0x144   :  { %2819 = vmatmul.msk.f32.vlgmr.msrb.gmra.mxu1 %vm529_vm10, %v618_v3  ;;  %vm487_vm13 = vcmp.gt.f32.partialorder %v480_v1, %v3341_v24  ;;  %v491_v4 = vsub.f32 %v480_v1, %v3341_v24  ;;  %vm503_vm14 = vcmp.lt.f32.partialorder %v480_v1, %v3343_v25  ;;  %v507_v5 = vadd.f32 %v3341_v24, %v480_v1 }
 0x145   :  { %v463_v6 = vpop.f32.mrf.mxu2  ;;  %850 = vmatpush.msra.mxu0 %v3436_v60 }
 0x146   :  { %v469_v7 = vadd.f32 %v463_v6, %v400_v2  ;;  %v495_v13 = vsel %vm487_vm13, %v491_v4, 0.0  ;;  %v511_v14 = vsel %vm503_vm14, %v507_v5, 0.0  ;;  %v3448_v4 = vstv %s2795_s0  ;;  %v3453_v6 = vld [vmem:[%s4424_s10] ss:$0 sm:$0xff] }
 0x147   :  { %v515_v15 = vadd.f32 %v511_v14, %v495_v13  ;;  %v3459_v14 = vld [vmem:[%s4427_s13] ss:$0 sm:$0xff] }
 0x148   :  { %v474_v16 = vmul.f32 %v3330_v19, %v469_v7 }
 0x149   :  { %2813 = vmatmul.msk.f32.gmra.mxu3 %vm529_vm10, %v515_v15  ;;  %v614_v17 = vrot.slane %v515_v15, 1  ;;  %v519_v50 = vrot.slane %v515_v15, 7 }
 0x14a   :  { %v481_v18 = vadd.f32 %v3335_v22, %v474_v16 }
 0x14b   :  { %v617_v21 = vsel %vm205_vm2, %v613_v63, %v614_v17  ;;  %v522_v53 = vsel %vm134_vm1, %v518_v45, %v519_v50  ;;  %v100_v63 = vld [vmem:[%s4427_s13] sm:$0x1] }
 0x14c   :  { %v621_v23 = vsel %vm111_vm3, 0.0, %v617_v21  ;;  %vm488_vm15 = vcmp.gt.f32.partialorder %v481_v18, %v3341_v24  ;;  %v492_v27 = vsub.f32 %v481_v18, %v3341_v24  ;;  %vm504_vm7 = vcmp.lt.f32.partialorder %v481_v18, %v3343_v25 }
 0x14d   :  { %2820 = vmatmul.msk.f32.gmra.mxu1 %vm529_vm10, %v621_v23  ;;  %v508_v28 = vadd.f32 %v3341_v24, %v481_v18  ;;  %v527_v54 = vsel %vm116_vm5, 0.0, %v522_v53  ;;  %v696_v3 = vsub.f32 0.0, %v100_v63 }
 0x14e   :  { %v496_v29 = vsel %vm488_vm15, %v492_v27, 0.0 }
 0x14f   :  { %v512_v31 = vsel %vm504_vm7, %v508_v28, 0.0  ;;  %v3461_v15 = vperm.slane %v696_v3, 0 }
 0x150   :  { %v516_v34 = vadd.f32 %v512_v31, %v496_v29 }
 0x152   :  { %v520_v38 = vrot.slane %v516_v34, 7  ;;  %2814 = vmatmul.msk.f32.gmra.mxu3 %vm529_vm10, %v516_v34  ;;  %v615_v39 = vrot.slane %v516_v34, 1 }
 0x154   :  { %v524_v41 = vsel %vm134_vm1, %v520_v38, %v517_v37  ;;  %v616_v43 = vsel %vm205_vm2, %v614_v17, %v615_v39  ;;  %v619_v40 = vsel %vm205_vm2, %v615_v39, %v612_v62  ;;  %v521_v55 = vsel %vm134_vm1, %v519_v50, %v520_v38 }
 0x155   :  { %v525_v44 = vsel %vm106_vm0, 0.0, %v524_v41  ;;  %2821 = vmatmul.msk.f32.gmra.mxu1 %vm529_vm10, %v616_v43  ;;  %v623_v46 = vsel %vm125_vm4, 0.0, %v619_v40 }
 0x156   :  { %2815 = vmatmul.msk.f32.vlgmr.msrb.gmra.mxu0 %vm529_vm10, %v525_v44 }
 0x15d   :  { %2822 = vmatmul.msk.f32.gmra.mxu1 %vm529_vm10, %v623_v46 }
 0x15e   :  { %2816 = vmatmul.msk.f32.gmra.mxu0 %vm529_vm10, %v523_v49 }
 0x166   :  { %2817 = vmatmul.msk.f32.gmra.mxu0 %vm529_vm10, %v527_v54 }
 0x16e   :  { %2818 = vmatmul.msk.f32.gmra.mxu0 %vm529_vm10, %v521_v55 }
 0x1b8   :  { %v559_v61 = vpop.f32.mrf.mxu3 }
 0x1c1   :  { %v653_v62 = vpop.f32.mrf.mxu1 }
 0x1c4   :  { %v562_v7 = vpop.f32.mrf.mxu3 }
 0x1ca   :  { %v656_v16 = vpop.f32.mrf.mxu1 }
 0x1cc   :  { %v565_v38 = vpop.f32.mrf.mxu3 }
 0x1d2   :  { %v659_v41 = vpop.f32.mrf.mxu1 }
 0x1d3   :  { %v600_v1 = vpop.f32.mrf.mxu0 }
 0x1d4   :  { %v601_v2 = vadd.f32 %v600_v1, %v559_v61 }
 0x1d5   :  { %v568_v63 = vpop.f32.mrf.mxu3 }
 0x1d6   :  { %v665_v5 = vadd.f32 %v653_v62, %v601_v2 }
 0x1d8   :  { %v670_v13 = vmul.f32 %v3448_v4, %v665_v5 }
 0x1da   :  { %v677_v17 = vadd.f32 %v3453_v6, %v670_v13 }
 0x1db   :  { %v603_v18 = vpop.f32.mrf.mxu0 }
 0x1dc   :  { %v604_v21 = vadd.f32 %v603_v18, %v562_v7  ;;  %vm684_vm8 = vcmp.gt.f32.partialorder %v677_v17, %v3459_v14  ;;  %v688_v23 = vsub.f32 %v677_v17, %v3459_v14  ;;  %vm700_vm11 = vcmp.lt.f32.partialorder %v677_v17, %v3461_v15  ;;  %v662_v7 = vpop.f32.mrf.mxu1 }
 0x1dd   :  { %v704_v27 = vadd.f32 %v3459_v14, %v677_v17 }
 0x1de   :  { %v666_v28 = vadd.f32 %v656_v16, %v604_v21  ;;  %v692_v29 = vsel %vm684_vm8, %v688_v23, 0.0 }
 0x1df   :  { %v708_v31 = vsel %vm700_vm11, %v704_v27, 0.0 }
 0x1e0   :  { %v671_v34 = vmul.f32 %v3448_v4, %v666_v28  ;;  %v3469_v37 = vadd.f32 %v708_v31, %v692_v29 }
 0x1e2   :  { %v678_v39 = vadd.f32 %v3453_v6, %v671_v34  ;;  %2823 = vmatmul.msk.f32.vlgmr.msrb.gmra.mxu2 %vm728_vm12, %v3469_v37  ;;  %v811_v61 = vrot.slane %v3469_v37, 1 }
 0x1e3   :  { %v606_v43 = vpop.f32.mrf.mxu0 }
 0x1e4   :  { %v607_v44 = vadd.f32 %v606_v43, %v565_v38  ;;  %vm685_vm13 = vcmp.gt.f32.partialorder %v678_v39, %v3459_v14  ;;  %v689_v45 = vsub.f32 %v678_v39, %v3459_v14  ;;  %vm701_vm14 = vcmp.lt.f32.partialorder %v678_v39, %v3461_v15 }
 0x1e5   :  { %v705_v40 = vadd.f32 %v3459_v14, %v678_v39 }
 0x1e6   :  { %v667_v46 = vadd.f32 %v659_v41, %v607_v44  ;;  %v693_v49 = vsel %vm685_vm13, %v689_v45, 0.0  ;;  %v716_v44 = vrot.slane %v3469_v37, 7 }
 0x1e7   :  { %v709_v50 = vsel %vm701_vm14, %v705_v40, 0.0 }
 0x1e8   :  { %v672_v53 = vmul.f32 %v3448_v4, %v667_v46  ;;  %v3479_v54 = vadd.f32 %v709_v50, %v693_v49 }
 0x1ea   :  { %v679_v55 = vadd.f32 %v3453_v6, %v672_v53  ;;  %2824 = vmatmul.msk.f32.gmra.mxu2 %vm728_vm12, %v3479_v54  ;;  %v812_v62 = vrot.slane %v3479_v54, 1  ;;  %v717_v53 = vrot.slane %v3479_v54, 7 }
 0x1eb   :  { %v609_v1 = vpop.f32.mrf.mxu0 }
 0x1ec   :  { %v610_v2 = vadd.f32 %v609_v1, %v568_v63  ;;  %v817_v3 = vsel %vm205_vm2, %v811_v61, %v812_v62  ;;  %vm686_vm15 = vcmp.gt.f32.partialorder %v679_v55, %v3459_v14  ;;  %v690_v5 = vsub.f32 %v679_v55, %v3459_v14 }
 0x1ed   :  { %2831 = vmatmul.msk.f32.vlgmr.msra.gmra.mxu0 %vm728_vm12, %v817_v3  ;;  %vm702_vm7 = vcmp.lt.f32.partialorder %v679_v55, %v3461_v15  ;;  %v706_v13 = vadd.f32 %v3459_v14, %v679_v55 }
 0x1ee   :  { %v668_v16 = vadd.f32 %v662_v7, %v610_v2  ;;  %v694_v17 = vsel %vm686_vm15, %v690_v5, 0.0  ;;  %v3545_v5 = vld [vmem:[%s4419_s5] sm:$0xff]  ;;  %v3550_v7 = vld [vmem:[%s4419_s5 + $0x10] sm:$0xff] }
 0x1ef   :  { %v710_v18 = vsel %vm702_vm7, %v706_v13, 0.0  ;;  %v3555_v13 = vld [vmem:[%s4419_s5 + $0x8] sm:$0xff]  ;;  %948 = vmatpush.msra.mxu2 %v3545_v5  ;;  %1001 = vmatpush.msra.mxu3 %v3550_v7 }
 0x1f0   :  { %v673_v21 = vmul.f32 %v3448_v4, %v668_v16  ;;  %v3494_v23 = vadd.f32 %v710_v18, %v694_v17  ;;  %907 = vmatpush.msra.mxu1 %v3555_v13 }
 0x1f2   :  { %v680_v27 = vadd.f32 %v3453_v6, %v673_v21  ;;  %2825 = vmatmul.msk.f32.gmra.mxu2 %vm728_vm12, %v3494_v23  ;;  %v813_v28 = vrot.slane %v3494_v23, 1  ;;  %v718_v1 = vrot.slane %v3494_v23, 7 }
 0x1f4   :  { %v816_v29 = vsel %vm205_vm2, %v812_v62, %v813_v28  ;;  %vm687_vm8 = vcmp.gt.f32.partialorder %v680_v27, %v3459_v14  ;;  %v691_v31 = vsub.f32 %v680_v27, %v3459_v14  ;;  %vm703_vm11 = vcmp.lt.f32.partialorder %v680_v27, %v3461_v15 }
 0x1f5   :  { %v820_v34 = vsel %vm111_vm3, 0.0, %v816_v29  ;;  %v707_v38 = vadd.f32 %v3459_v14, %v680_v27  ;;  %v722_v62 = vsel %vm134_vm1, %v716_v44, %v717_v53  ;;  %v721_v2 = vsel %vm134_vm1, %v717_v53, %v718_v1 }
 0x1f6   :  { %2832 = vmatmul.msk.f32.gmra.mxu0 %vm728_vm12, %v820_v34  ;;  %v695_v39 = vsel %vm687_vm8, %v691_v31, 0.0  ;;  %v726_v3 = vsel %vm116_vm5, 0.0, %v721_v2 }
 0x1f7   :  { %v711_v41 = vsel %vm703_vm11, %v707_v38, 0.0 }
 0x1f8   :  { %v3509_v43 = vadd.f32 %v711_v41, %v695_v39 }
 0x1fa   :  { %2826 = vmatmul.msk.f32.gmra.mxu2 %vm728_vm12, %v3509_v43  ;;  %v719_v45 = vrot.slane %v3509_v43, 7  ;;  %v814_v40 = vrot.slane %v3509_v43, 1 }
 0x1fc   :  { %v723_v46 = vsel %vm134_vm1, %v719_v45, %v716_v44  ;;  %v815_v49 = vsel %vm205_vm2, %v813_v28, %v814_v40  ;;  %v818_v55 = vsel %vm205_vm2, %v814_v40, %v811_v61  ;;  %v720_v61 = vsel %vm134_vm1, %v718_v1, %v719_v45 }
 0x1fd   :  { %v724_v50 = vsel %vm106_vm0, 0.0, %v723_v46  ;;  %v822_v63 = vsel %vm125_vm4, 0.0, %v818_v55 }
 0x1fe   :  { %2827 = vmatmul.msk.f32.vlgmr.msrb.gmra.mxu3 %vm728_vm12, %v724_v50  ;;  %2833 = vmatmul.msk.f32.gmra.mxu0 %vm728_vm12, %v815_v49 }
 0x1ff   :  { %2862 = vmatpush.msk.msrb.mxu3 %vm325_vm6, %v3182_v30 }
 0x206   :  { %2828 = vmatmul.msk.f32.gmra.mxu3 %vm728_vm12, %v722_v62  ;;  %2834 = vmatmul.msk.f32.gmra.mxu0 %vm728_vm12, %v822_v63 }
 0x20e   :  { %2829 = vmatmul.msk.f32.gmra.mxu3 %vm728_vm12, %v726_v3 }
 0x216   :  { %2830 = vmatmul.msk.f32.gmra.mxu3 %vm728_vm12, %v720_v61 }
 0x265   :  { %v758_v16 = vpop.f32.mrf.mxu2 }
 0x26a   :  { %v852_v17 = vpop.f32.mrf.mxu0 }
 0x26d   :  { %v761_v28 = vpop.f32.mrf.mxu2 }
 0x273   :  { %v855_v29 = vpop.f32.mrf.mxu0 }
 0x275   :  { %v764_v41 = vpop.f32.mrf.mxu2 }
 0x27b   :  { %v858_v45 = vpop.f32.mrf.mxu0 }
 0x27d   :  { %v767_v55 = vpop.f32.mrf.mxu2 }
 0x281   :  { %v799_v18 = vpop.f32.mrf.mxu3 }
 0x282   :  { %v800_v21 = vadd.f32 %v799_v18, %v758_v16 }
 0x283   :  { %v861_v2 = vpop.f32.mrf.mxu0 }
 0x284   :  { %v3562_v27 = vadd.f32 %v852_v17, %v800_v21 }
 0x286   :  { %2835 = vmatmul.msk.f32.vlgmr.msra.gmra.mxu1 %vm529_vm10, %v3562_v27  ;;  %v962_v30 = vrot.slane %v3562_v27, 1  ;;  %v868_v3 = vrot.slane %v3562_v27, 7 }
 0x289   :  { %v802_v31 = vpop.f32.mrf.mxu3 }
 0x28a   :  { %v803_v34 = vadd.f32 %v802_v31, %v761_v28 }
 0x28c   :  { %v3566_v38 = vadd.f32 %v855_v29, %v803_v34 }
 0x28e   :  { %2836 = vmatmul.msk.f32.gmra.mxu1 %vm529_vm10, %v3566_v38  ;;  %v963_v39 = vrot.slane %v3566_v38, 1  ;;  %v869_v28 = vrot.slane %v3566_v38, 7 }
 0x290   :  { %v968_v44 = vsel %vm205_vm2, %v962_v30, %v963_v39  ;;  %v874_v31 = vsel %vm134_vm1, %v868_v3, %v869_v28 }
 0x291   :  { %v805_v40 = vpop.f32.mrf.mxu3  ;;  %2843 = vmatmul.msk.f32.vlgmr.msra.gmra.mxu3 %vm529_vm10, %v968_v44 }
 0x292   :  { %v806_v46 = vadd.f32 %v805_v40, %v764_v41  ;;  %1606 = vmatpush.msra.mxu3 %v3318_v9  ;;  %v3630_v40 = vld [vmem:[%s4418_s4 + $0x4] sm:$0xf] }
 0x293   :  { %2847 = vmatpush.msk.msrb.mxu0 %vm325_vm6, %v3630_v40 }
 0x294   :  { %v3576_v49 = vadd.f32 %v858_v45, %v806_v46  ;;  %v3622_v45 = vld [vmem:[%s4418_s4 + $0x8] sm:$0xf]  ;;  %v3635_v46 = vld [vmem:[%s4418_s4] sm:$0xf] }
 0x295   :  { %2857 = vmatpush.msk.msrb.mxu2 %vm325_vm6, %v3622_v45  ;;  %2852 = vmatpush.msk.msrb.mxu1 %vm325_vm6, %v3635_v46 }
 0x296   :  { %2837 = vmatmul.msk.f32.gmra.mxu1 %vm529_vm10, %v3576_v49  ;;  %v964_v50 = vrot.slane %v3576_v49, 1  ;;  %2867 = vmatpush.msk.msra.mxu0 %vm325_vm6, %v3217_v42 }
 0x297   :  { %2872 = vmatpush.msk.msra.mxu1 %vm325_vm6, %v3189_v32 }
 0x298   :  { %v967_v53 = vsel %vm205_vm2, %v963_v39, %v964_v50  ;;  %v870_v39 = vrot.slane %v3576_v49, 7 }
 0x299   :  { %v808_v62 = vpop.f32.mrf.mxu3  ;;  %v971_v63 = vsel %vm111_vm3, 0.0, %v967_v53 }
 0x29a   :  { %v809_v1 = vadd.f32 %v808_v62, %v767_v55  ;;  %2844 = vmatmul.msk.f32.gmra.mxu3 %vm529_vm10, %v971_v63  ;;  %v873_v41 = vsel %vm134_vm1, %v869_v28, %v870_v39 }
 0x29b   :  { %v878_v44 = vsel %vm116_vm5, 0.0, %v873_v41 }
 0x29c   :  { %v3586_v9 = vadd.f32 %v861_v2, %v809_v1 }
 0x29e   :  { %2838 = vmatmul.msk.f32.gmra.mxu1 %vm529_vm10, %v3586_v9  ;;  %v871_v61 = vrot.slane %v3586_v9, 7  ;;  %v965_v16 = vrot.slane %v3586_v9, 1 }
 0x2a0   :  { %v875_v17 = vsel %vm134_vm1, %v871_v61, %v868_v3  ;;  %v966_v18 = vsel %vm205_vm2, %v964_v50, %v965_v16  ;;  %v969_v29 = vsel %vm205_vm2, %v965_v16, %v962_v30  ;;  %v872_v30 = vsel %vm134_vm1, %v870_v39, %v871_v61 }
 0x2a1   :  { %v876_v21 = vsel %vm106_vm0, 0.0, %v875_v17  ;;  %v973_v34 = vsel %vm125_vm4, 0.0, %v969_v29 }
 0x2a2   :  { %2839 = vmatmul.msk.f32.vlgmr.msra.gmra.mxu2 %vm529_vm10, %v876_v21  ;;  %2845 = vmatmul.msk.f32.gmra.mxu3 %vm529_vm10, %v966_v18 }
 0x2a3   :  { %1565 = vmatpush.msra.mxu2 %v3312_v8 }
 0x2aa   :  { %2840 = vmatmul.msk.f32.gmra.mxu2 %vm529_vm10, %v874_v31  ;;  %2846 = vmatmul.msk.f32.gmra.mxu3 %vm529_vm10, %v973_v34 }
 0x2b2   :  { %2841 = vmatmul.msk.f32.gmra.mxu2 %vm529_vm10, %v878_v44 }
 0x2ba   :  { %2842 = vmatmul.msk.f32.gmra.mxu2 %vm529_vm10, %v872_v30 }
 0x303   :  { %v909_v8 = vpop.f32.mrf.mxu1 }
 0x30b   :  { %v912_v63 = vpop.f32.mrf.mxu1 }
 0x313   :  { %v915_v16 = vpop.f32.mrf.mxu1 }
 0x314   :  { %v1003_v50 = vpop.f32.mrf.mxu3 }
 0x31b   :  { %v918_v34 = vpop.f32.mrf.mxu1 }
 0x31d   :  { %v1006_v1 = vpop.f32.mrf.mxu3 }
 0x325   :  { %v950_v53 = vpop.f32.mrf.mxu2  ;;  %v1009_v18 = vpop.f32.mrf.mxu3 }
 0x326   :  { %v951_v55 = vadd.f32 %v950_v53, %v909_v8 }
 0x328   :  { %v3645_v62 = vadd.f32 %v1003_v50, %v951_v55 }
 0x32a   :  { %2848 = vmatmul.msk.f32.vlgmr.msrb.gmra.mxu0 %vm312_vm9, %v3645_v62  ;;  %v1119_v32 = vrot.slane %v3645_v62, 1 }
 0x32b   :  { %1659 = vmatpush.msrb.mxu0 %v3323_v11 }
 0x32d   :  { %v953_v2 = vpop.f32.mrf.mxu2 }
 0x32e   :  { %v954_v3 = vadd.f32 %v953_v2, %v912_v63 }
 0x330   :  { %v3650_v61 = vadd.f32 %v1006_v1, %v954_v3 }
 0x332   :  { %2849 = vmatmul.msk.f32.gmra.mxu0 %vm312_vm9, %v3650_v61  ;;  %v1120_v42 = vrot.slane %v3650_v61, 1  ;;  %v1020_v1 = vrot.slane %v3650_v61, 7 }
 0x334   :  { %v1125_v17 = vsel %vm205_vm2, %v1119_v32, %v1120_v42 }
 0x335   :  { %v956_v21 = vpop.f32.mrf.mxu2  ;;  %2858 = vmatmul.msk.f32.vlgmr.msrb.gmra.mxu2 %vm312_vm9, %v1125_v17 }
 0x336   :  { %v957_v11 = vadd.f32 %v956_v21, %v915_v16  ;;  %1796 = vmatpush.msrb.mxu2 %v3424_v58  ;;  %v1012_v58 = vpop.f32.mrf.mxu3 }
 0x338   :  { %v3660_v28 = vadd.f32 %v1009_v18, %v957_v11  ;;  %1797 = vmatpush.msrb.mxu2 %v3445_v0  ;;  %v1019_v0 = vrot.slane %v3645_v62, 7 }
 0x33a   :  { %2850 = vmatmul.msk.f32.gmra.mxu0 %vm312_vm9, %v3660_v28  ;;  %v1121_v29 = vrot.slane %v3660_v28, 1  ;;  %v1025_v3 = vsel %vm134_vm1, %v1019_v0, %v1020_v1  ;;  %v1021_v16 = vrot.slane %v3660_v28, 7 }
 0x33c   :  { %v1124_v31 = vsel %vm205_vm2, %v1120_v42, %v1121_v29 }
 0x33d   :  { %v959_v39 = vpop.f32.mrf.mxu2  ;;  %v1128_v41 = vsel %vm111_vm3, 0.0, %v1124_v31 }
 0x33e   :  { %v960_v44 = vadd.f32 %v959_v39, %v918_v34  ;;  %2859 = vmatmul.msk.f32.gmra.mxu2 %vm312_vm9, %v1128_v41  ;;  %v3709_v34 = vld [vmem:[%s4433_s27] sm:$0xff] }
 0x340   :  { %v3671_v30 = vadd.f32 %v1012_v58, %v960_v44 }
 0x342   :  { %2851 = vmatmul.msk.f32.gmra.mxu0 %vm312_vm9, %v3671_v30  ;;  %v1022_v8 = vrot.slane %v3671_v30, 7  ;;  %v1122_v50 = vrot.slane %v3671_v30, 1 }
 0x344   :  { %v1026_v53 = vsel %vm134_vm1, %v1022_v8, %v1019_v0  ;;  %v1123_v55 = vsel %vm205_vm2, %v1121_v29, %v1122_v50  ;;  %v1126_v2 = vsel %vm205_vm2, %v1122_v50, %v1119_v32  ;;  %v1023_v32 = vsel %vm134_vm1, %v1021_v16, %v1022_v8  ;;  %v3715_v8 = vld [vmem:[%s4433_s27 + $0x8] sm:$0xff] }
 0x345   :  { %v1027_v63 = vsel %vm106_vm0, 0.0, %v1026_v53  ;;  %v1130_v42 = vsel %vm125_vm4, 0.0, %v1126_v2 }
 0x346   :  { %2853 = vmatmul.msk.f32.vlgmr.msrb.gmra.mxu1 %vm312_vm9, %v1027_v63  ;;  %2860 = vmatmul.msk.f32.gmra.mxu2 %vm312_vm9, %v1123_v55 }
 0x347   :  { %1755 = vmatpush.msrb.mxu1 %v3412_v56  ;;  %v1024_v56 = vsel %vm134_vm1, %v1020_v1, %v1021_v16 }
 0x349   :  { %1756 = vmatpush.msrb.mxu1 %v3418_v57  ;;  %v1029_v57 = vsel %vm116_vm5, 0.0, %v1024_v56 }
 0x34e   :  { %2854 = vmatmul.msk.f32.gmra.mxu1 %vm312_vm9, %v1025_v3  ;;  %2861 = vmatmul.msk.f32.gmra.mxu2 %vm312_vm9, %v1130_v42 }
 0x356   :  { %2855 = vmatmul.msk.f32.gmra.mxu1 %vm312_vm9, %v1029_v57 }
 0x35e   :  { %2856 = vmatmul.msk.f32.gmra.mxu1 %vm312_vm9, %v1023_v32 }
 0x3a7   :  { %v1063_v17 = vpop.f32.mrf.mxu0 }
 0x3af   :  { %v1066_v31 = vpop.f32.mrf.mxu0 }
 0x3b7   :  { %v1069_v53 = vpop.f32.mrf.mxu0 }
 0x3b8   :  { %v1163_v18 = vpop.f32.mrf.mxu2 }
 0x3bf   :  { %v1072_v56 = vpop.f32.mrf.mxu0 }
 0x3c1   :  { %v1166_v41 = vpop.f32.mrf.mxu2 }
 0x3c3   :  { %v1107_v21 = vpop.f32.mrf.mxu1 }
 0x3c4   :  { %v1108_v11 = vadd.f32 %v1107_v21, %v1063_v17  ;;  %v3723_v21 = vld [vmem:[%s4433_s27 + $0x10] sm:$0xff] }
 0x3c6   :  { %v1175_v29 = vadd.f32 %v1163_v18, %v1108_v11 }
 0x3c8   :  { %v1179_v39 = vsub.f32 %v1175_v29, %v3709_v34  ;;  %v3729_v29 = vld [vmem:[%s4433_s27 + $0x18] sm:$0xff] }
 0x3c9   :  { %v1169_v1 = vpop.f32.mrf.mxu2 }
 0x3ca   :  { %1221 = vperm.xlu1 %2960, %v1179_v39   ;;  %v1247_v55 = vrot.slane %v1179_v39, 1 }
 0x3cb   :  { %v1110_v44 = vpop.f32.mrf.mxu1 }
 0x3cc   :  { %v1111_v58 = vadd.f32 %v1110_v44, %v1066_v31 }
 0x3ce   :  { %v1176_v0 = vadd.f32 %v1166_v41, %v1111_v58 }
 0x3d0   :  { %v1180_v50 = vsub.f32 %v1176_v0, %v3715_v8  ;;  %v1183_v0 = vrot.slane %v1179_v39, 7 }
 0x3d1   :  { %v1172_v17 = vpop.f32.mrf.mxu2 }
 0x3d2   :  { %v1248_v63 = vrot.slane %v1180_v50, 1 }
 0x3d3   :  { %v1113_v2 = vpop.f32.mrf.mxu1 }
 0x3d4   :  { %v1253_v3 = vsel %vm205_vm2, %v1247_v55, %v1248_v63  ;;  %v1114_v42 = vadd.f32 %v1113_v2, %v1069_v53 }
 0x3d5   :  { %1261 = vperm.xlu1 %2960, %v1253_v3  }
 0x3d6   :  { %v1177_v16 = vadd.f32 %v1169_v1, %v1114_v42 }
 0x3d8   :  { %v1181_v11 = vsub.f32 %v1177_v16, %v3723_v21  ;;  %v1184_v16 = vrot.slane %v1180_v50, 7 }
 0x3da   :  { %v1185_v41 = vrot.slane %v1181_v11, 7  ;;  %v1189_v39 = vsel %vm134_vm1, %v1183_v0, %v1184_v16 }
 0x3db   :  { %v1116_v57 = vpop.f32.mrf.mxu1 }
 0x3dc   :  { %v1117_v32 = vadd.f32 %v1116_v57, %v1072_v56  ;;  %v1249_v56 = vrot.slane %v1181_v11, 1 }
 0x3dd   :  { %1226 = vperm.xlu1 %2960, %v1180_v50  }
 0x3de   :  { %v1178_v18 = vadd.f32 %v1172_v17, %v1117_v32  ;;  %v1252_v57 = vsel %vm205_vm2, %v1248_v63, %v1249_v56 }
 0x3df   :  { %v1256_v32 = vsel %vm111_vm3, 0.0, %v1252_v57  ;;  %v3775_v57 = vld [vmem:[%s4415_s1 + $0x2] ss:$0 sm:$0xff] }
 0x3e0   :  { %v1182_v31 = vsub.f32 %v1178_v18, %v3729_v29 }
 0x3e2   :  { %1236 = vperm.xlu0 %2959, %v1182_v31   ;;  %v1186_v44 = vrot.slane %v1182_v31, 7  ;;  %v1250_v53 = vrot.slane %v1182_v31, 1 }
 0x3e4   :  { %v1187_v58 = vsel %vm134_vm1, %v1185_v41, %v1186_v44  ;;  %v1190_v1 = vsel %vm134_vm1, %v1186_v44, %v1183_v0  ;;  %v1254_v3 = vsel %vm205_vm2, %v1250_v53, %v1247_v55  ;;  %v1188_v55 = vsel %vm134_vm1, %v1184_v16, %v1185_v41 }
 0x3e5   :  { %1231 = vperm.xlu1 %2960, %v1181_v11   ;;  %1212 = vperm.xlu2 %2961, %v1187_v58   ;;  %v1191_v2 = vsel %vm106_vm0, 0.0, %v1190_v1  ;;  %v1258_v42 = vsel %vm125_vm4, 0.0, %v1254_v3  ;;  %v1193_v17 = vsel %vm116_vm5, 0.0, %v1188_v55  ;;  %v1251_v50 = vsel %vm205_vm2, %v1249_v56, %v1250_v53  ;;  %v3761_v53 = vld [vmem:[%s4415_s1 + $0x1] ss:$0 sm:$0xff] }
 0x3ea   :  { %1197 = vperm.xlu0 %2959, %v1191_v2  }
 0x3ed   :  { %1276 = vperm.xlu2 %2961, %v1258_v42  }
 0x3f2   :  { %1202 = vperm.xlu0 %2959, %v1189_v39  }
 0x3f5   :  { %1266 = vperm.xlu2 %2961, %v1256_v32  }
 0x3fa   :  { %1207 = vperm.xlu0 %2959, %v1193_v17  }
 0x3fd   :  { %1271 = vperm.xlu2 %2961, %v1251_v50  }
 0x43c   :  { %v1222_v11 = vpop.permute.xlu1 %1221 }
 0x43d   :  { %v1239_v16 = vmul.f32 %v3761_v53, %v1222_v11 }
 0x43f   :  { %v1213_v18 = vpop.permute.xlu2 %1212 }
 0x440   :  { %v1218_v44 = vmul.f32 %v3206_v36, %v1213_v18 }
 0x447   :  { %v1277_v31 = vpop.permute.xlu2 %1276  ;;  %v1262_v0 = vpop.permute.xlu1 %1261 }
 0x448   :  { %v1282_v1 = vmul.f32 %v3201_v35, %v1277_v31  ;;  %v1279_v32 = vmul.f32 %v3775_v57, %v1262_v0 }
 0x44f   :  { %v1227_v55 = vpop.permute.xlu1 %1226  ;;  %v1267_v18 = vpop.permute.xlu2 %1266 }
 0x454   :  { %v1237_v63 = vpop.permute.xlu0 %1236 }
 0x455   :  { %v1242_v58 = vmul.f32 %v3194_v33, %v1237_v63  ;;  %v3768_v33 = vld [vmem:[%s4415_s1] ss:$0 sm:$0xff]  ;;  %v1240_v63 = vmul.f32 %v3761_v53, %v1227_v55 }
 0x457   :  { %v1246_v41 = vadd.f32 %v1242_v58, %v1218_v44  ;;  %v1272_v55 = vpop.permute.xlu2 %1271 }
 0x459   :  { %v1286_v2 = vadd.f32 %v1282_v1, %v1246_v41  ;;  %v1280_v41 = vmul.f32 %v3775_v57, %v1267_v18 }
 0x45b   :  { %v1290_v3 = vmul.f32 %v1286_v2, %v3221_v47 }
 0x45c   :  { %v1198_v42 = vpop.permute.xlu0 %1197 }
 0x45d   :  { %v1294_v56 = vsub.f32 %v3671_v30, %v1290_v3  ;;  %v1215_v35 = vmul.f32 %v3768_v33, %v1198_v42 }
 0x45f   :  { %v1298_v36 = vadd.f32 %v3226_v48, %v1294_v56  ;;  %v1243_v39 = vadd.f32 %v1239_v16, %v1215_v35  ;;  %v1232_v56 = vpop.permute.xlu1 %1231  ;;  %v3796_v35 = vld [vmem:[%s4425_s11] ss:$0 sm:$0xff] }
 0x461   :  { %v1306_v17 = vsub.f32 %v1298_v36, %v3232_v51  ;;  %v1318_v50 = vadd.f32 %v3232_v51, %v1298_v36  ;;  %vm1302_vm13 = vcmp.gt.f32.partialorder %v1298_v36, %v3232_v51  ;;  %vm1314_vm14 = vcmp.lt.f32.partialorder %v1298_v36, %v3234_v52  ;;  %v3790_v51 = vld [vmem:[%s4422_s8] ss:$0 sm:$0xff]  ;;  %s2784_s8 = sshll.u32 %s4430_s16, 4  ;;  %s2785_s8 = int_to_ptr.hbm [resolvable:$true] %s2784_s8 }
 0x462   :  { %v1283_v11 = vadd.f32 %v1279_v32, %v1243_v39 }
 0x463   :  { %v1310_v58 = vsel %vm1302_vm13, %v1306_v17, 0.0  ;;  %v1322_v0 = vsel %vm1314_vm14, %v1318_v50, 0.0 }
 0x464   :  { %v1287_v48 = vmul.f32 %v1283_v11, %v3221_v47  ;;  %v1203_v31 = vpop.permute.xlu0 %1202  ;;  %v1326_v42 = vadd.f32 %v1322_v0, %v1310_v58  ;;  %v1281_v58 = vmul.f32 %v3775_v57, %v1272_v55 }
 0x465   :  { %v1216_v44 = vmul.f32 %v3768_v33, %v1203_v31 }
 0x466   :  { %v1291_v1 = vsub.f32 %v3645_v62, %v1287_v48  ;;  %v3804_v11 = vsub.f32 %v3671_v30, %v1326_v42  ;;  %v1241_v48 = vmul.f32 %v3761_v53, %v1232_v56 }
 0x467   :  { %v1244_v2 = vadd.f32 %v1240_v63, %v1216_v44 }
 0x468   :  { %v1295_v3 = vadd.f32 %v3790_v51, %v1291_v1 }
 0x469   :  { %v1284_v16 = vadd.f32 %v1280_v41, %v1244_v2  ;;  %v1334_v2 = vrot.slane %v3804_v11, 7 }
 0x46a   :  { %vm1299_vm15 = vcmp.gt.f32.partialorder %v1295_v3, %v3796_v35  ;;  %v1303_v36 = vsub.f32 %v1295_v3, %v3796_v35  ;;  %vm1311_vm7 = vcmp.lt.f32.partialorder %v1295_v3, %v3234_v52  ;;  %v1315_v39 = vadd.f32 %v3796_v35, %v1295_v3 }
 0x46b   :  { %v1288_v32 = vmul.f32 %v1284_v16, %v3221_v47 }
 0x46c   :  { %v1208_v17 = vpop.permute.xlu0 %1207  ;;  %v1307_v50 = vsel %vm1299_vm15, %v1303_v36, 0.0  ;;  %v1319_v18 = vsel %vm1311_vm7, %v1315_v39, 0.0 }
 0x46d   :  { %v1292_v31 = vsub.f32 %v3650_v61, %v1288_v32  ;;  %v1217_v63 = vmul.f32 %v3768_v33, %v1208_v17  ;;  %v1323_v44 = vadd.f32 %v1319_v18, %v1307_v50 }
 0x46f   :  { %v1296_v0 = vadd.f32 %v3790_v51, %v1292_v31  ;;  %v1245_v1 = vadd.f32 %v1241_v48, %v1217_v63  ;;  %v1327_v41 = vsub.f32 %v3645_v62, %v1323_v44 }
 0x471   :  { %v1285_v3 = vadd.f32 %v1281_v58, %v1245_v1  ;;  %2863 = vmatmul.msk.f32.vlgmr.msrb.gmra.mxu3 %vm312_vm9, %v1327_v41  ;;  %v1331_v30 = vrot.slane %v1327_v41, 7  ;;  %vm1300_vm8 = vcmp.gt.f32.partialorder %v1296_v0, %v3796_v35  ;;  %v1304_v42 = vsub.f32 %v1296_v0, %v3796_v35 }
 0x472   :  { %vm1312_vm11 = vcmp.lt.f32.partialorder %v1296_v0, %v3234_v52  ;;  %v1316_v16 = vadd.f32 %v3796_v35, %v1296_v0  ;;  %1849 = vmatpush.msrb.mxu3 %v3430_v59  ;;  %v1425_v18 = vrot.slane %v1327_v41, 1 }
 0x473   :  { %v1289_v56 = vmul.f32 %v1285_v3, %v3221_v47  ;;  %v1338_v62 = vsel %vm134_vm1, %v1334_v2, %v1331_v30  ;;  %v1308_v36 = vsel %vm1300_vm8, %v1304_v42, 0.0 }
 0x474   :  { %v1339_v39 = vsel %vm106_vm0, 0.0, %v1338_v62  ;;  %v1320_v32 = vsel %vm1312_vm11, %v1316_v16, 0.0  ;;  %1850 = vmatpush.msrb.mxu3 %v3436_v60 }
 0x475   :  { %v1293_v55 = vsub.f32 %v3660_v28, %v1289_v56  ;;  %2868 = vmatmul.msk.f32.vlgmr.msra.gmra.mxu0 %vm312_vm9, %v1339_v39  ;;  %v1324_v17 = vadd.f32 %v1320_v32, %v1308_v36 }
 0x476   :  { %1907 = vmatpush.msra.mxu0 %v3555_v13 }
 0x477   :  { %v1297_v59 = vadd.f32 %v3790_v51, %v1293_v55  ;;  %v1328_v50 = vsub.f32 %v3650_v61, %v1324_v17 }
 0x479   :  { %2864 = vmatmul.msk.f32.gmra.mxu3 %vm312_vm9, %v1328_v50  ;;  %v1426_v48 = vrot.slane %v1328_v50, 1  ;;  %v1332_v31 = vrot.slane %v1328_v50, 7  ;;  %vm1301_vm13 = vcmp.gt.f32.partialorder %v1297_v59, %v3796_v35  ;;  %v1305_v60 = vsub.f32 %v1297_v59, %v3796_v35 }
 0x47a   :  { %vm1313_vm14 = vcmp.lt.f32.partialorder %v1297_v59, %v3234_v52  ;;  %v1317_v63 = vadd.f32 %v3796_v35, %v1297_v59 }
 0x47b   :  { %v1431_v13 = vsel %vm205_vm2, %v1425_v18, %v1426_v48  ;;  %v1337_v44 = vsel %vm134_vm1, %v1331_v30, %v1332_v31  ;;  %v1309_v61 = vsel %vm1301_vm13, %v1305_v60, 0.0 }
 0x47c   :  { %2873 = vmatmul.msk.f32.vlgmr.msra.gmra.mxu1 %vm312_vm9, %v1431_v13  ;;  %v1321_v58 = vsel %vm1313_vm14, %v1317_v63, 0.0 }
 0x47d   :  { %2869 = vmatmul.msk.f32.gmra.mxu0 %vm312_vm9, %v1337_v44  ;;  %v1325_v0 = vadd.f32 %v1321_v58, %v1309_v61  ;;  %1948 = vmatpush.msra.mxu1 %v3545_v5  ;;  %v1428_v5 = vrot.slane %v3804_v11, 1 }
 0x47f   :  { %v1329_v1 = vsub.f32 %v3660_v28, %v1325_v0  ;;  %v1432_v36 = vsel %vm205_vm2, %v1428_v5, %v1425_v18 }
 0x480   :  { %v1436_v39 = vsel %vm125_vm4, 0.0, %v1432_v36 }
 0x481   :  { %2865 = vmatmul.msk.f32.gmra.mxu3 %vm312_vm9, %v1329_v1  ;;  %v1333_v41 = vrot.slane %v1329_v1, 7  ;;  %v1427_v3 = vrot.slane %v1329_v1, 1 }
 0x483   :  { %v1336_v42 = vsel %vm134_vm1, %v1332_v31, %v1333_v41  ;;  %v1430_v30 = vsel %vm205_vm2, %v1426_v48, %v1427_v3  ;;  %v1335_v28 = vsel %vm134_vm1, %v1333_v41, %v1334_v2  ;;  %v1429_v62 = vsel %vm205_vm2, %v1427_v3, %v1428_v5 }
 0x484   :  { %v1341_v16 = vsel %vm116_vm5, 0.0, %v1336_v42  ;;  %v1434_v56 = vsel %vm111_vm3, 0.0, %v1430_v30 }
 0x485   :  { %2870 = vmatmul.msk.f32.gmra.mxu0 %vm312_vm9, %v1341_v16  ;;  %2874 = vmatmul.msk.f32.gmra.mxu1 %vm312_vm9, %v1434_v56  ;;  %v3883_v16 = vld [vmem:[%s4423_s9] ss:$0 sm:$0xff] }
 0x489   :  { %2866 = vmatmul.msk.f32.gmra.mxu3 %vm312_vm9, %v3804_v11 }
 0x48d   :  { %2871 = vmatmul.msk.f32.gmra.mxu0 %vm312_vm9, %v1335_v28  ;;  %2875 = vmatmul.msk.f32.gmra.mxu1 %vm312_vm9, %v1429_v62 }
 0x495   :  { %2876 = vmatmul.msk.f32.gmra.mxu1 %vm312_vm9, %v1436_v39 }
 0x4f2   :  { %v1413_v32 = vpop.f32.mrf.mxu0 }
 0x4f4   :  { %v1372_v11 = vpop.f32.mrf.mxu3 }
 0x4f5   :  { %v1414_v55 = vadd.f32 %v1413_v32, %v1372_v11 }
 0x4f9   :  { %v1466_v17 = vpop.f32.mrf.mxu1 }
 0x4fa   :  { %v1478_v2 = vadd.f32 %v1466_v17, %v1414_v55  ;;  %v1416_v50 = vpop.f32.mrf.mxu0 }
 0x4fc   :  { %v1482_v59 = vmul.f32 %v1478_v2, %v3330_v19  ;;  %v1375_v48 = vpop.f32.mrf.mxu3 }
 0x4fd   :  { %v1417_v63 = vadd.f32 %v1416_v50, %v1375_v48 }
 0x4fe   :  { %v1486_v31 = vsub.f32 %v3562_v27, %v1482_v59 }
 0x500   :  { %v1490_v60 = vadd.f32 %v3335_v22, %v1486_v31 }
 0x502   :  { %vm1494_vm15 = vcmp.gt.f32.partialorder %v1490_v60, %v3341_v24  ;;  %v1498_v18 = vsub.f32 %v1490_v60, %v3341_v24  ;;  %vm1506_vm7 = vcmp.lt.f32.partialorder %v1490_v60, %v3343_v25  ;;  %v1510_v13 = vadd.f32 %v3341_v24, %v1490_v60  ;;  %v1469_v44 = vpop.f32.mrf.mxu1  ;;  %v1419_v42 = vpop.f32.mrf.mxu0 }
 0x503   :  { %v1479_v61 = vadd.f32 %v1469_v44, %v1417_v63 }
 0x504   :  { %v1378_v58 = vpop.f32.mrf.mxu3  ;;  %v1502_v0 = vsel %vm1494_vm15, %v1498_v18, 0.0  ;;  %v1514_v1 = vsel %vm1506_vm7, %v1510_v13, 0.0 }
 0x505   :  { %v1483_v41 = vmul.f32 %v1479_v61, %v3330_v19  ;;  %v1518_v3 = vadd.f32 %v1514_v1, %v1502_v0  ;;  %v1420_v56 = vadd.f32 %v1419_v42, %v1378_v58 }
 0x507   :  { %v1487_v22 = vsub.f32 %v3566_v38, %v1483_v41  ;;  %v3878_v30 = vsub.f32 %v3562_v27, %v1518_v3  ;;  %v3892_v27 = vld [vmem:[%s4426_s12] ss:$0 sm:$0xff] }
 0x509   :  { %v1491_v24 = vadd.f32 %v3883_v16, %v1487_v22  ;;  %2877 = vmatmul.msk.f32.vlgmr.msra.gmra.mxu2 %vm529_vm10, %v3878_v30  ;;  %v1620_v60 = vrot.slane %v3878_v30, 1 }
 0x50a   :  { %v1472_v5 = vpop.f32.mrf.mxu1  ;;  %2001 = vmatpush.msra.mxu2 %v3550_v7  ;;  %v1422_v2 = vpop.f32.mrf.mxu0 }
 0x50b   :  { %v1480_v28 = vadd.f32 %v1472_v5, %v1420_v56  ;;  %vm1495_vm8 = vcmp.gt.f32.partialorder %v1491_v24, %v3892_v27  ;;  %v1499_v62 = vsub.f32 %v1491_v24, %v3892_v27  ;;  %vm1507_vm11 = vcmp.lt.f32.partialorder %v1491_v24, %v3343_v25 }
 0x50c   :  { %v1511_v36 = vadd.f32 %v3892_v27, %v1491_v24  ;;  %v1381_v11 = vpop.f32.mrf.mxu3 }
 0x50d   :  { %v1484_v39 = vmul.f32 %v1480_v28, %v3330_v19  ;;  %v1503_v32 = vsel %vm1495_vm8, %v1499_v62, 0.0  ;;  %v1423_v50 = vadd.f32 %v1422_v2, %v1381_v11 }
 0x50e   :  { %v1515_v55 = vsel %vm1507_vm11, %v1511_v36, 0.0 }
 0x50f   :  { %v1488_v7 = vsub.f32 %v3576_v49, %v1484_v39  ;;  %v1519_v17 = vadd.f32 %v1515_v55, %v1503_v32  ;;  %v1526_v32 = vrot.slane %v3878_v30, 7 }
 0x511   :  { %v1492_v59 = vadd.f32 %v3883_v16, %v1488_v7  ;;  %v1523_v48 = vsub.f32 %v3566_v38, %v1519_v17 }
 0x512   :  { %v1475_v31 = vpop.f32.mrf.mxu1 }
 0x513   :  { %v1481_v63 = vadd.f32 %v1475_v31, %v1423_v50  ;;  %2878 = vmatmul.msk.f32.gmra.mxu2 %vm529_vm10, %v1523_v48  ;;  %v1621_v18 = vrot.slane %v1523_v48, 1  ;;  %vm1496_vm13 = vcmp.gt.f32.partialorder %v1492_v59, %v3892_v27  ;;  %v1500_v13 = vsub.f32 %v1492_v59, %v3892_v27 }
 0x514   :  { %vm1508_vm14 = vcmp.lt.f32.partialorder %v1492_v59, %v3343_v25  ;;  %v1512_v44 = vadd.f32 %v3892_v27, %v1492_v59 }
 0x515   :  { %v1485_v61 = vmul.f32 %v1481_v63, %v3330_v19  ;;  %v1626_v38 = vsel %vm205_vm2, %v1620_v60, %v1621_v18  ;;  %v1504_v58 = vsel %vm1496_vm13, %v1500_v13, 0.0 }
 0x516   :  { %2885 = vmatmul.msk.f32.vlgmr.msrb.gmra.mxu0 %vm529_vm10, %v1626_v38  ;;  %v1516_v0 = vsel %vm1508_vm14, %v1512_v44, 0.0 }
 0x517   :  { %v1489_v1 = vsub.f32 %v3586_v9, %v1485_v61  ;;  %v1520_v41 = vadd.f32 %v1516_v0, %v1504_v58  ;;  %2918 = vmatpush.msk.msrb.mxu0 %vm325_vm6, %v3635_v46 }
 0x519   :  { %v1493_v3 = vadd.f32 %v3883_v16, %v1489_v1  ;;  %v1524_v42 = vsub.f32 %v3576_v49, %v1520_v41 }
 0x51b   :  { %2879 = vmatmul.msk.f32.gmra.mxu2 %vm529_vm10, %v1524_v42  ;;  %v1622_v22 = vrot.slane %v1524_v42, 1  ;;  %vm1497_vm15 = vcmp.gt.f32.partialorder %v1493_v3, %v3892_v27  ;;  %v1501_v24 = vsub.f32 %v1493_v3, %v3892_v27  ;;  %vm1509_vm7 = vcmp.lt.f32.partialorder %v1493_v3, %v3343_v25 }
 0x51c   :  { %v1513_v56 = vadd.f32 %v3892_v27, %v1493_v3  ;;  %v1528_v50 = vrot.slane %v1524_v42, 7 }
 0x51d   :  { %v1625_v5 = vsel %vm205_vm2, %v1621_v18, %v1622_v22  ;;  %v1505_v28 = vsel %vm1497_vm15, %v1501_v24, 0.0 }
 0x51e   :  { %v1629_v46 = vsel %vm111_vm3, 0.0, %v1625_v5  ;;  %v1517_v62 = vsel %vm1509_vm7, %v1513_v56, 0.0 }
 0x51f   :  { %2886 = vmatmul.msk.f32.gmra.mxu0 %vm529_vm10, %v1629_v46  ;;  %v1521_v49 = vadd.f32 %v1517_v62, %v1505_v28 }
 0x521   :  { %v1525_v36 = vsub.f32 %v3586_v9, %v1521_v49  ;;  %v1527_v9 = vrot.slane %v1523_v48, 7 }
 0x523   :  { %v1529_v39 = vrot.slane %v1525_v36, 7  ;;  %2880 = vmatmul.msk.f32.gmra.mxu2 %vm529_vm10, %v1525_v36  ;;  %v1623_v11 = vrot.slane %v1525_v36, 1  ;;  %v1532_v2 = vsel %vm134_vm1, %v1526_v32, %v1527_v9  ;;  %v1531_v31 = vsel %vm134_vm1, %v1527_v9, %v1528_v50 }
 0x525   :  { %v1533_v55 = vsel %vm134_vm1, %v1529_v39, %v1526_v32  ;;  %v1624_v7 = vsel %vm205_vm2, %v1622_v22, %v1623_v11  ;;  %v1627_v30 = vsel %vm205_vm2, %v1623_v11, %v1620_v60  ;;  %v1530_v48 = vsel %vm134_vm1, %v1528_v50, %v1529_v39 }
 0x526   :  { %v1534_v17 = vsel %vm106_vm0, 0.0, %v1533_v55  ;;  %v1631_v59 = vsel %vm125_vm4, 0.0, %v1627_v30 }
 0x527   :  { %2881 = vmatmul.msk.f32.vlgmr.msra.gmra.mxu3 %vm529_vm10, %v1534_v17  ;;  %2887 = vmatmul.msk.f32.gmra.mxu0 %vm529_vm10, %v1624_v7 }
 0x528   :  { %2913 = vmatpush.msk.msra.mxu3 %vm325_vm6, %v3630_v40  ;;  %v1536_v40 = vsel %vm116_vm5, 0.0, %v1531_v31 }
 0x52f   :  { %2882 = vmatmul.msk.f32.gmra.mxu3 %vm529_vm10, %v1532_v2  ;;  %2888 = vmatmul.msk.f32.gmra.mxu0 %vm529_vm10, %v1631_v59 }
 0x537   :  { %2883 = vmatmul.msk.f32.gmra.mxu3 %vm529_vm10, %v1536_v40 }
 0x53f   :  { %2884 = vmatmul.msk.f32.gmra.mxu3 %vm529_vm10, %v1530_v48 }
 0x58c   :  { %v1567_v60 = vpop.f32.mrf.mxu2 }
 0x593   :  { %v1661_v63 = vpop.f32.mrf.mxu0 }
 0x596   :  { %v1570_v61 = vpop.f32.mrf.mxu2 }
 0x59c   :  { %v1664_v58 = vpop.f32.mrf.mxu0 }
 0x59e   :  { %v1573_v28 = vpop.f32.mrf.mxu2 }
 0x5a4   :  { %v1667_v49 = vpop.f32.mrf.mxu0 }
 0x5a6   :  { %v1576_v2 = vpop.f32.mrf.mxu2 }
 0x5aa   :  { %v1608_v18 = vpop.f32.mrf.mxu3 }
 0x5ab   :  { %v1609_v13 = vadd.f32 %v1608_v18, %v1567_v60 }
 0x5ad   :  { %v1673_v44 = vadd.f32 %v1661_v63, %v1609_v13  ;;  %v3995_v63 = vld [vmem:[%s4427_s13] ss:$0 sm:$0xff] }
 0x5af   :  { %v1677_v38 = vmul.f32 %v1673_v44, %v3448_v4 }
 0x5b1   :  { %v1681_v0 = vsub.f32 %v3469_v37, %v1677_v38  ;;  %v2989_v38 = vld [vmem:[%s4416_s2] sm:$0xf] }
 0x5b2   :  { %v1611_v1 = vpop.f32.mrf.mxu3 }
 0x5b3   :  { %v1685_v41 = vadd.f32 %v3453_v6, %v1681_v0  ;;  %v1612_v3 = vadd.f32 %v1611_v1, %v1570_v61 }
 0x5b5   :  { %v1674_v42 = vadd.f32 %v1664_v58, %v1612_v3  ;;  %vm1689_vm8 = vcmp.gt.f32.partialorder %v1685_v41, %v3459_v14  ;;  %v1693_v22 = vsub.f32 %v1685_v41, %v3459_v14  ;;  %vm1701_vm11 = vcmp.lt.f32.partialorder %v1685_v41, %v3461_v15 }
 0x5b6   :  { %v1705_v24 = vadd.f32 %v3459_v14, %v1685_v41 }
 0x5b7   :  { %v1678_v56 = vmul.f32 %v1674_v42, %v3448_v4  ;;  %v1697_v5 = vsel %vm1689_vm8, %v1693_v22, 0.0 }
 0x5b8   :  { %v1709_v46 = vsel %vm1701_vm11, %v1705_v24, 0.0 }
 0x5b9   :  { %v1682_v37 = vsub.f32 %v3479_v54, %v1678_v56  ;;  %v3965_v62 = vadd.f32 %v1709_v46, %v1697_v5 }
 0x5ba   :  { %v1614_v36 = vpop.f32.mrf.mxu3 }
 0x5bb   :  { %v1686_v39 = vadd.f32 %v3453_v6, %v1682_v37  ;;  %v1615_v32 = vadd.f32 %v1614_v36, %v1573_v28  ;;  %2889 = vmatmul.msk.f32.vlgmr.msrb.gmra.mxu1 %vm728_vm12, %v3965_v62  ;;  %v1717_v46 = vrot.slane %v3965_v62, 7 }
 0x5bc   :  { %2923 = vmatpush.msk.msrb.mxu1 %vm325_vm6, %v3622_v45  ;;  %v3983_v45 = vld [vmem:[%s4424_s10] ss:$0 sm:$0xff] }
 0x5bd   :  { %v1675_v11 = vadd.f32 %v1667_v49, %v1615_v32  ;;  %vm1690_vm13 = vcmp.gt.f32.partialorder %v1686_v39, %v3459_v14  ;;  %v1694_v55 = vsub.f32 %v1686_v39, %v3459_v14  ;;  %vm1702_vm14 = vcmp.lt.f32.partialorder %v1686_v39, %v3461_v15 }
 0x5be   :  { %v1706_v54 = vadd.f32 %v3459_v14, %v1686_v39  ;;  %v1811_v14 = vrot.slane %v3965_v62, 1 }
 0x5bf   :  { %v1679_v7 = vmul.f32 %v1675_v11, %v3448_v4  ;;  %v1698_v17 = vsel %vm1690_vm13, %v1694_v55, 0.0  ;;  %v2990_v11 = vld [vmem:[%s4416_s2 + $0x4] sm:$0xf] }
 0x5c0   :  { %v1710_v6 = vsel %vm1702_vm14, %v1706_v54, 0.0 }
 0x5c1   :  { %v1683_v9 = vsub.f32 %v3494_v23, %v1679_v7  ;;  %v3978_v30 = vadd.f32 %v1710_v6, %v1698_v17  ;;  %v1670_v23 = vpop.f32.mrf.mxu0 }
 0x5c2   :  { %v1617_v59 = vpop.f32.mrf.mxu3 }
 0x5c3   :  { %v1687_v50 = vadd.f32 %v3983_v45, %v1683_v9  ;;  %v1618_v31 = vadd.f32 %v1617_v59, %v1576_v2  ;;  %2890 = vmatmul.msk.f32.gmra.mxu1 %vm728_vm12, %v3978_v30  ;;  %v1812_v40 = vrot.slane %v3978_v30, 1  ;;  %v1718_v55 = vrot.slane %v3978_v30, 7 }
 0x5c5   :  { %v1676_v48 = vadd.f32 %v1670_v23, %v1618_v31  ;;  %v1817_v60 = vsel %vm205_vm2, %v1811_v14, %v1812_v40  ;;  %vm1691_vm15 = vcmp.gt.f32.partialorder %v1687_v50, %v3995_v63  ;;  %v1695_v18 = vsub.f32 %v1687_v50, %v3995_v63 }
 0x5c6   :  { %2897 = vmatmul.msk.f32.vlgmr.msrb.gmra.mxu3 %vm728_vm12, %v1817_v60  ;;  %vm1703_vm7 = vcmp.lt.f32.partialorder %v1687_v50, %v3461_v15  ;;  %v1707_v13 = vadd.f32 %v3995_v63, %v1687_v50  ;;  %v1723_v7 = vsel %vm134_vm1, %v1717_v46, %v1718_v55 }
 0x5c7   :  { %v1680_v44 = vmul.f32 %v1676_v48, %v3448_v4  ;;  %v1699_v61 = vsel %vm1691_vm15, %v1695_v18, 0.0  ;;  %2933 = vmatpush.msk.msrb.mxu3 %vm325_vm6, %v2989_v38  ;;  %v2991_v18 = vld [vmem:[%s4416_s2 + $0x8] sm:$0xf] }
 0x5c8   :  { %v1711_v58 = vsel %vm1703_vm7, %v1707_v13, 0.0 }
 0x5c9   :  { %v1684_v0 = vsub.f32 %v3509_v43, %v1680_v44  ;;  %v4008_v1 = vadd.f32 %v1711_v58, %v1699_v61 }
 0x5cb   :  { %v1688_v41 = vadd.f32 %v3983_v45, %v1684_v0  ;;  %2891 = vmatmul.msk.f32.gmra.mxu1 %vm728_vm12, %v4008_v1  ;;  %v1813_v3 = vrot.slane %v4008_v1, 1  ;;  %v1719_v6 = vrot.slane %v4008_v1, 7 }
 0x5cd   :  { %v1816_v42 = vsel %vm205_vm2, %v1812_v40, %v1813_v3  ;;  %vm1692_vm8 = vcmp.gt.f32.partialorder %v1688_v41, %v3995_v63  ;;  %v1696_v22 = vsub.f32 %v1688_v41, %v3995_v63  ;;  %vm1704_vm11 = vcmp.lt.f32.partialorder %v1688_v41, %v3461_v15 }
 0x5ce   :  { %v1820_v43 = vsel %vm111_vm3, 0.0, %v1816_v42  ;;  %v1708_v24 = vadd.f32 %v3995_v63, %v1688_v41  ;;  %v1722_v9 = vsel %vm134_vm1, %v1718_v55, %v1719_v6 }
 0x5cf   :  { %2898 = vmatmul.msk.f32.gmra.mxu3 %vm728_vm12, %v1820_v43  ;;  %v1700_v56 = vsel %vm1692_vm8, %v1696_v22, 0.0  ;;  %v1727_v2 = vsel %vm116_vm5, 0.0, %v1722_v9  ;;  %v2992_v43 = vld [vmem:[%s4417_s3] sm:$0xff]  ;;  %v2993_v9 = vld [vmem:[%s4417_s3 + $0x8] sm:$0xff] }
 0x5d0   :  { %v1712_v5 = vsel %vm1704_vm11, %v1708_v24, 0.0 }
 0x5d1   :  { %v4023_v28 = vadd.f32 %v1712_v5, %v1700_v56 }
 0x5d3   :  { %2892 = vmatmul.msk.f32.gmra.mxu1 %vm728_vm12, %v4023_v28  ;;  %v1720_v37 = vrot.slane %v4023_v28, 7  ;;  %v1814_v49 = vrot.slane %v4023_v28, 1 }
 0x5d5   :  { %v1724_v36 = vsel %vm134_vm1, %v1720_v37, %v1717_v46  ;;  %v1815_v39 = vsel %vm205_vm2, %v1813_v3, %v1814_v49  ;;  %v1818_v54 = vsel %vm205_vm2, %v1814_v49, %v1811_v14  ;;  %v1721_v59 = vsel %vm134_vm1, %v1719_v6, %v1720_v37 }
 0x5d6   :  { %v1725_v32 = vsel %vm106_vm0, 0.0, %v1724_v36  ;;  %v1822_v17 = vsel %vm125_vm4, 0.0, %v1818_v54 }
 0x5d7   :  { %2893 = vmatmul.msk.f32.vlgmr.msrb.gmra.mxu2 %vm728_vm12, %v1725_v32  ;;  %2899 = vmatmul.msk.f32.gmra.mxu3 %vm728_vm12, %v1815_v39 }
 0x5d8   :  { %2928 = vmatpush.msk.msrb.mxu2 %vm325_vm6, %v2990_v11 }
 0x5df   :  { %2894 = vmatmul.msk.f32.gmra.mxu2 %vm728_vm12, %v1723_v7  ;;  %2900 = vmatmul.msk.f32.gmra.mxu3 %vm728_vm12, %v1822_v17 }
 0x5e7   :  { %2895 = vmatmul.msk.f32.gmra.mxu2 %vm728_vm12, %v1727_v2 }
 0x5ef   :  { %2896 = vmatmul.msk.f32.gmra.mxu2 %vm728_vm12, %v1721_v59 }
 0x638   :  { %v1758_v50 = vpop.f32.mrf.mxu1 }
 0x640   :  { %v1761_v48 = vpop.f32.mrf.mxu1 }
 0x648   :  { %v1764_v0 = vpop.f32.mrf.mxu1 }
 0x649   :  { %v1852_v31 = vpop.f32.mrf.mxu3 }
 0x650   :  { %v1767_v46 = vpop.f32.mrf.mxu1 }
 0x652   :  { %v1855_v60 = vpop.f32.mrf.mxu3 }
 0x65a   :  { %v1799_v14 = vpop.f32.mrf.mxu2  ;;  %v1858_v3 = vpop.f32.mrf.mxu3 }
 0x65b   :  { %v1800_v40 = vadd.f32 %v1799_v14, %v1758_v50 }
 0x65d   :  { %v4060_v23 = vadd.f32 %v1852_v31, %v1800_v40 }
 0x65f   :  { %2901 = vmatmul.msk.f32.vlgmr.msra.gmra.mxu0 %vm529_vm10, %v4060_v23  ;;  %v1962_v38 = vrot.slane %v4060_v23, 1  ;;  %v1868_v11 = vrot.slane %v4060_v23, 7 }
 0x660   :  { %2938 = vmatpush.msk.msra.mxu0 %vm325_vm6, %v2991_v18 }
 0x662   :  { %v1802_v13 = vpop.f32.mrf.mxu2  ;;  %v1861_v39 = vpop.f32.mrf.mxu3 }
 0x663   :  { %v1803_v44 = vadd.f32 %v1802_v13, %v1761_v48 }
 0x665   :  { %v4068_v61 = vadd.f32 %v1855_v60, %v1803_v44 }
 0x667   :  { %2902 = vmatmul.msk.f32.gmra.mxu0 %vm529_vm10, %v4068_v61  ;;  %v1963_v58 = vrot.slane %v4068_v61, 1  ;;  %v1869_v2 = vrot.slane %v4068_v61, 7 }
 0x669   :  { %v1968_v41 = vsel %vm205_vm2, %v1962_v38, %v1963_v58  ;;  %v1874_v50 = vsel %vm134_vm1, %v1868_v11, %v1869_v2 }
 0x66a   :  { %v1805_v42 = vpop.f32.mrf.mxu2  ;;  %2909 = vmatmul.msk.f32.vlgmr.msra.gmra.mxu2 %vm529_vm10, %v1968_v41 }
 0x66b   :  { %v1806_v22 = vadd.f32 %v1805_v42, %v1764_v0  ;;  %2597 = vmatpush.msra.mxu2 %v2992_v43 }
 0x66d   :  { %v4080_v24 = vadd.f32 %v1858_v3, %v1806_v22  ;;  %v2994_v3 = vld [vmem:[%s4417_s3 + $0x10] sm:$0xff] }
 0x66f   :  { %2903 = vmatmul.msk.f32.gmra.mxu0 %vm529_vm10, %v4080_v24  ;;  %v1964_v56 = vrot.slane %v4080_v24, 1  ;;  %v1870_v14 = vrot.slane %v4080_v24, 7 }
 0x671   :  { %v1967_v5 = vsel %vm205_vm2, %v1963_v58, %v1964_v56  ;;  %v1873_v40 = vsel %vm134_vm1, %v1869_v2, %v1870_v14 }
 0x672   :  { %v1808_v37 = vpop.f32.mrf.mxu2  ;;  %v1971_v49 = vsel %vm111_vm3, 0.0, %v1967_v5  ;;  %v1878_v48 = vsel %vm116_vm5, 0.0, %v1873_v40 }
 0x673   :  { %v1809_v36 = vadd.f32 %v1808_v37, %v1767_v46  ;;  %2910 = vmatmul.msk.f32.gmra.mxu2 %vm529_vm10, %v1971_v49 }
 0x675   :  { %v4090_v32 = vadd.f32 %v1861_v39, %v1809_v36 }
 0x677   :  { %2904 = vmatmul.msk.f32.gmra.mxu0 %vm529_vm10, %v4090_v32  ;;  %v1871_v55 = vrot.slane %v4090_v32, 7  ;;  %v1965_v54 = vrot.slane %v4090_v32, 1 }
 0x679   :  { %v1875_v7 = vsel %vm134_vm1, %v1871_v55, %v1868_v11  ;;  %v1966_v17 = vsel %vm205_vm2, %v1964_v56, %v1965_v54  ;;  %v1969_v59 = vsel %vm205_vm2, %v1965_v54, %v1962_v38  ;;  %v1872_v60 = vsel %vm134_vm1, %v1870_v14, %v1871_v55 }
 0x67a   :  { %v1876_v6 = vsel %vm106_vm0, 0.0, %v1875_v7  ;;  %v1973_v31 = vsel %vm125_vm4, 0.0, %v1969_v59 }
 0x67b   :  { %2905 = vmatmul.msk.f32.vlgmr.msra.gmra.mxu1 %vm529_vm10, %v1876_v6  ;;  %2911 = vmatmul.msk.f32.gmra.mxu2 %vm529_vm10, %v1966_v17 }
 0x67c   :  { %2556 = vmatpush.msra.mxu1 %v2993_v9 }
 0x683   :  { %2906 = vmatmul.msk.f32.gmra.mxu1 %vm529_vm10, %v1874_v50  ;;  %2912 = vmatmul.msk.f32.gmra.mxu2 %vm529_vm10, %v1973_v31 }
 0x68b   :  { %2907 = vmatmul.msk.f32.gmra.mxu1 %vm529_vm10, %v1878_v48 }
 0x693   :  { %2908 = vmatmul.msk.f32.gmra.mxu1 %vm529_vm10, %v1872_v60 }
 0x6dc   :  { %v1909_v18 = vpop.f32.mrf.mxu0 }
 0x6e4   :  { %v1912_v0 = vpop.f32.mrf.mxu0 }
 0x6ec   :  { %v1915_v46 = vpop.f32.mrf.mxu0 }
 0x6ed   :  { %v2003_v13 = vpop.f32.mrf.mxu2 }
 0x6f4   :  { %v1918_v7 = vpop.f32.mrf.mxu0 }
 0x6f6   :  { %v2006_v41 = vpop.f32.mrf.mxu2 }
 0x6f8   :  { %v1950_v44 = vpop.f32.mrf.mxu1 }
 0x6f9   :  { %v1951_v38 = vadd.f32 %v1950_v44, %v1909_v18 }
 0x6fb   :  { %v4126_v58 = vadd.f32 %v2003_v13, %v1951_v38 }
 0x6fd   :  { %2914 = vmatmul.msk.f32.vlgmr.msra.gmra.mxu3 %vm312_vm9, %v4126_v58  ;;  %v2113_v56 = vrot.slane %v4126_v58, 1  ;;  %v2019_v50 = vrot.slane %v4126_v58, 7 }
 0x6fe   :  { %2650 = vmatpush.msra.mxu3 %v2994_v3  ;;  %v2009_v49 = vpop.f32.mrf.mxu2 }
 0x700   :  { %v1953_v42 = vpop.f32.mrf.mxu1 }
 0x701   :  { %v1954_v22 = vadd.f32 %v1953_v42, %v1912_v0 }
 0x703   :  { %v4133_v43 = vadd.f32 %v2006_v41, %v1954_v22 }
 0x705   :  { %2915 = vmatmul.msk.f32.gmra.mxu3 %vm312_vm9, %v4133_v43  ;;  %v2114_v5 = vrot.slane %v4133_v43, 1  ;;  %v2020_v18 = vrot.slane %v4133_v43, 7 }
 0x706   :  { %v2012_v2 = vpop.f32.mrf.mxu2 }
 0x707   :  { %v2119_v37 = vsel %vm205_vm2, %v2113_v56, %v2114_v5  ;;  %v2025_v44 = vsel %vm134_vm1, %v2019_v50, %v2020_v18 }
 0x708   :  { %v1956_v36 = vpop.f32.mrf.mxu1  ;;  %2924 = vmatmul.msk.f32.vlgmr.msrb.gmra.mxu1 %vm312_vm9, %v2119_v37 }
 0x709   :  { %v1957_v39 = vadd.f32 %v1956_v36, %v1915_v46 }
 0x70b   :  { %v4142_v11 = vadd.f32 %v2009_v49, %v1957_v39 }
 0x70d   :  { %2916 = vmatmul.msk.f32.gmra.mxu3 %vm312_vm9, %v4142_v11  ;;  %v2115_v55 = vrot.slane %v4142_v11, 1  ;;  %v2021_v0 = vrot.slane %v4142_v11, 7 }
 0x70f   :  { %v2118_v54 = vsel %vm205_vm2, %v2114_v5, %v2115_v55  ;;  %v2024_v41 = vsel %vm134_vm1, %v2020_v18, %v2021_v0 }
 0x710   :  { %v1959_v17 = vpop.f32.mrf.mxu1  ;;  %v2122_v6 = vsel %vm111_vm3, 0.0, %v2118_v54  ;;  %v2029_v3 = vsel %vm116_vm5, 0.0, %v2024_v41 }
 0x711   :  { %v1960_v9 = vadd.f32 %v1959_v17, %v1918_v7  ;;  %2925 = vmatmul.msk.f32.gmra.mxu1 %vm312_vm9, %v2122_v6 }
 0x713   :  { %v4152_v59 = vadd.f32 %v2012_v2, %v1960_v9 }
 0x715   :  { %2917 = vmatmul.msk.f32.gmra.mxu3 %vm312_vm9, %v4152_v59  ;;  %v2022_v31 = vrot.slane %v4152_v59, 7  ;;  %v2116_v14 = vrot.slane %v4152_v59, 1 }
 0x717   :  { %v2026_v40 = vsel %vm134_vm1, %v2022_v31, %v2019_v50  ;;  %v2117_v48 = vsel %vm205_vm2, %v2115_v55, %v2116_v14  ;;  %v2120_v13 = vsel %vm205_vm2, %v2116_v14, %v2113_v56  ;;  %v2023_v42 = vsel %vm134_vm1, %v2021_v0, %v2022_v31 }
 0x718   :  { %v2027_v60 = vsel %vm106_vm0, 0.0, %v2026_v40  ;;  %v2124_v38 = vsel %vm125_vm4, 0.0, %v2120_v13 }
 0x719   :  { %2919 = vmatmul.msk.f32.vlgmr.msrb.gmra.mxu0 %vm312_vm9, %v2027_v60  ;;  %2926 = vmatmul.msk.f32.gmra.mxu1 %vm312_vm9, %v2117_v48 }
 0x71a   :  { %2756 = vmatpush.msrb.mxu0 %v2731_v10 }
 0x721   :  { %2920 = vmatmul.msk.f32.gmra.mxu0 %vm312_vm9, %v2025_v44  ;;  %2927 = vmatmul.msk.f32.gmra.mxu1 %vm312_vm9, %v2124_v38 }
 0x729   :  { %2921 = vmatmul.msk.f32.gmra.mxu0 %vm312_vm9, %v2029_v3 }
 0x731   :  { %2922 = vmatmul.msk.f32.gmra.mxu0 %vm312_vm9, %v2023_v42 }
 0x780   :  { %v2060_v22 = vpop.f32.mrf.mxu3 }
 0x785   :  { %v2154_v56 = vpop.f32.mrf.mxu1 }
 0x788   :  { %v2063_v49 = vpop.f32.mrf.mxu3 }
 0x78e   :  { %v2157_v39 = vpop.f32.mrf.mxu1 }
 0x790   :  { %v2066_v6 = vpop.f32.mrf.mxu3 }
 0x796   :  { %v2101_v5 = vpop.f32.mrf.mxu0  ;;  %v2160_v50 = vpop.f32.mrf.mxu1 }
 0x797   :  { %v2102_v46 = vadd.f32 %v2101_v5, %v2060_v22 }
 0x798   :  { %v2069_v60 = vpop.f32.mrf.mxu3 }
 0x799   :  { %v2166_v37 = vadd.f32 %v2154_v56, %v2102_v46 }
 0x79b   :  { %v2170_v36 = vsub.f32 %v2166_v37, %v3709_v34 }
 0x79d   :  { %2212 = vperm.xlu2 %2961, %v2170_v36   ;;  %v2238_v9 = vrot.slane %v2170_v36, 1  ;;  %v2174_v56 = vrot.slane %v2170_v36, 7 }
 0x79e   :  { %v2104_v55 = vpop.f32.mrf.mxu0  ;;  %v2163_v13 = vpop.f32.mrf.mxu1 }
 0x79f   :  { %v2105_v54 = vadd.f32 %v2104_v55, %v2063_v49 }
 0x7a1   :  { %v2167_v7 = vadd.f32 %v2157_v39, %v2105_v54 }
 0x7a3   :  { %v2171_v17 = vsub.f32 %v2167_v7, %v3715_v8 }
 0x7a5   :  { %v2239_v2 = vrot.slane %v2171_v17, 1  ;;  %v2175_v36 = vrot.slane %v2171_v17, 7 }
 0x7a6   :  { %v2107_v31 = vpop.f32.mrf.mxu0 }
 0x7a7   :  { %v2244_v14 = vsel %vm205_vm2, %v2238_v9, %v2239_v2  ;;  %v2108_v40 = vadd.f32 %v2107_v31, %v2066_v6  ;;  %v2180_v39 = vsel %vm134_vm1, %v2174_v56, %v2175_v36 }
 0x7a8   :  { %2252 = vperm.xlu1 %2960, %v2244_v14  }
 0x7a9   :  { %v2168_v48 = vadd.f32 %v2160_v50, %v2108_v40 }
 0x7ab   :  { %v2172_v44 = vsub.f32 %v2168_v48, %v3723_v21 }
 0x7ad   :  { %v2176_v0 = vrot.slane %v2172_v44, 7 }
 0x7ae   :  { %v2110_v34 = vpop.f32.mrf.mxu0 }
 0x7af   :  { %v2111_v18 = vadd.f32 %v2110_v34, %v2069_v60  ;;  %v2179_v54 = vsel %vm134_vm1, %v2175_v36, %v2176_v0 }
 0x7b0   :  { %v2184_v7 = vsel %vm116_vm5, 0.0, %v2179_v54 }
 0x7b1   :  { %v2169_v38 = vadd.f32 %v2163_v13, %v2111_v18 }
 0x7b3   :  { %v2173_v8 = vsub.f32 %v2169_v38, %v3729_v29  ;;  %v2240_v29 = vrot.slane %v2172_v44, 1 }
 0x7b5   :  { %2227 = vperm.xlu0 %2959, %v2173_v8   ;;  %v2177_v41 = vrot.slane %v2173_v8, 7  ;;  %v2241_v3 = vrot.slane %v2173_v8, 1  ;;  %v2243_v37 = vsel %vm205_vm2, %v2239_v2, %v2240_v29 }
 0x7b6   :  { %v2247_v49 = vsel %vm111_vm3, 0.0, %v2243_v37 }
 0x7b7   :  { %v2178_v42 = vsel %vm134_vm1, %v2176_v0, %v2177_v41  ;;  %v2245_v22 = vsel %vm205_vm2, %v2241_v3, %v2238_v9  ;;  %v2181_v21 = vsel %vm134_vm1, %v2177_v41, %v2174_v56  ;;  %v2242_v55 = vsel %vm205_vm2, %v2240_v29, %v2241_v3 }
 0x7b8   :  { %2203 = vperm.xlu1 %2960, %v2178_v42   ;;  %v2249_v5 = vsel %vm125_vm4, 0.0, %v2245_v22  ;;  %v2182_v46 = vsel %vm106_vm0, 0.0, %v2181_v21 }
 0x7b9   :  { %2267 = vperm.xlu2 %2961, %v2249_v5  }
 0x7bd   :  { %2188 = vperm.xlu0 %2959, %v2182_v46  }
 0x7c0   :  { %2217 = vperm.xlu1 %2960, %v2171_v17  }
 0x7c1   :  { %2257 = vperm.xlu2 %2961, %v2247_v49  }
 0x7c5   :  { %2193 = vperm.xlu0 %2959, %v2180_v39  }
 0x7c8   :  { %2222 = vperm.xlu1 %2960, %v2172_v44  }
 0x7c9   :  { %2262 = vperm.xlu2 %2961, %v2242_v55  }
 0x7cd   :  { %2198 = vperm.xlu0 %2959, %v2184_v7  }
 0x7f7   :  { %v2213_v6 = vpop.permute.xlu2 %2212 }
 0x7f8   :  { %v2230_v18 = vmul.f32 %v3761_v53, %v2213_v6 }
 0x813   :  { %v2268_v2 = vpop.permute.xlu2 %2267 }
 0x814   :  { %v2273_v40 = vmul.f32 %v3775_v57, %v2268_v2 }
 0x81a   :  { %v2253_v9 = vpop.permute.xlu1 %2252 }
 0x81b   :  { %v2270_v38 = vmul.f32 %v3775_v57, %v2253_v9  ;;  %v2258_v42 = vpop.permute.xlu2 %2257 }
 0x81c   :  { %v2271_v7 = vmul.f32 %v3775_v57, %v2258_v42 }
 0x827   :  { %v2228_v17 = vpop.permute.xlu0 %2227 }
 0x828   :  { %v2233_v31 = vmul.f32 %v3761_v53, %v2228_v17 }
 0x82a   :  { %v2204_v50 = vpop.permute.xlu1 %2203 }
 0x82b   :  { %v2209_v14 = vmul.f32 %v3768_v33, %v2204_v50 }
 0x82d   :  { %v2237_v48 = vadd.f32 %v2233_v31, %v2209_v14 }
 0x82f   :  { %v2277_v60 = vadd.f32 %v2273_v40, %v2237_v48  ;;  %v2189_v34 = vpop.permute.xlu0 %2188  ;;  %v2263_v40 = vpop.permute.xlu2 %2262 }
 0x830   :  { %v2206_v13 = vmul.f32 %v3768_v33, %v2189_v34 }
 0x831   :  { %v2281_v44 = vmul.f32 %v2277_v60, %v3221_v47 }
 0x832   :  { %v2234_v8 = vadd.f32 %v2230_v18, %v2206_v13  ;;  %v2218_v41 = vpop.permute.xlu1 %2217 }
 0x833   :  { %v2285_v0 = vsub.f32 %v4152_v59, %v2281_v44  ;;  %v2231_v37 = vmul.f32 %v3761_v53, %v2218_v41 }
 0x834   :  { %v2274_v3 = vadd.f32 %v2270_v38, %v2234_v8 }
 0x835   :  { %v2289_v22 = vadd.f32 %v3790_v51, %v2285_v0  ;;  %v2272_v0 = vmul.f32 %v3775_v57, %v2263_v40 }
 0x836   :  { %v2278_v56 = vmul.f32 %v2274_v3, %v3221_v47 }
 0x837   :  { %vm2293_vm6 = vcmp.gt.f32.partialorder %v2289_v22, %v3796_v35  ;;  %v2297_v5 = vsub.f32 %v2289_v22, %v3796_v35  ;;  %vm2305_vm13 = vcmp.lt.f32.partialorder %v2289_v22, %v3234_v52  ;;  %v2309_v21 = vadd.f32 %v3796_v35, %v2289_v22  ;;  %v2194_v29 = vpop.permute.xlu0 %2193 }
 0x838   :  { %v2282_v46 = vsub.f32 %v4126_v58, %v2278_v56  ;;  %v2207_v49 = vmul.f32 %v3768_v33, %v2194_v29 }
 0x839   :  { %v2301_v36 = vsel %vm2293_vm6, %v2297_v5, 0.0  ;;  %v2313_v39 = vsel %vm2305_vm13, %v2309_v21, 0.0 }
 0x83a   :  { %v2286_v55 = vadd.f32 %v3790_v51, %v2282_v46  ;;  %v2235_v54 = vadd.f32 %v2231_v37, %v2207_v49  ;;  %v2317_v6 = vadd.f32 %v2313_v39, %v2301_v36  ;;  %v2223_v50 = vpop.permute.xlu1 %2222 }
 0x83b   :  { %v2232_v13 = vmul.f32 %v3761_v53, %v2223_v50 }
 0x83c   :  { %vm2290_vm14 = vcmp.gt.f32.partialorder %v2286_v55, %v3796_v35  ;;  %v2294_v9 = vsub.f32 %v2286_v55, %v3796_v35  ;;  %vm2302_vm15 = vcmp.lt.f32.partialorder %v2286_v55, %v3234_v52  ;;  %v2306_v17 = vadd.f32 %v3796_v35, %v2286_v55 }
 0x83d   :  { %v2275_v2 = vadd.f32 %v2271_v7, %v2235_v54  ;;  %v2321_v18 = vsub.f32 %v4152_v59, %v2317_v6 }
 0x83e   :  { %v2298_v31 = vsel %vm2290_vm14, %v2294_v9, 0.0  ;;  %v2310_v14 = vsel %vm2302_vm15, %v2306_v17, 0.0 }
 0x83f   :  { %v2279_v48 = vmul.f32 %v2275_v2, %v3221_v47  ;;  %v2199_v60 = vpop.permute.xlu0 %2198  ;;  %v2314_v34 = vadd.f32 %v2310_v14, %v2298_v31  ;;  %v2325_v22 = vrot.slane %v2321_v18, 7 }
 0x840   :  { %v2208_v44 = vmul.f32 %v3768_v33, %v2199_v60 }
 0x841   :  { %v2283_v38 = vsub.f32 %v4133_v43, %v2279_v48  ;;  %v2318_v8 = vsub.f32 %v4126_v58, %v2314_v34 }
 0x842   :  { %v2236_v41 = vadd.f32 %v2232_v13, %v2208_v44 }
 0x843   :  { %v2287_v3 = vadd.f32 %v3790_v51, %v2283_v38  ;;  %2929 = vmatmul.msk.f32.vlgmr.msrb.gmra.mxu2 %vm312_vm9, %v2318_v8  ;;  %v2322_v42 = vrot.slane %v2318_v8, 7  ;;  %v2416_v55 = vrot.slane %v2318_v8, 1 }
 0x844   :  { %v2276_v56 = vadd.f32 %v2272_v0, %v2236_v41 }
 0x845   :  { %v2329_v59 = vsel %vm134_vm1, %v2325_v22, %v2322_v42  ;;  %vm2291_vm7 = vcmp.gt.f32.partialorder %v2287_v3, %v3796_v35  ;;  %v2295_v53 = vsub.f32 %v2287_v3, %v3796_v35  ;;  %vm2303_vm8 = vcmp.lt.f32.partialorder %v2287_v3, %v3234_v52 }
 0x846   :  { %v2280_v33 = vmul.f32 %v2276_v56, %v3221_v47  ;;  %v2330_v57 = vsel %vm106_vm0, 0.0, %v2329_v59  ;;  %v2307_v58 = vadd.f32 %v3796_v35, %v2287_v3 }
 0x847   :  { %2934 = vmatmul.msk.f32.vlgmr.msrb.gmra.mxu3 %vm312_vm9, %v2330_v57  ;;  %v2299_v5 = vsel %vm2291_vm7, %v2295_v53, 0.0 }
 0x848   :  { %v2284_v21 = vsub.f32 %v4142_v11, %v2280_v33  ;;  %v2311_v29 = vsel %vm2303_vm8, %v2307_v58, 0.0 }
 0x849   :  { %v2315_v46 = vadd.f32 %v2311_v29, %v2299_v5 }
 0x84a   :  { %v2288_v37 = vadd.f32 %v3790_v51, %v2284_v21 }
 0x84b   :  { %v2319_v49 = vsub.f32 %v4133_v43, %v2315_v46 }
 0x84c   :  { %vm2292_vm11 = vcmp.gt.f32.partialorder %v2288_v37, %v3796_v35  ;;  %v2296_v47 = vsub.f32 %v2288_v37, %v3796_v35  ;;  %vm2304_vm6 = vcmp.lt.f32.partialorder %v2288_v37, %v3234_v52  ;;  %v2308_v36 = vadd.f32 %v3796_v35, %v2288_v37 }
 0x84d   :  { %2930 = vmatmul.msk.f32.gmra.mxu2 %vm312_vm9, %v2319_v49  ;;  %v2417_v39 = vrot.slane %v2319_v49, 1  ;;  %v2323_v54 = vrot.slane %v2319_v49, 7 }
 0x84e   :  { %v2300_v7 = vsel %vm2292_vm11, %v2296_v47, 0.0  ;;  %v2312_v6 = vsel %vm2304_vm6, %v2308_v36, 0.0 }
 0x84f   :  { %v2422_v51 = vsel %vm205_vm2, %v2416_v55, %v2417_v39  ;;  %v2328_v43 = vsel %vm134_vm1, %v2322_v42, %v2323_v54  ;;  %v2316_v9 = vadd.f32 %v2312_v6, %v2300_v7 }
 0x850   :  { %2939 = vmatmul.msk.f32.vlgmr.msra.gmra.mxu0 %vm312_vm9, %v2422_v51  ;;  %2935 = vmatmul.msk.f32.gmra.mxu3 %vm312_vm9, %v2328_v43 }
 0x851   :  { %v2320_v52 = vsub.f32 %v4142_v11, %v2316_v9  ;;  %v2419_v11 = vrot.slane %v2321_v18, 1 }
 0x853   :  { %v2324_v35 = vrot.slane %v2320_v52, 7  ;;  %v2418_v17 = vrot.slane %v2320_v52, 1  ;;  %v2423_v60 = vsel %vm205_vm2, %v2419_v11, %v2416_v55 }
 0x854   :  { %v2427_v34 = vsel %vm125_vm4, 0.0, %v2423_v60 }
 0x855   :  { %2931 = vmatmul.msk.f32.gmra.mxu2 %vm312_vm9, %v2320_v52  ;;  %v2327_v2 = vsel %vm134_vm1, %v2323_v54, %v2324_v35  ;;  %v2421_v50 = vsel %vm205_vm2, %v2417_v39, %v2418_v17  ;;  %v2326_v40 = vsel %vm134_vm1, %v2324_v35, %v2325_v22  ;;  %v2420_v48 = vsel %vm205_vm2, %v2418_v17, %v2419_v11 }
 0x856   :  { %v2332_v31 = vsel %vm116_vm5, 0.0, %v2327_v2  ;;  %v2425_v14 = vsel %vm111_vm3, 0.0, %v2421_v50 }
 0x858   :  { %2936 = vmatmul.msk.f32.gmra.mxu3 %vm312_vm9, %v2332_v31  ;;  %2940 = vmatmul.msk.f32.gmra.mxu0 %vm312_vm9, %v2425_v14 }
 0x85d   :  { %2932 = vmatmul.msk.f32.gmra.mxu2 %vm312_vm9, %v2321_v18 }
 0x860   :  { %2937 = vmatmul.msk.f32.gmra.mxu3 %vm312_vm9, %v2326_v40  ;;  %2941 = vmatmul.msk.f32.gmra.mxu0 %vm312_vm9, %v2420_v48 }
 0x868   :  { %2942 = vmatmul.msk.f32.gmra.mxu0 %vm312_vm9, %v2427_v34 }
 0x8c6   :  { %v2363_v13 = vpop.f32.mrf.mxu2 }
 0x8ca   :  { %v2404_v18 = vpop.f32.mrf.mxu3 }
 0x8cb   :  { %v2405_v44 = vadd.f32 %v2404_v18, %v2363_v13 }
 0x8cd   :  { %v2457_v38 = vpop.f32.mrf.mxu0 }
 0x8ce   :  { %v2469_v8 = vadd.f32 %v2457_v38, %v2405_v44 }
 0x8d0   :  { %v2473_v0 = vmul.f32 %v2469_v8, %v3330_v19  ;;  %v2366_v41 = vpop.f32.mrf.mxu2 }
 0x8d2   :  { %v2477_v3 = vsub.f32 %v4060_v23, %v2473_v0 }
 0x8d3   :  { %v2407_v42 = vpop.f32.mrf.mxu3 }
 0x8d4   :  { %v2481_v22 = vadd.f32 %v3883_v16, %v2477_v3  ;;  %v2408_v56 = vadd.f32 %v2407_v42, %v2366_v41 }
 0x8d5   :  { %v2460_v59 = vpop.f32.mrf.mxu0 }
 0x8d6   :  { %vm2485_vm13 = vcmp.gt.f32.partialorder %v2481_v22, %v3892_v27  ;;  %v2489_v53 = vsub.f32 %v2481_v22, %v3892_v27  ;;  %vm2497_vm9 = vcmp.lt.f32.partialorder %v2481_v22, %v3343_v25  ;;  %v2501_v33 = vadd.f32 %v3892_v27, %v2481_v22 }
 0x8d7   :  { %v2470_v57 = vadd.f32 %v2460_v59, %v2408_v56 }
 0x8d8   :  { %v2493_v58 = vsel %vm2485_vm13, %v2489_v53, 0.0  ;;  %v2505_v5 = vsel %vm2497_vm9, %v2501_v33, 0.0  ;;  %v2369_v46 = vpop.f32.mrf.mxu2  ;;  %vm2738_vm9 = vcmask 1041409  }
 0x8d9   :  { %v2509_v21 = vadd.f32 %v2505_v5, %v2493_v58  ;;  %v2474_v29 = vmul.f32 %v2470_v57, %v3330_v19 }
 0x8db   :  { %v2478_v37 = vsub.f32 %v4068_v61, %v2474_v29  ;;  %v2410_v49 = vpop.f32.mrf.mxu3  ;;  %v4303_v47 = vsub.f32 %v4060_v23, %v2509_v21 }
 0x8dc   :  { %v2411_v36 = vadd.f32 %v2410_v49, %v2369_v46 }
 0x8dd   :  { %v2482_v39 = vadd.f32 %v3883_v16, %v2478_v37  ;;  %v2463_v55 = vpop.f32.mrf.mxu0  ;;  %2943 = vmatmul.msk.f32.vlgmr.msra.gmra.mxu1 %vm529_vm10, %v4303_v47  ;;  %v2611_v11 = vrot.slane %v4303_v47, 1 }
 0x8de   :  { %v2471_v54 = vadd.f32 %v2463_v55, %v2411_v36 }
 0x8df   :  { %vm2486_vm14 = vcmp.gt.f32.partialorder %v2482_v39, %v3892_v27  ;;  %v2490_v7 = vsub.f32 %v2482_v39, %v3892_v27  ;;  %vm2498_vm15 = vcmp.lt.f32.partialorder %v2482_v39, %v3343_v25  ;;  %v2502_v6 = vadd.f32 %v3892_v27, %v2482_v39 }
 0x8e0   :  { %v2475_v51 = vmul.f32 %v2471_v54, %v3330_v19  ;;  %v2372_v35 = vpop.f32.mrf.mxu2 }
 0x8e1   :  { %v2494_v23 = vsel %vm2486_vm14, %v2490_v7, 0.0  ;;  %v2506_v43 = vsel %vm2498_vm15, %v2502_v6, 0.0  ;;  %vm2762_vm14 = vcmask 74752  }
 0x8e2   :  { %v2479_v9 = vsub.f32 %v4080_v24, %v2475_v51  ;;  %v2510_v52 = vadd.f32 %v2506_v43, %v2494_v23 }
 0x8e3   :  { %v2413_v17 = vpop.f32.mrf.mxu3 }
 0x8e4   :  { %v2483_v2 = vadd.f32 %v3883_v16, %v2479_v9  ;;  %v2414_v50 = vadd.f32 %v2413_v17, %v2372_v35  ;;  %v2514_v31 = vsub.f32 %v4068_v61, %v2510_v52  ;;  %v2730_v9 = vld [vmem:[%s4428_s14] sm:$0xff] }
 0x8e5   :  { %v2466_v14 = vpop.f32.mrf.mxu0  ;;  %2757 = vmatpush.msrb.mxu0 %v2730_v9 }
 0x8e6   :  { %v2472_v40 = vadd.f32 %v2466_v14, %v2414_v50  ;;  %2944 = vmatmul.msk.f32.gmra.mxu1 %vm529_vm10, %v2514_v31  ;;  %v2612_v48 = vrot.slane %v2514_v31, 1  ;;  %vm2487_vm7 = vcmp.gt.f32.partialorder %v2483_v2, %v3892_v27  ;;  %v2491_v60 = vsub.f32 %v2483_v2, %v3892_v27 }
 0x8e7   :  { %vm2499_vm8 = vcmp.lt.f32.partialorder %v2483_v2, %v3343_v25  ;;  %v2503_v34 = vadd.f32 %v3892_v27, %v2483_v2 }
 0x8e8   :  { %v2476_v13 = vmul.f32 %v2472_v40, %v3330_v19  ;;  %v2617_v61 = vsel %vm205_vm2, %v2611_v11, %v2612_v48  ;;  %v2495_v18 = vsel %vm2487_vm7, %v2491_v60, 0.0 }
 0x8e9   :  { %2951 = vmatmul.msk.f32.vlgmr.msra.gmra.mxu3 %vm529_vm10, %v2617_v61  ;;  %v2507_v44 = vsel %vm2499_vm8, %v2503_v34, 0.0 }
 0x8ea   :  { %v2480_v38 = vsub.f32 %v4090_v32, %v2476_v13  ;;  %v2511_v8 = vadd.f32 %v2507_v44, %v2495_v18 }
 0x8ec   :  { %v2484_v0 = vadd.f32 %v3883_v16, %v2480_v38  ;;  %v2515_v41 = vsub.f32 %v4080_v24, %v2511_v8 }
 0x8ee   :  { %2945 = vmatmul.msk.f32.gmra.mxu1 %vm529_vm10, %v2515_v41  ;;  %v2613_v3 = vrot.slane %v2515_v41, 1  ;;  %vm2488_vm11 = vcmp.gt.f32.partialorder %v2484_v0, %v3892_v27  ;;  %v2492_v19 = vsub.f32 %v2484_v0, %v3892_v27  ;;  %vm2500_vm6 = vcmp.lt.f32.partialorder %v2484_v0, %v3343_v25 }
 0x8ef   :  { %v2504_v42 = vadd.f32 %v3892_v27, %v2484_v0  ;;  %v2517_v25 = vrot.slane %v4303_v47, 7  ;;  %v2519_v46 = vrot.slane %v2515_v41, 7 }
 0x8f0   :  { %v2616_v22 = vsel %vm205_vm2, %v2612_v48, %v2613_v3  ;;  %v2496_v56 = vsel %vm2488_vm11, %v2492_v19, 0.0 }
 0x8f1   :  { %v2620_v16 = vsel %vm111_vm3, 0.0, %v2616_v22  ;;  %v2508_v59 = vsel %vm2500_vm6, %v2504_v42, 0.0 }
 0x8f2   :  { %2952 = vmatmul.msk.f32.gmra.mxu3 %vm529_vm10, %v2620_v16  ;;  %v2512_v24 = vadd.f32 %v2508_v59, %v2496_v56 }
 0x8f4   :  { %v2516_v53 = vsub.f32 %v4090_v32, %v2512_v24  ;;  %v2518_v32 = vrot.slane %v2514_v31, 7 }
 0x8f6   :  { %v2520_v33 = vrot.slane %v2516_v53, 7  ;;  %2946 = vmatmul.msk.f32.gmra.mxu1 %vm529_vm10, %v2516_v53  ;;  %v2614_v57 = vrot.slane %v2516_v53, 1  ;;  %v2523_v21 = vsel %vm134_vm1, %v2517_v25, %v2518_v32  ;;  %v2522_v37 = vsel %vm134_vm1, %v2518_v32, %v2519_v46 }
 0x8f7   :  { %v2527_v49 = vsel %vm116_vm5, 0.0, %v2522_v37 }
 0x8f8   :  { %v2524_v27 = vsel %vm134_vm1, %v2520_v33, %v2517_v25  ;;  %v2615_v58 = vsel %vm205_vm2, %v2613_v3, %v2614_v57  ;;  %v2618_v5 = vsel %vm205_vm2, %v2614_v57, %v2611_v11  ;;  %v2521_v47 = vsel %vm134_vm1, %v2519_v46, %v2520_v33 }
 0x8f9   :  { %v2525_v12 = vsel %vm106_vm0, 0.0, %v2524_v27  ;;  %v2622_v29 = vsel %vm125_vm4, 0.0, %v2618_v5 }
 0x8fa   :  { %2947 = vmatmul.msk.f32.vlgmr.msra.gmra.mxu2 %vm529_vm10, %v2525_v12  ;;  %2953 = vmatmul.msk.f32.gmra.mxu3 %vm529_vm10, %v2615_v58 }
 0x902   :  { %2948 = vmatmul.msk.f32.gmra.mxu2 %vm529_vm10, %v2523_v21  ;;  %2954 = vmatmul.msk.f32.gmra.mxu3 %vm529_vm10, %v2622_v29 }
 0x90a   :  { %2949 = vmatmul.msk.f32.gmra.mxu2 %vm529_vm10, %v2527_v49 }
 0x912   :  { %2950 = vmatmul.msk.f32.gmra.mxu2 %vm529_vm10, %v2521_v47 }
 0x95a   :  { %v2558_v20 = vpop.f32.mrf.mxu1 }
 0x963   :  { %v2561_v7 = vpop.f32.mrf.mxu1 }
 0x96b   :  { %v2564_v17 = vpop.f32.mrf.mxu1 }
 0x96c   :  { %v2652_v36 = vpop.f32.mrf.mxu3 }
 0x973   :  { %v2567_v3 = vpop.f32.mrf.mxu1 }
 0x975   :  { %v2655_v51 = vpop.f32.mrf.mxu3 }
 0x97d   :  { %v2599_v39 = vpop.f32.mrf.mxu2  ;;  %v2658_v11 = vpop.f32.mrf.mxu3 }
 0x97e   :  { %v2600_v55 = vadd.f32 %v2599_v39, %v2558_v20 }
 0x980   :  { %v2664_v54 = vadd.f32 %v2652_v36, %v2600_v55 }
 0x982   :  { %v2668_v6 = vmul.f32 %v2664_v54, %v3448_v4 }
 0x984   :  { %v2672_v23 = vsub.f32 %v3965_v62, %v2668_v6 }
 0x985   :  { %v2602_v26 = vpop.f32.mrf.mxu2  ;;  %v2661_v59 = vpop.f32.mrf.mxu3 }
 0x986   :  { %v2603_v43 = vadd.f32 %v2602_v26, %v2561_v7  ;;  %v2676_v52 = vadd.f32 %v3983_v45, %v2672_v23 }
 0x988   :  { %v2665_v35 = vadd.f32 %v2655_v51, %v2603_v43  ;;  %v2684_v62 = vsub.f32 %v2676_v52, %v3995_v63  ;;  %v2696_v50 = vadd.f32 %v3995_v63, %v2676_v52  ;;  %vm2680_vm0 = vcmp.gt.f32.partialorder %v2676_v52, %v3995_v63 }
 0x989   :  { %vm2692_vm1 = vcmp.lt.f32.partialorder %v2676_v52, %v3461_v15  ;;  %v2971_v52 = vld [vmem:[%s4429_s15] ss:$0 sm:$0xff]  ;;  %s2782_s15 = sshll.u32 %s3037_s30, 4  ;;  %s2783_s15 = int_to_ptr.vmem [resolvable:$true] %s2782_s15 }
 0x98a   :  { %v2669_v2 = vmul.f32 %v2665_v35, %v3448_v4  ;;  %v2688_v60 = vsel %vm2680_vm0, %v2684_v62, 0.0  ;;  %v2700_v34 = vsel %vm2692_vm1, %v2696_v50, 0.0 }
 0x98b   :  { %v2704_v38 = vadd.f32 %v2700_v34, %v2688_v60 }
 0x98c   :  { %v2673_v31 = vsub.f32 %v3978_v30, %v2669_v2 }
 0x98d   :  { %v2605_v14 = vpop.f32.mrf.mxu2  ;;  %v2708_v16 = vand.u32 2147483647, %v2704_v38 }
 0x98e   :  { %v2606_v40 = vadd.f32 %v2605_v14, %v2564_v17  ;;  %v2677_v48 = vadd.f32 %v3983_v45, %v2673_v31 }
 0x98f   :  { %v2712_v57 = vsel %vm728_vm12, %v2708_v16, -inf }
 0x990   :  { %v2666_v13 = vadd.f32 %v2658_v11, %v2606_v40  ;;  %vm2681_vm2 = vcmp.gt.f32.partialorder %v2677_v48, %v3995_v63  ;;  %v2685_v61 = vsub.f32 %v2677_v48, %v3995_v63  ;;  %vm2693_vm3 = vcmp.lt.f32.partialorder %v2677_v48, %v3461_v15 }
 0x991   :  { %v2697_v18 = vadd.f32 %v3995_v63, %v2677_v48 }
 0x992   :  { %v2670_v44 = vmul.f32 %v2666_v13, %v3448_v4  ;;  %v2689_v30 = vsel %vm2681_vm2, %v2685_v61, 0.0 }
 0x993   :  { %v2701_v8 = vsel %vm2693_vm3, %v2697_v18, 0.0 }
 0x994   :  { %v2705_v0 = vadd.f32 %v2701_v8, %v2689_v30  ;;  %v2674_v41 = vsub.f32 %v4008_v1, %v2670_v44 }
 0x995   :  { %v2608_v19 = vpop.f32.mrf.mxu2 }
 0x996   :  { %v2709_v42 = vand.u32 2147483647, %v2705_v0  ;;  %v2678_v22 = vadd.f32 %v3983_v45, %v2674_v41  ;;  %v2609_v56 = vadd.f32 %v2608_v19, %v2567_v3 }
 0x998   :  { %v2686_v24 = vsub.f32 %v2678_v22, %v3995_v63  ;;  %v2698_v53 = vadd.f32 %v3995_v63, %v2678_v22  ;;  %v2667_v33 = vadd.f32 %v2661_v59, %v2609_v56  ;;  %v2713_v25 = vsel %vm728_vm12, %v2709_v42, -inf }
 0x999   :  { %vm2682_vm4 = vcmp.gt.f32.partialorder %v2678_v22, %v3995_v63  ;;  %vm2694_vm5 = vcmp.lt.f32.partialorder %v2678_v22, %v3461_v15  ;;  %v2714_v27 = vmax.f32 %v2712_v57, %v2713_v25 }
 0x99a   :  { %v2671_v1 = vmul.f32 %v2667_v33, %v3448_v4  ;;  %v2690_v58 = vsel %vm2682_vm4, %v2686_v24, 0.0  ;;  %v2702_v12 = vsel %vm2694_vm5, %v2698_v53, 0.0 }
 0x99b   :  { %v2706_v21 = vadd.f32 %v2702_v12, %v2690_v58  ;;  %v2715_v29 = vrot.slane %v2714_v27, 4 }
 0x99c   :  { %v2675_v32 = vsub.f32 %v4023_v28, %v2671_v1 }
 0x99d   :  { %v2710_v47 = vand.u32 2147483647, %v2706_v21  ;;  %v2716_v36 = vmax.f32 %v2714_v27, %v2715_v29 }
 0x99e   :  { %v2679_v5 = vadd.f32 %v3983_v45, %v2675_v32 }
 0x99f   :  { %v2721_v28 = vsel %vm728_vm12, %v2710_v47, -inf  ;;  %v2717_v55 = vrot.slane %v2716_v36, 2 }
 0x9a0   :  { %vm2683_vm10 = vcmp.gt.f32.partialorder %v2679_v5, %v3995_v63  ;;  %v2687_v46 = vsub.f32 %v2679_v5, %v3995_v63  ;;  %vm2695_vm13 = vcmp.lt.f32.partialorder %v2679_v5, %v3461_v15  ;;  %v2699_v37 = vadd.f32 %v3995_v63, %v2679_v5 }
 0x9a1   :  { %v2718_v6 = vmax.f32 %v2716_v36, %v2717_v55 }
 0x9a2   :  { %v2691_v4 = vsel %vm2683_vm10, %v2687_v46, 0.0  ;;  %v2703_v49 = vsel %vm2695_vm13, %v2699_v37, 0.0 }
 0x9a3   :  { %v2707_v20 = vadd.f32 %v2703_v49, %v2691_v4  ;;  %v2719_v26 = vrot.slane %v2718_v6, 1 }
 0x9a5   :  { %v2711_v39 = vand.u32 2147483647, %v2707_v20  ;;  %v2720_v63 = vmax.f32 %v2718_v6, %v2719_v26 }
 0x9a7   :  { %v2722_v45 = vsel %vm728_vm12, %v2711_v39, -inf }
 0x9a8   :  { %v2723_v54 = vmax.f32 %v2721_v28, %v2722_v45 }
 0x9aa   :  { %v2724_v7 = vrot.slane %v2723_v54, 4 }
 0x9ac   :  { %v2725_v51 = vmax.f32 %v2723_v54, %v2724_v7 }
 0x9ae   :  { %v2726_v23 = vrot.slane %v2725_v51, 2 }
 0x9b0   :  { %v2727_v15 = vmax.f32 %v2725_v51, %v2726_v23 }
 0x9b2   :  { %v2728_v43 = vrot.slane %v2727_v15, 1 }
 0x9b4   :  { %v2729_v10 = vmax.f32 %v2727_v15, %v2728_v43 }
 0x9b6   :  { %v2739_v9 = vsel %vm2738_vm9, %v2729_v10, %v2720_v63 }
 0x9b7   :  { %2955 = vmatmul.msk.f32.vlgmr.msrb.gmra.mxu0 %vm728_vm12, %v2739_v9 }
 0xa34   :  { %v2759_v35 = vpop.f32.mrf.mxu0 }
 0xa35   :  { %v2760_v17 = vadd.f32 %v2971_v52, %v2759_v35 }
 0xa37   :  { %v2763_v2 = vsel %vm2762_vm14, %v2760_v17, -inf }
 0xa38   :  { %2764 = vmax.xlane.f32.xlu0 %v2763_v2 }
 0xaab   :  { %v2765_v62 = vpop.xlane.xlu0 %2764 }
 0xaac   :  { %v2766_v50 = vsub.f32 %v2760_v17, %v2765_v62 }
 0xaae   :  { %v2767_v31 = vmul.f32 1.442695, %v2766_v50 }
 0xab0   :  { %2972 = vpow2.f32 %v2767_v31 }
 0xab6   :  { %v2973_v14 = vpop.eup %2972 }
 0xab7   :  { %v2769_v11 = vsel %vm2762_vm14, %v2973_v14, 0.0 }
 0xab8   :  { %2770 = vadd.xlane.f32.xlu1 %v2769_v11 }
 0xb2b   :  { %v2771_v40 = vpop.xlane.xlu1 %2770 }
 0xb2c   :  { %2974 = vlog2.f32 %v2771_v40 }
 0xb32   :  { %v2975_v48 = vpop.eup %2974 }
 0xb33   :  { %v2773_v60 = vmul.f32 0.6931472, %v2975_v48 }
 0xb35   :  { %v2774_v34 = vadd.f32 %v2773_v60, %v2765_v62 }
 0xb37   :  { %v2775_v13 = vsub.f32 %v2760_v17, %v2774_v34 }
 0xb39   :  { %2776 = vst.msk [vmem:[#allocation5] sm:$0x3] %vm2762_vm14, %v2775_v13 }
 0xb3a   :  { %2787 = dma.vmem_to_hbm [thread:$0]  %s2783_s15, 32, %s2785_s8, [#allocation3]  }
 0xb3b   :  { %3033 = dma.done.wait [#allocation3], 32  }
 0xb3c   :  { %3034 = vsyncadd [#allocation3], 4294967264 }
 0xb3d   :  { %2792 = vsyncpa [#allocation3], 1 }
 0xb3e   :  { %2793 = vsyncpa [#allocation4], 1 }

</bundles_post_ra>
